<compile_context>
chip_gen: v7x
topology: tpu7x:2x2x1
jax: 0.10.0
libtpu: 0.0.40
codegen_flags: <defaults>
</compile_context>

<pallas_src>
import functools

import jax
import jax.numpy as jnp
from jax import lax
from jax.experimental import pallas as pl
from jax.experimental.pallas import tpu as pltpu


# ----------------------------------------------------------------------------
# Pallas kernel: one GAT conv layer for one tile of destination rows
# (matmul + attention + edge softmax + SPMV aggregation + fused activation).
# ----------------------------------------------------------------------------
def _gat_conv_kernel(x_dst_ref, x_src_ref, w_ref, al_ref, ar_ref, adj_ref,
                     o_ref, acc_ref, *, heads, out_channels, negative_slope,
                     activation):
    C = out_channels
    f32 = jnp.float32

    w = w_ref[...]

    # Feature transform for all (src) nodes on the MXU: (N, Fin) @ (Fin, H*C).
    feat = jnp.dot(x_src_ref[...], w, preferred_element_type=f32)      # (N, HC)
    feat_bf = feat.astype(jnp.bfloat16)        # bf16 copy feeding the SPMV matmul

    # src attention scores, row oriented: a1_t[h, j] = <feat[j, hC:(h+1)C], att_l[h]>
    a1_t = lax.dot_general(al_ref[...], feat,
                           dimension_numbers=(((0,), (1,)), ((), ())),
                           preferred_element_type=f32)                 # (H, N)

    # dst attention scores only for this tile's destination rows.
    feat_dst = jnp.dot(x_dst_ref[...], w, preferred_element_type=f32)  # (T, HC)
    a2 = jnp.dot(feat_dst, ar_ref[...], preferred_element_type=f32)    # (T, H)

    # Additive edge mask, hoisted out of the head loop:
    #   0 for edges, -1e30 for non-edges (exp(s - m) underflows to exactly 0 in f32).
    bias = (adj_ref[...].astype(f32) - 1.0) * f32(1e30)                # (T, N)

    # TODO(synk): for very large N, tile the src axis too and use an online
    # (flash-style) softmax so the working set is (T, T_src) instead of (T, N).
    for h in range(heads):  # static; heads is small (8 or 1)
        s = a2[:, h:h + 1] + a1_r[h] if False else a2[:, h:h + 1] + a1_t[h:h + 1, :]
        # leaky_relu: valid as a max because 0 < negative_slope < 1.
        if 0.0 < negative_slope < 1.0:
            s = jnp.maximum(s, negative_slope * s)
        else:
            s = jnp.where(s > 0, s, negative_slope * s)
        s = s + bias                                        # mask non-edges
        m = jnp.max(s, axis=-1, keepdims=True)              # per-dst max
        p = jnp.exp(s - m)                                  # masked -> exactly 0
        z = jnp.sum(p, axis=-1, keepdims=True)              # edge-softmax normalizer
        agg = jnp.dot(p.astype(jnp.bfloat16),
                      feat_bf[:, h * C:(h + 1) * C],
                      preferred_element_type=f32)           # SPMV on the MXU
        # Consume this head's result immediately so s/p temps die per iteration.
        acc_ref[:, h * C:(h + 1) * C] = agg / z

    out = acc_ref[...]
    if activation == "elu":
        # jnp.expm1 would be marginally more accurate near 0; exp(x)-1 kept for
        # guaranteed Mosaic lowering (negligible downstream effect).
        out = jnp.where(out > 0, out, jnp.exp(out) - 1.0)
    elif activation == "log_softmax":
        mx = jnp.max(out, axis=-1, keepdims=True)
        sh = out - mx
        out = sh - jnp.log(jnp.sum(jnp.exp(sh), axis=-1, keepdims=True))
    o_ref[...] = out.astype(o_ref.dtype)


def _pick_tile_n(n):
    """Dst-row tile: multiple of 8 dividing n, capped so a double-buffered bf16
    adj tile plus the f32 score temps fit comfortably in v7x's 64 MiB VMEM,
    and so the grid has >= 2 steps when possible (v7x has 2 TensorCores)."""
    budget = 24 * 1024 * 1024
    per_row = n * (2 * 2 + 3 * 4)      # 2x bf16 adj rows + ~3 f32 temp rows
    cap = max(8, budget // per_row)
    cap = min(cap, max(8, n // 2)) if n >= 16 else n
    for cand in (512, 256, 128, 64, 32, 16, 8):
        if cand <= cap and n % cand == 0:
            return cand
    return n  # tiny / awkward n: single resident block


def gat_conv(x, weight, att_l, att_r, adj, *, heads, out_channels,
             negative_slope, activation=None):
    """One GATSPMVConv layer. x: (N, Fin), weight: (Fin, H*C),
    att_l/att_r: (H, C, 1), adj: (N, N) dense {0,1} mask adj[dst, src]."""
    N, Fin = x.shape
    H, C = heads, out_channels
    HC = H * C

    x = x.astype(jnp.float32)
    adj = adj.astype(jnp.bfloat16)     # {0,1} mask; bf16 halves the O(N^2) traffic

    # Glue: fold per-head attention vectors into block-diagonal projection
    # matrices so a1 = feat @ AL and a2 = feat @ AR are plain MXU matmuls.
    eye = jnp.eye(H, dtype=jnp.float32)
    AL = (att_l[:, :, 0][:, :, None] * eye[:, None, :]).reshape(HC, H)
    AR = (att_r[:, :, 0][:, :, None] * eye[:, None, :]).reshape(HC, H)

    tile_n = _pick_tile_n(N)
    grid = (N // tile_n,)

    kernel = functools.partial(
        _gat_conv_kernel,
        heads=H, out_channels=C,
        negative_slope=float(negative_slope),
        activation=activation,
    )

    return pl.pallas_call(
        kernel,
        grid=grid,
        in_specs=[
            pl.BlockSpec((tile_n, Fin), lambda i: (i, 0)),   # x, this tile's dst rows
            pl.BlockSpec((N, Fin), lambda i: (0, 0)),        # x, all src rows (resident)
            pl.BlockSpec((Fin, HC), lambda i: (0, 0)),       # weight (resident)
            pl.BlockSpec((HC, H), lambda i: (0, 0)),         # AL (resident)
            pl.BlockSpec((HC, H), lambda i: (0, 0)),         # AR (resident)
            pl.BlockSpec((tile_n, N), lambda i: (i, 0)),     # adj row tile (streamed)
        ],
        out_specs=pl.BlockSpec((tile_n, HC), lambda i: (i, 0)),
        out_shape=jax.ShapeDtypeStruct((N, HC), jnp.float32),
        scratch_shapes=[pltpu.VMEM((tile_n, HC), jnp.float32)],
        compiler_params=pltpu.CompilerParams(
            dimension_semantics=("parallel",),
            vmem_limit_bytes=48 * 1024 * 1024,
        ),
    )(x, x, weight.astype(jnp.float32), AL, AR, adj)


# ----------------------------------------------------------------------------
# Full GATSPMV forward (inference mode: dropouts are identity).
# ----------------------------------------------------------------------------
def gat_spmv_forward(x, params, adj, *, num_classes):
    # F.dropout(p=0.6 / p=0.2) paths only fire when training=True; skipped.
    adj = adj.astype(jnp.bfloat16)
    # TODO(synk): a single-pass fusion of conv1+conv2 that streams adj from HBM
    # once is not implemented: every conv2 dst row needs conv1 outputs for all
    # src nodes, so it requires either adj resident in VMEM or a second sweep.
    h = gat_conv(x, params["w1"], params["att_l1"], params["att_r1"], adj,
                 heads=8, out_channels=8, negative_slope=0.6,
                 activation="elu")
    out = gat_conv(h, params["w2"], params["att_l2"], params["att_r2"], adj,
                   heads=1, out_channels=num_classes, negative_slope=0.6,
                   activation="log_softmax")
    return out


def _glorot(key, shape):
    fan_in, fan_out = shape[0], shape[-1] if len(shape) > 1 else shape[0]
    lim = (6.0 / (fan_in + fan_out)) ** 0.5
    return jax.random.uniform(key, shape, jnp.float32, -lim, lim)


if __name__ == "__main__":
    N = 128              # nodes
    IN_CH = 16           # input feature dim
    NUM_CLASSES = 16     # output classes
    HID_HEADS, HID_C = 8, 8   # conv1: heads=8, out_channels=8 -> 64 hidden

    key = jax.random.PRNGKey(0)
    kx, kadj, k1, k2, k3, k4, k5, k6 = jax.random.split(key, 8)

    # deterministic node features
    x = jax.random.normal(kx, (N, IN_CH), dtype=jnp.float32)

    # deterministic random graph (dense adjacency, adj[dst, src]), with
    # self-loops so every dst row has at least one edge (softmax precondition)
    adj = (jax.random.uniform(kadj, (N, N)) < 0.08).astype(jnp.float32)
    adj = jnp.maximum(adj, jnp.eye(N, dtype=jnp.float32))

    # deterministic parameters (self.bias of the reference module is unused)
    params = {
        "w1": _glorot(k1, (IN_CH, HID_HEADS * HID_C)),
        "att_l1": _glorot(k2, (HID_HEADS, HID_C, 1)),
        "att_r1": _glorot(k3, (HID_HEADS, HID_C, 1)),
        "w2": _glorot(k4, (HID_HEADS * HID_C, 1 * NUM_CLASSES)),
        "att_l2": _glorot(k5, (1, NUM_CLASSES, 1)),
        "att_r2": _glorot(k6, (1, NUM_CLASSES, 1)),
    }

    out = gat_spmv_forward(x, params, adj, num_classes=NUM_CLASSES)
    out = jax.block_until_ready(out)

    assert out.shape == (N, NUM_CLASSES)
    assert bool(jnp.all(jnp.isfinite(out)))
    # rows of log_softmax should sum (in prob space) to ~1
    assert bool(jnp.allclose(jnp.sum(jnp.exp(out), axis=1), 1.0, atol=1e-4))
    print("KERNEL_OK")
</pallas_src>

<mosaic_0001>
module attributes {stable_mosaic.version = 11 : i64} {
  func.func @_gat_conv_kernel(%arg0: i32, %arg1: memref<64x16xf32, #tpu.memory_space<vmem>>, %arg2: memref<128x16xf32, #tpu.memory_space<vmem>>, %arg3: memref<16x64xf32, #tpu.memory_space<vmem>>, %arg4: memref<64x8xf32, #tpu.memory_space<vmem>>, %arg5: memref<64x8xf32, #tpu.memory_space<vmem>>, %arg6: memref<64x128xbf16, #tpu.memory_space<vmem>>, %arg7: memref<64x64xf32, #tpu.memory_space<vmem>>, %arg8: memref<64x64xf32, #tpu.memory_space<vmem>>) attributes {dimension_semantics = [#tpu.dimension_semantics<parallel>], iteration_bounds = array<i64: 2>, scalar_prefetch = 0 : i64, scratch_operands = 1 : i64, tpu.core_type = #tpu.core_type<tc>, window_params = [{transform_indices = @transform_0, window_bounds = array<i64: 64, 16>}, {pipeline_mode = #tpu.pipeline_mode<synchronous>, transform_indices = @transform_1, window_bounds = array<i64: 128, 16>}, {pipeline_mode = #tpu.pipeline_mode<synchronous>, transform_indices = @transform_2, window_bounds = array<i64: 16, 64>}, {pipeline_mode = #tpu.pipeline_mode<synchronous>, transform_indices = @transform_3, window_bounds = array<i64: 64, 8>}, {pipeline_mode = #tpu.pipeline_mode<synchronous>, transform_indices = @transform_4, window_bounds = array<i64: 64, 8>}, {transform_indices = @transform_5, window_bounds = array<i64: 64, 128>}, {transform_indices = @transform_6, window_bounds = array<i64: 64, 64>}]} {
    %c0 = arith.constant 0 : index
    %c0_0 = arith.constant 0 : index
    %0 = vector.load %arg3[%c0, %c0_0] : memref<16x64xf32, #tpu.memory_space<vmem>>, vector<16x64xf32>
    %c0_1 = arith.constant 0 : index
    %c0_2 = arith.constant 0 : index
    %1 = vector.load %arg2[%c0_1, %c0_2] : memref<128x16xf32, #tpu.memory_space<vmem>>, vector<128x16xf32>
    %cst = arith.constant dense<0.000000e+00> : vector<128x64xf32>
    %2 = tpu.matmul %1, %0, %cst {dimension_numbers = #tpu.dot_dimension_numbers<[1], [0], [0], [1], [0, 0, 1, 1], [], []>} : vector<128x16xf32>, vector<16x64xf32>, vector<128x64xf32> -> vector<128x64xf32>
    %3 = arith.truncf %2 : vector<128x64xf32> to vector<128x64xbf16>
    %c0_3 = arith.constant 0 : index
    %c0_4 = arith.constant 0 : index
    %4 = vector.load %arg4[%c0_3, %c0_4] : memref<64x8xf32, #tpu.memory_space<vmem>>, vector<64x8xf32>
    %cst_5 = arith.constant dense<0.000000e+00> : vector<8x128xf32>
    %5 = tpu.matmul %4, %2, %cst_5 {dimension_numbers = #tpu.dot_dimension_numbers<[0], [1], [1], [0], [0, 1, 1, 0], [], []>} : vector<64x8xf32>, vector<128x64xf32>, vector<8x128xf32> -> vector<8x128xf32>
    %c0_6 = arith.constant 0 : index
    %c0_7 = arith.constant 0 : index
    %6 = vector.load %arg1[%c0_6, %c0_7] : memref<64x16xf32, #tpu.memory_space<vmem>>, vector<64x16xf32>
    %cst_8 = arith.constant dense<0.000000e+00> : vector<64x64xf32>
    %7 = tpu.matmul %6, %0, %cst_8 {dimension_numbers = #tpu.dot_dimension_numbers<[1], [0], [0], [1], [0, 0, 1, 1], [], []>} : vector<64x16xf32>, vector<16x64xf32>, vector<64x64xf32> -> vector<64x64xf32>
    %c0_9 = arith.constant 0 : index
    %c0_10 = arith.constant 0 : index
    %8 = vector.load %arg5[%c0_9, %c0_10] : memref<64x8xf32, #tpu.memory_space<vmem>>, vector<64x8xf32>
    %cst_11 = arith.constant dense<0.000000e+00> : vector<64x8xf32>
    %9 = tpu.matmul %7, %8, %cst_11 {dimension_numbers = #tpu.dot_dimension_numbers<[1], [0], [0], [1], [0, 0, 1, 1], [], []>} : vector<64x64xf32>, vector<64x8xf32>, vector<64x8xf32> -> vector<64x8xf32>
    %c0_12 = arith.constant 0 : index
    %c0_13 = arith.constant 0 : index
    %10 = vector.load %arg6[%c0_12, %c0_13] : memref<64x128xbf16, #tpu.memory_space<vmem>>, vector<64x128xbf16>
    %11 = arith.extf %10 : vector<64x128xbf16> to vector<64x128xf32>
    %cst_14 = arith.constant 1.000000e+00 : f32
    %12 = vector.broadcast %cst_14 : f32 to vector<64x128xf32>
    %13 = arith.subf %11, %12 : vector<64x128xf32>
    %cst_15 = arith.constant 1.000000e+30 : f32
    %14 = vector.broadcast %cst_15 : f32 to vector<64x128xf32>
    %15 = arith.mulf %13, %14 : vector<64x128xf32>
    %16 = vector.extract_strided_slice %9 {offsets = [0, 0], sizes = [64, 1], strides = [1, 1]} : vector<64x8xf32> to vector<64x1xf32>
    %17 = vector.extract_strided_slice %5 {offsets = [0, 0], sizes = [1, 128], strides = [1, 1]} : vector<8x128xf32> to vector<1x128xf32>
    %18 = vector.broadcast %16 : vector<64x1xf32> to vector<64x128xf32>
    %19 = vector.broadcast %17 : vector<1x128xf32> to vector<64x128xf32>
    %20 = arith.addf %18, %19 : vector<64x128xf32>
    %cst_16 = arith.constant 6.000000e-01 : f32
    %21 = vector.broadcast %cst_16 : f32 to vector<64x128xf32>
    %22 = arith.mulf %21, %20 : vector<64x128xf32>
    %23 = arith.maximumf %20, %22 : vector<64x128xf32>
    %24 = arith.addf %23, %15 : vector<64x128xf32>
    %cst_17 = arith.constant dense<0xFF800000> : vector<64xf32>
    %25 = vector.multi_reduction <maximumf>, %24, %cst_17 [1] : vector<64x128xf32> to vector<64xf32>
    %26 = vector.shape_cast %25 : vector<64xf32> to vector<64x1xf32>
    %27 = vector.broadcast %26 : vector<64x1xf32> to vector<64x128xf32>
    %28 = arith.subf %24, %27 : vector<64x128xf32>
    %29 = math.exp %28 : vector<64x128xf32>
    %cst_18 = arith.constant dense<0.000000e+00> : vector<64xf32>
    %30 = vector.multi_reduction <add>, %29, %cst_18 [1] : vector<64x128xf32> to vector<64xf32>
    %31 = vector.shape_cast %30 : vector<64xf32> to vector<64x1xf32>
    %32 = arith.truncf %29 : vector<64x128xf32> to vector<64x128xbf16>
    %33 = vector.extract_strided_slice %3 {offsets = [0, 0], sizes = [128, 8], strides = [1, 1]} : vector<128x64xbf16> to vector<128x8xbf16>
    %cst_19 = arith.constant dense<0.000000e+00> : vector<64x8xf32>
    %34 = tpu.matmul %32, %33, %cst_19 {dimension_numbers = #tpu.dot_dimension_numbers<[1], [0], [0], [1], [0, 0, 1, 1], [], []>} : vector<64x128xbf16>, vector<128x8xbf16>, vector<64x8xf32> -> vector<64x8xf32>
    %35 = vector.broadcast %31 : vector<64x1xf32> to vector<64x8xf32>
    %36 = arith.divf %34, %35 : vector<64x8xf32>
    %c0_20 = arith.constant 0 : index
    %c0_21 = arith.constant 0 : index
    %37 = vector.load %arg8[%c0_20, %c0_21] : memref<64x64xf32, #tpu.memory_space<vmem>>, vector<64x8xf32>
    tpu.vector_store %arg8[%c0_20, %c0_21], %36 {strides = array<i32>} : memref<64x64xf32, #tpu.memory_space<vmem>>, vector<64x8xf32>,
    %38 = vector.extract_strided_slice %9 {offsets = [0, 1], sizes = [64, 1], strides = [1, 1]} : vector<64x8xf32> to vector<64x1xf32>
    %39 = vector.extract_strided_slice %5 {offsets = [1, 0], sizes = [1, 128], strides = [1, 1]} : vector<8x128xf32> to vector<1x128xf32>
    %40 = vector.broadcast %38 : vector<64x1xf32> to vector<64x128xf32>
    %41 = vector.broadcast %39 : vector<1x128xf32> to vector<64x128xf32>
    %42 = arith.addf %40, %41 : vector<64x128xf32>
    %cst_22 = arith.constant 6.000000e-01 : f32
    %43 = vector.broadcast %cst_22 : f32 to vector<64x128xf32>
    %44 = arith.mulf %43, %42 : vector<64x128xf32>
    %45 = arith.maximumf %42, %44 : vector<64x128xf32>
    %46 = arith.addf %45, %15 : vector<64x128xf32>
    %cst_23 = arith.constant dense<0xFF800000> : vector<64xf32>
    %47 = vector.multi_reduction <maximumf>, %46, %cst_23 [1] : vector<64x128xf32> to vector<64xf32>
    %48 = vector.shape_cast %47 : vector<64xf32> to vector<64x1xf32>
    %49 = vector.broadcast %48 : vector<64x1xf32> to vector<64x128xf32>
    %50 = arith.subf %46, %49 : vector<64x128xf32>
    %51 = math.exp %50 : vector<64x128xf32>
    %cst_24 = arith.constant dense<0.000000e+00> : vector<64xf32>
    %52 = vector.multi_reduction <add>, %51, %cst_24 [1] : vector<64x128xf32> to vector<64xf32>
    %53 = vector.shape_cast %52 : vector<64xf32> to vector<64x1xf32>
    %54 = arith.truncf %51 : vector<64x128xf32> to vector<64x128xbf16>
    %55 = vector.extract_strided_slice %3 {offsets = [0, 8], sizes = [128, 8], strides = [1, 1]} : vector<128x64xbf16> to vector<128x8xbf16>
    %cst_25 = arith.constant dense<0.000000e+00> : vector<64x8xf32>
    %56 = tpu.matmul %54, %55, %cst_25 {dimension_numbers = #tpu.dot_dimension_numbers<[1], [0], [0], [1], [0, 0, 1, 1], [], []>} : vector<64x128xbf16>, vector<128x8xbf16>, vector<64x8xf32> -> vector<64x8xf32>
    %57 = vector.broadcast %53 : vector<64x1xf32> to vector<64x8xf32>
    %58 = arith.divf %56, %57 : vector<64x8xf32>
    %c0_26 = arith.constant 0 : index
    %c8 = arith.constant 8 : index
    %59 = vector.load %arg8[%c0_26, %c8] : memref<64x64xf32, #tpu.memory_space<vmem>>, vector<64x8xf32>
    tpu.vector_store %arg8[%c0_26, %c8], %58 {strides = array<i32>} : memref<64x64xf32, #tpu.memory_space<vmem>>, vector<64x8xf32>,
    %60 = vector.extract_strided_slice %9 {offsets = [0, 2], sizes = [64, 1], strides = [1, 1]} : vector<64x8xf32> to vector<64x1xf32>
    %61 = vector.extract_strided_slice %5 {offsets = [2, 0], sizes = [1, 128], strides = [1, 1]} : vector<8x128xf32> to vector<1x128xf32>
    %62 = vector.broadcast %60 : vector<64x1xf32> to vector<64x128xf32>
    %63 = vector.broadcast %61 : vector<1x128xf32> to vector<64x128xf32>
    %64 = arith.addf %62, %63 : vector<64x128xf32>
    %cst_27 = arith.constant 6.000000e-01 : f32
    %65 = vector.broadcast %cst_27 : f32 to vector<64x128xf32>
    %66 = arith.mulf %65, %64 : vector<64x128xf32>
    %67 = arith.maximumf %64, %66 : vector<64x128xf32>
    %68 = arith.addf %67, %15 : vector<64x128xf32>
    %cst_28 = arith.constant dense<0xFF800000> : vector<64xf32>
    %69 = vector.multi_reduction <maximumf>, %68, %cst_28 [1] : vector<64x128xf32> to vector<64xf32>
    %70 = vector.shape_cast %69 : vector<64xf32> to vector<64x1xf32>
    %71 = vector.broadcast %70 : vector<64x1xf32> to vector<64x128xf32>
    %72 = arith.subf %68, %71 : vector<64x128xf32>
    %73 = math.exp %72 : vector<64x128xf32>
    %cst_29 = arith.constant dense<0.000000e+00> : vector<64xf32>
    %74 = vector.multi_reduction <add>, %73, %cst_29 [1] : vector<64x128xf32> to vector<64xf32>
    %75 = vector.shape_cast %74 : vector<64xf32> to vector<64x1xf32>
    %76 = arith.truncf %73 : vector<64x128xf32> to vector<64x128xbf16>
    %77 = vector.extract_strided_slice %3 {offsets = [0, 16], sizes = [128, 8], strides = [1, 1]} : vector<128x64xbf16> to vector<128x8xbf16>
    %cst_30 = arith.constant dense<0.000000e+00> : vector<64x8xf32>
    %78 = tpu.matmul %76, %77, %cst_30 {dimension_numbers = #tpu.dot_dimension_numbers<[1], [0], [0], [1], [0, 0, 1, 1], [], []>} : vector<64x128xbf16>, vector<128x8xbf16>, vector<64x8xf32> -> vector<64x8xf32>
    %79 = vector.broadcast %75 : vector<64x1xf32> to vector<64x8xf32>
    %80 = arith.divf %78, %79 : vector<64x8xf32>
    %c0_31 = arith.constant 0 : index
    %c16 = arith.constant 16 : index
    %81 = vector.load %arg8[%c0_31, %c16] : memref<64x64xf32, #tpu.memory_space<vmem>>, vector<64x8xf32>
    tpu.vector_store %arg8[%c0_31, %c16], %80 {strides = array<i32>} : memref<64x64xf32, #tpu.memory_space<vmem>>, vector<64x8xf32>,
    %82 = vector.extract_strided_slice %9 {offsets = [0, 3], sizes = [64, 1], strides = [1, 1]} : vector<64x8xf32> to vector<64x1xf32>
    %83 = vector.extract_strided_slice %5 {offsets = [3, 0], sizes = [1, 128], strides = [1, 1]} : vector<8x128xf32> to vector<1x128xf32>
    %84 = vector.broadcast %82 : vector<64x1xf32> to vector<64x128xf32>
    %85 = vector.broadcast %83 : vector<1x128xf32> to vector<64x128xf32>
    %86 = arith.addf %84, %85 : vector<64x128xf32>
    %cst_32 = arith.constant 6.000000e-01 : f32
    %87 = vector.broadcast %cst_32 : f32 to vector<64x128xf32>
    %88 = arith.mulf %87, %86 : vector<64x128xf32>
    %89 = arith.maximumf %86, %88 : vector<64x128xf32>
    %90 = arith.addf %89, %15 : vector<64x128xf32>
    %cst_33 = arith.constant dense<0xFF800000> : vector<64xf32>
    %91 = vector.multi_reduction <maximumf>, %90, %cst_33 [1] : vector<64x128xf32> to vector<64xf32>
    %92 = vector.shape_cast %91 : vector<64xf32> to vector<64x1xf32>
    %93 = vector.broadcast %92 : vector<64x1xf32> to vector<64x128xf32>
    %94 = arith.subf %90, %93 : vector<64x128xf32>
    %95 = math.exp %94 : vector<64x128xf32>
    %cst_34 = arith.constant dense<0.000000e+00> : vector<64xf32>
    %96 = vector.multi_reduction <add>, %95, %cst_34 [1] : vector<64x128xf32> to vector<64xf32>
    %97 = vector.shape_cast %96 : vector<64xf32> to vector<64x1xf32>
    %98 = arith.truncf %95 : vector<64x128xf32> to vector<64x128xbf16>
    %99 = vector.extract_strided_slice %3 {offsets = [0, 24], sizes = [128, 8], strides = [1, 1]} : vector<128x64xbf16> to vector<128x8xbf16>
    %cst_35 = arith.constant dense<0.000000e+00> : vector<64x8xf32>
    %100 = tpu.matmul %98, %99, %cst_35 {dimension_numbers = #tpu.dot_dimension_numbers<[1], [0], [0], [1], [0, 0, 1, 1], [], []>} : vector<64x128xbf16>, vector<128x8xbf16>, vector<64x8xf32> -> vector<64x8xf32>
    %101 = vector.broadcast %97 : vector<64x1xf32> to vector<64x8xf32>
    %102 = arith.divf %100, %101 : vector<64x8xf32>
    %c0_36 = arith.constant 0 : index
    %c24 = arith.constant 24 : index
    %103 = vector.load %arg8[%c0_36, %c24] : memref<64x64xf32, #tpu.memory_space<vmem>>, vector<64x8xf32>
    tpu.vector_store %arg8[%c0_36, %c24], %102 {strides = array<i32>} : memref<64x64xf32, #tpu.memory_space<vmem>>, vector<64x8xf32>,
    %104 = vector.extract_strided_slice %9 {offsets = [0, 4], sizes = [64, 1], strides = [1, 1]} : vector<64x8xf32> to vector<64x1xf32>
    %105 = vector.extract_strided_slice %5 {offsets = [4, 0], sizes = [1, 128], strides = [1, 1]} : vector<8x128xf32> to vector<1x128xf32>
    %106 = vector.broadcast %104 : vector<64x1xf32> to vector<64x128xf32>
    %107 = vector.broadcast %105 : vector<1x128xf32> to vector<64x128xf32>
    %108 = arith.addf %106, %107 : vector<64x128xf32>
    %cst_37 = arith.constant 6.000000e-01 : f32
    %109 = vector.broadcast %cst_37 : f32 to vector<64x128xf32>
    %110 = arith.mulf %109, %108 : vector<64x128xf32>
    %111 = arith.maximumf %108, %110 : vector<64x128xf32>
    %112 = arith.addf %111, %15 : vector<64x128xf32>
    %cst_38 = arith.constant dense<0xFF800000> : vector<64xf32>
    %113 = vector.multi_reduction <maximumf>, %112, %cst_38 [1] : vector<64x128xf32> to vector<64xf32>
    %114 = vector.shape_cast %113 : vector<64xf32> to vector<64x1xf32>
    %115 = vector.broadcast %114 : vector<64x1xf32> to vector<64x128xf32>
    %116 = arith.subf %112, %115 : vector<64x128xf32>
    %117 = math.exp %116 : vector<64x128xf32>
    %cst_39 = arith.constant dense<0.000000e+00> : vector<64xf32>
    %118 = vector.multi_reduction <add>, %117, %cst_39 [1] : vector<64x128xf32> to vector<64xf32>
    %119 = vector.shape_cast %118 : vector<64xf32> to vector<64x1xf32>
    %120 = arith.truncf %117 : vector<64x128xf32> to vector<64x128xbf16>
    %121 = vector.extract_strided_slice %3 {offsets = [0, 32], sizes = [128, 8], strides = [1, 1]} : vector<128x64xbf16> to vector<128x8xbf16>
    %cst_40 = arith.constant dense<0.000000e+00> : vector<64x8xf32>
    %122 = tpu.matmul %120, %121, %cst_40 {dimension_numbers = #tpu.dot_dimension_numbers<[1], [0], [0], [1], [0, 0, 1, 1], [], []>} : vector<64x128xbf16>, vector<128x8xbf16>, vector<64x8xf32> -> vector<64x8xf32>
    %123 = vector.broadcast %119 : vector<64x1xf32> to vector<64x8xf32>
    %124 = arith.divf %122, %123 : vector<64x8xf32>
    %c0_41 = arith.constant 0 : index
    %c32 = arith.constant 32 : index
    %125 = vector.load %arg8[%c0_41, %c32] : memref<64x64xf32, #tpu.memory_space<vmem>>, vector<64x8xf32>
    tpu.vector_store %arg8[%c0_41, %c32], %124 {strides = array<i32>} : memref<64x64xf32, #tpu.memory_space<vmem>>, vector<64x8xf32>,
    %126 = vector.extract_strided_slice %9 {offsets = [0, 5], sizes = [64, 1], strides = [1, 1]} : vector<64x8xf32> to vector<64x1xf32>
    %127 = vector.extract_strided_slice %5 {offsets = [5, 0], sizes = [1, 128], strides = [1, 1]} : vector<8x128xf32> to vector<1x128xf32>
    %128 = vector.broadcast %126 : vector<64x1xf32> to vector<64x128xf32>
    %129 = vector.broadcast %127 : vector<1x128xf32> to vector<64x128xf32>
    %130 = arith.addf %128, %129 : vector<64x128xf32>
    %cst_42 = arith.constant 6.000000e-01 : f32
    %131 = vector.broadcast %cst_42 : f32 to vector<64x128xf32>
    %132 = arith.mulf %131, %130 : vector<64x128xf32>
    %133 = arith.maximumf %130, %132 : vector<64x128xf32>
    %134 = arith.addf %133, %15 : vector<64x128xf32>
    %cst_43 = arith.constant dense<0xFF800000> : vector<64xf32>
    %135 = vector.multi_reduction <maximumf>, %134, %cst_43 [1] : vector<64x128xf32> to vector<64xf32>
    %136 = vector.shape_cast %135 : vector<64xf32> to vector<64x1xf32>
    %137 = vector.broadcast %136 : vector<64x1xf32> to vector<64x128xf32>
    %138 = arith.subf %134, %137 : vector<64x128xf32>
    %139 = math.exp %138 : vector<64x128xf32>
    %cst_44 = arith.constant dense<0.000000e+00> : vector<64xf32>
    %140 = vector.multi_reduction <add>, %139, %cst_44 [1] : vector<64x128xf32> to vector<64xf32>
    %141 = vector.shape_cast %140 : vector<64xf32> to vector<64x1xf32>
    %142 = arith.truncf %139 : vector<64x128xf32> to vector<64x128xbf16>
    %143 = vector.extract_strided_slice %3 {offsets = [0, 40], sizes = [128, 8], strides = [1, 1]} : vector<128x64xbf16> to vector<128x8xbf16>
    %cst_45 = arith.constant dense<0.000000e+00> : vector<64x8xf32>
    %144 = tpu.matmul %142, %143, %cst_45 {dimension_numbers = #tpu.dot_dimension_numbers<[1], [0], [0], [1], [0, 0, 1, 1], [], []>} : vector<64x128xbf16>, vector<128x8xbf16>, vector<64x8xf32> -> vector<64x8xf32>
    %145 = vector.broadcast %141 : vector<64x1xf32> to vector<64x8xf32>
    %146 = arith.divf %144, %145 : vector<64x8xf32>
    %c0_46 = arith.constant 0 : index
    %c40 = arith.constant 40 : index
    %147 = vector.load %arg8[%c0_46, %c40] : memref<64x64xf32, #tpu.memory_space<vmem>>, vector<64x8xf32>
    tpu.vector_store %arg8[%c0_46, %c40], %146 {strides = array<i32>} : memref<64x64xf32, #tpu.memory_space<vmem>>, vector<64x8xf32>,
    %148 = vector.extract_strided_slice %9 {offsets = [0, 6], sizes = [64, 1], strides = [1, 1]} : vector<64x8xf32> to vector<64x1xf32>
    %149 = vector.extract_strided_slice %5 {offsets = [6, 0], sizes = [1, 128], strides = [1, 1]} : vector<8x128xf32> to vector<1x128xf32>
    %150 = vector.broadcast %148 : vector<64x1xf32> to vector<64x128xf32>
    %151 = vector.broadcast %149 : vector<1x128xf32> to vector<64x128xf32>
    %152 = arith.addf %150, %151 : vector<64x128xf32>
    %cst_47 = arith.constant 6.000000e-01 : f32
    %153 = vector.broadcast %cst_47 : f32 to vector<64x128xf32>
    %154 = arith.mulf %153, %152 : vector<64x128xf32>
    %155 = arith.maximumf %152, %154 : vector<64x128xf32>
    %156 = arith.addf %155, %15 : vector<64x128xf32>
    %cst_48 = arith.constant dense<0xFF800000> : vector<64xf32>
    %157 = vector.multi_reduction <maximumf>, %156, %cst_48 [1] : vector<64x128xf32> to vector<64xf32>
    %158 = vector.shape_cast %157 : vector<64xf32> to vector<64x1xf32>
    %159 = vector.broadcast %158 : vector<64x1xf32> to vector<64x128xf32>
    %160 = arith.subf %156, %159 : vector<64x128xf32>
    %161 = math.exp %160 : vector<64x128xf32>
    %cst_49 = arith.constant dense<0.000000e+00> : vector<64xf32>
    %162 = vector.multi_reduction <add>, %161, %cst_49 [1] : vector<64x128xf32> to vector<64xf32>
    %163 = vector.shape_cast %162 : vector<64xf32> to vector<64x1xf32>
    %164 = arith.truncf %161 : vector<64x128xf32> to vector<64x128xbf16>
    %165 = vector.extract_strided_slice %3 {offsets = [0, 48], sizes = [128, 8], strides = [1, 1]} : vector<128x64xbf16> to vector<128x8xbf16>
    %cst_50 = arith.constant dense<0.000000e+00> : vector<64x8xf32>
    %166 = tpu.matmul %164, %165, %cst_50 {dimension_numbers = #tpu.dot_dimension_numbers<[1], [0], [0], [1], [0, 0, 1, 1], [], []>} : vector<64x128xbf16>, vector<128x8xbf16>, vector<64x8xf32> -> vector<64x8xf32>
    %167 = vector.broadcast %163 : vector<64x1xf32> to vector<64x8xf32>
    %168 = arith.divf %166, %167 : vector<64x8xf32>
    %c0_51 = arith.constant 0 : index
    %c48 = arith.constant 48 : index
    %169 = vector.load %arg8[%c0_51, %c48] : memref<64x64xf32, #tpu.memory_space<vmem>>, vector<64x8xf32>
    tpu.vector_store %arg8[%c0_51, %c48], %168 {strides = array<i32>} : memref<64x64xf32, #tpu.memory_space<vmem>>, vector<64x8xf32>,
    %170 = vector.extract_strided_slice %9 {offsets = [0, 7], sizes = [64, 1], strides = [1, 1]} : vector<64x8xf32> to vector<64x1xf32>
    %171 = vector.extract_strided_slice %5 {offsets = [7, 0], sizes = [1, 128], strides = [1, 1]} : vector<8x128xf32> to vector<1x128xf32>
    %172 = vector.broadcast %170 : vector<64x1xf32> to vector<64x128xf32>
    %173 = vector.broadcast %171 : vector<1x128xf32> to vector<64x128xf32>
    %174 = arith.addf %172, %173 : vector<64x128xf32>
    %cst_52 = arith.constant 6.000000e-01 : f32
    %175 = vector.broadcast %cst_52 : f32 to vector<64x128xf32>
    %176 = arith.mulf %175, %174 : vector<64x128xf32>
    %177 = arith.maximumf %174, %176 : vector<64x128xf32>
    %178 = arith.addf %177, %15 : vector<64x128xf32>
    %cst_53 = arith.constant dense<0xFF800000> : vector<64xf32>
    %179 = vector.multi_reduction <maximumf>, %178, %cst_53 [1] : vector<64x128xf32> to vector<64xf32>
    %180 = vector.shape_cast %179 : vector<64xf32> to vector<64x1xf32>
    %181 = vector.broadcast %180 : vector<64x1xf32> to vector<64x128xf32>
    %182 = arith.subf %178, %181 : vector<64x128xf32>
    %183 = math.exp %182 : vector<64x128xf32>
    %cst_54 = arith.constant dense<0.000000e+00> : vector<64xf32>
    %184 = vector.multi_reduction <add>, %183, %cst_54 [1] : vector<64x128xf32> to vector<64xf32>
    %185 = vector.shape_cast %184 : vector<64xf32> to vector<64x1xf32>
    %186 = arith.truncf %183 : vector<64x128xf32> to vector<64x128xbf16>
    %187 = vector.extract_strided_slice %3 {offsets = [0, 56], sizes = [128, 8], strides = [1, 1]} : vector<128x64xbf16> to vector<128x8xbf16>
    %cst_55 = arith.constant dense<0.000000e+00> : vector<64x8xf32>
    %188 = tpu.matmul %186, %187, %cst_55 {dimension_numbers = #tpu.dot_dimension_numbers<[1], [0], [0], [1], [0, 0, 1, 1], [], []>} : vector<64x128xbf16>, vector<128x8xbf16>, vector<64x8xf32> -> vector<64x8xf32>
    %189 = vector.broadcast %185 : vector<64x1xf32> to vector<64x8xf32>
    %190 = arith.divf %188, %189 : vector<64x8xf32>
    %c0_56 = arith.constant 0 : index
    %c56 = arith.constant 56 : index
    %191 = vector.load %arg8[%c0_56, %c56] : memref<64x64xf32, #tpu.memory_space<vmem>>, vector<64x8xf32>
    tpu.vector_store %arg8[%c0_56, %c56], %190 {strides = array<i32>} : memref<64x64xf32, #tpu.memory_space<vmem>>, vector<64x8xf32>,
    %c0_57 = arith.constant 0 : index
    %c0_58 = arith.constant 0 : index
    %192 = vector.load %arg8[%c0_57, %c0_58] : memref<64x64xf32, #tpu.memory_space<vmem>>, vector<64x64xf32>
    %cst_59 = arith.constant 0.000000e+00 : f32
    %193 = vector.broadcast %cst_59 : f32 to vector<64x64xf32>
    %194 = arith.cmpf ogt, %192, %193 : vector<64x64xf32>
    %195 = math.exp %192 : vector<64x64xf32>
    %cst_60 = arith.constant 1.000000e+00 : f32
    %196 = vector.broadcast %cst_60 : f32 to vector<64x64xf32>
    %197 = arith.subf %195, %196 : vector<64x64xf32>
    %198 = arith.select %194, %192, %197 : vector<64x64xi1>, vector<64x64xf32>
    %c0_61 = arith.constant 0 : index
    %c0_62 = arith.constant 0 : index
    %199 = vector.load %arg7[%c0_61, %c0_62] : memref<64x64xf32, #tpu.memory_space<vmem>>, vector<64x64xf32>
    tpu.vector_store %arg7[%c0_61, %c0_62], %198 {strides = array<i32>} : memref<64x64xf32, #tpu.memory_space<vmem>>, vector<64x64xf32>,
    return
  }
  func.func @transform_0(%arg0: i32) -> (i32, i32) {
    %c0_i32 = arith.constant 0 : i32
    %c0_i32_0 = arith.constant 0 : i32
    return %arg0, %c0_i32 : i32, i32
  }
  func.func @transform_1(%arg0: i32) -> (i32, i32) {
    %c0_i32 = arith.constant 0 : i32
    %c0_i32_0 = arith.constant 0 : i32
    %c0_i32_1 = arith.constant 0 : i32
    return %c0_i32, %c0_i32_0 : i32, i32
  }
  func.func @transform_2(%arg0: i32) -> (i32, i32) {
    %c0_i32 = arith.constant 0 : i32
    %c0_i32_0 = arith.constant 0 : i32
    %c0_i32_1 = arith.constant 0 : i32
    return %c0_i32, %c0_i32_0 : i32, i32
  }
  func.func @transform_3(%arg0: i32) -> (i32, i32) {
    %c0_i32 = arith.constant 0 : i32
    %c0_i32_0 = arith.constant 0 : i32
    %c0_i32_1 = arith.constant 0 : i32
    return %c0_i32, %c0_i32_0 : i32, i32
  }
  func.func @transform_4(%arg0: i32) -> (i32, i32) {
    %c0_i32 = arith.constant 0 : i32
    %c0_i32_0 = arith.constant 0 : i32
    %c0_i32_1 = arith.constant 0 : i32
    return %c0_i32, %c0_i32_0 : i32, i32
  }
  func.func @transform_5(%arg0: i32) -> (i32, i32) {
    %c0_i32 = arith.constant 0 : i32
    %c0_i32_0 = arith.constant 0 : i32
    return %arg0, %c0_i32 : i32, i32
  }
  func.func @transform_6(%arg0: i32) -> (i32, i32) {
    %c0_i32 = arith.constant 0 : i32
    %c0_i32_0 = arith.constant 0 : i32
    return %arg0, %c0_i32 : i32, i32
  }
}

</mosaic_0001>

<bundles_post_ra>
// kernel: tpu_custom_call.1
= control target key start
LH: loop header
LB: loop body
LE: loop exit
PB: predicated region body
PF: predicated region fallthrough
CT: control target
= control target key end

     0   :  { %s4289_s21 = smov 0   ;;  %s5948_s0 = inlined_call_operand.vmem [shape: f32[128,16], index: 0, kind: input, shape index: {}]   ;;  %s5949_s1 = inlined_call_operand.vmem [shape: f32[128,16], index: 1, kind: input, shape index: {}]   ;;  %s5950_s2 = inlined_call_operand.vmem [shape: f32[16,64], index: 2, kind: input, shape index: {}]   ;;  %s5951_s3 = inlined_call_operand.vmem [shape: f32[64,8], index: 3, kind: input, shape index: {}]   ;;  %s5952_s4 = inlined_call_operand.vmem [shape: f32[64,8], index: 4, kind: input, shape index: {}]   ;;  %s5953_s5 = inlined_call_operand.vmem [shape: bf16[128,128], index: 5, kind: input, shape index: {}]   ;;  %s5954_s6 = inlined_call_operand.vmem [shape: f32[128,64], index: 6, kind: output, shape index: {}]  }
   0x1 LB: > { %s3242_s22 = sadd.s32 4294967295, %s4227_s21   ;;  %p3246_p0 = scmp.ge.s32.totalorder %s4227_s21, 1  ;;  %s4227_s21 = sphi %s4289_s21, %s16_s21  }
   0x2   : > { %p224_p1 = scmp.lt.s32.totalorder %s4227_s21, 3 }
   0x4   : > { %p225_p2 = pnand %p3246_p0, %p224_p1 }
   0x6   : > { %228 = sbr.rel (%p225_p2) target bundleno = 1677 (0x68d), region = 44 }
   0xd   : > { %v278_v0 = vld [vmem:[%s5950_s2] sm:$0xff]  ;;  %v279_v1 = vld [vmem:[%s5950_s2 + $0x8] sm:$0xff]  ;;  %vm296_vm0 = vcmask 130048   ;;  %v282_v5 = vld [vmem:[%s5949_s1 + $0x10] sm:$0xff]  ;;  %s3247_s27 = sshll.u32 %s3242_s22, 3  ;;  %v4229_v47 = vmov 0.0|0.0  }
   0xe   : > { %v280_v2 = vld [vmem:[%s5949_s1] sm:$0xff]  ;;  %v3795_v3 = vpack.c.bf16 %v279_v1, %v278_v0  ;;  %v281_v4 = vld [vmem:[%s5949_s1 + $0x8] sm:$0xff]  ;;  %v283_v7 = vld [vmem:[%s5949_s1 + $0x18] sm:$0xff]  ;;  %p260_p3 = scmp.lt.s32.totalorder %s3247_s27, 15  ;;  %3799 = vmatprep.subr.bf16.mxu1 %v4229_v47  ;;  %vm4230_vm1 = vmmov 0   ;;  %v4231_v48 = vmov 0.0  }
   0xf   : > { %3500 = vmatprep.mubr.msk.f32.mxu0 %vm296_vm0, %v280_v2  ;;  %v498_v6 = vld [vmem:[%s5951_s3] sm:$0xff]  ;;  %v499_v8 = vld [vmem:[%s5951_s3 + $0x8] sm:$0xff]  ;;  %v500_v11 = vld [vmem:[%s5951_s3 + $0x10] sm:$0xff]  ;;  %3556 = vmatprep.mubr.msk.f32.mxu1 %vm4230_vm1, %v4231_v48  ;;  %vm538_vm2 = vcmask 523264   ;;  %s4232_s7 = smov 112   ;;  %s4233_s8 = smov 120  }
  0x10   : > { %3796 = vmatprep.subr.bf16.mxu0 %v3795_v3  ;;  %506 = vxpose.xlu0.b32.start [1/8] (short) (narrow) %v498_v6, 8  ;;  %v284_v9 = vld [vmem:[%s5949_s1 + $0x20] sm:$0xff]  ;;  %v285_v10 = vld [vmem:[%s5949_s1 + $0x28] sm:$0xff]  ;;  %v286_v12 = vld [vmem:[%s5949_s1 + $0x30] sm:$0xff]  ;;  %s6231_s27 = smov (!%p260_p3, %s3247_s27), 15  ;;  %s4234_s9 = smov 96  }
  0x11   : > { %3798 = vmatpush3.bf16.msra.mxu0 %v3795_v3  ;;  %v287_v13 = vld [vmem:[%s5949_s1 + $0x38] sm:$0xff]  ;;  %v797_v15 = vld [vmem:[%s5952_s4] sm:$0xff]  ;;  %v798_v16 = vld [vmem:[%s5952_s4 + $0x8] sm:$0xff]  ;;  %s3248_s25 = sshll.u32 %s6231_s27, 3  ;;  %s4235_s10 = smov 104   ;;  %vm1183_vm4 = vcmask 64512  }
  0x12   : > { %3832 = vmatprep.subr.bf16.mxu0 %v3795_v3  ;;  %v501_v14 = vld [vmem:[%s5951_s3 + $0x18] sm:$0xff]  ;;  %v288_v17 = vld [vmem:[%s5949_s1 + $0x40] sm:$0xff]  ;;  %v3835_v18 = vpack.c.bf16 %v798_v16, %v797_v15  ;;  %v289_v19 = vld [vmem:[%s5949_s1 + $0x48] sm:$0xff]  ;;  %s4398_s11 = scalar_lea.vmem %s5948_s0, %s3248_s25  ;;  %s3250_s22 = sshll.u32 %s6231_s27, 2  ;;  %vm1465_vm5 = vcmask 130112   ;;  %vm1739_vm6 = vcmask 195712  }
  0x13   : > { %v502_v20 = vld [vmem:[%s5951_s3 + $0x20] sm:$0xff]  ;;  %v290_v21 = vld [vmem:[%s5949_s1 + $0x50] sm:$0xff]  ;;  %v291_v22 = vld [vmem:[%s5949_s1 + $0x58] sm:$0xff]  ;;  %s4747_s14 = scalar_lea.vmem %s5953_s5, %s3250_s22  ;;  %s4245_s15 = smov 80   ;;  %vm2013_vm7 = vcmask 261312   ;;  %vm2287_vm8 = vcmask 326912  }
  0x14   : > { %3501 = vmatmul.mubr.msk.f32.vlgmr.msra.gmra.mrb[0].mxu0 %vm296_vm0, %v281_v4  ;;  %507 = vxpose.xlu0.b32.cont [2/8] (short) (narrow) %v499_v8, 8  ;;  %v503_v23 = vld [vmem:[%s5951_s3 + $0x28] sm:$0xff]  ;;  %v292_v24 = vld [vmem:[%s5949_s1 + $0x60] sm:$0xff]  ;;  %v504_v26 = vld [vmem:[%s5951_s3 + $0x30] sm:$0xff]  ;;  %s4246_s16 = smov 72   ;;  %s4247_s17 = smov 8  }
  0x15   : > { %3834 = vmatpush3.bf16.msra.mxu0 %v3795_v3  ;;  %3503 = vmatprep.mubr.msk.f32.mxu0 %vm296_vm0, %v282_v5  ;;  %v293_v25 = vld [vmem:[%s5949_s1 + $0x68] sm:$0xff]  ;;  %v294_v27 = vld [vmem:[%s5949_s1 + $0x70] sm:$0xff]  ;;  %v295_v28 = vld [vmem:[%s5949_s1 + $0x78] sm:$0xff]  ;;  %s4248_s18 = smov 16   ;;  %s4249_s19 = smov 24   ;;  %vm2561_vm9 = vcmask 392512  }
  0x16   : > { %3836 = vmatprep.subr.bf16.mxu0 %v3835_v18  ;;  %v505_v29 = vld [vmem:[%s5951_s3 + $0x38] sm:$0xff]  ;;  %v660_v30 = vld [vmem:[%s4398_s11] sm:$0xff]  ;;  %v799_v31 = vld [vmem:[%s5952_s4 + $0x10] sm:$0xff]  ;;  %s4250_s20 = smov 32   ;;  %s4251_s23 = smov 40   ;;  %vm2835_vm10 = vcmask 458112  }
  0x17   : > { %v800_v32 = vld [vmem:[%s5952_s4 + $0x18] sm:$0xff]  ;;  %v661_v33 = vld [vmem:[%s4398_s11 + $0x8] sm:$0xff]  ;;  %v662_v34 = vld [vmem:[%s4398_s11 + $0x10] sm:$0xff]  ;;  %s4252_s24 = smov 48   ;;  %s4253_s26 = smov 56   ;;  %vm3109_vm11 = vcmask 523712  }
  0x18   : > { %3504 = vmatmul.mubr.msk.f32.gmra.mrb[2].mxu0 %vm296_vm0, %v283_v7  ;;  %508 = vxpose.xlu0.b32.cont [3/8] (short) (narrow) %v500_v11, 8  ;;  %v3839_v35 = vpack.c.bf16 %v800_v32, %v799_v31  ;;  %v801_v36 = vld [vmem:[%s5952_s4 + $0x20] sm:$0xff]  ;;  %v802_v37 = vld [vmem:[%s5952_s4 + $0x28] sm:$0xff]  ;;  %v663_v38 = vld [vmem:[%s4398_s11 + $0x18] sm:$0xff]  ;;  %s5927_s30 = scalar_lea.vmem %s5954_s6, %s3248_s25 }
  0x19   : > { %3506 = vmatprep.mubr.msk.f32.mxu0 %vm296_vm0, %v284_v9  ;;  %v664_v39 = vld [vmem:[%s4398_s11 + $0x20] sm:$0xff]  ;;  %v3843_v40 = vpack.c.bf16 %v802_v37, %v801_v36  ;;  %v665_v41 = vld [vmem:[%s4398_s11 + $0x28] sm:$0xff]  ;;  %v666_v42 = vld [vmem:[%s4398_s11 + $0x30] sm:$0xff] }
  0x1a   : > { %v667_v43 = vld [vmem:[%s4398_s11 + $0x38] sm:$0xff]  ;;  %v803_v44 = vld [vmem:[%s5952_s4 + $0x30] sm:$0xff]  ;;  %vm4448_vm3 = vmpackc.low %vm538_vm2, %vm538_vm2  ;;  %s4236_s11 = smov 88  }
  0x1b   : > { %v804_v45 = vld [vmem:[%s5952_s4 + $0x38] sm:$0xff] }
  0x1c   : > { %3507 = vmatmul.mubr.msk.f32.gmra.mrb[4].mxu0 %vm296_vm0, %v285_v10  ;;  %509 = vxpose.xlu0.b32.cont [4/8] (short) (narrow) %v501_v14, 8  ;;  %v3847_v46 = vpack.c.bf16 %v804_v45, %v803_v44 }
  0x1d   : > { %3509 = vmatprep.mubr.msk.f32.mxu0 %vm296_vm0, %v286_v12 }
  0x20   : > { %3510 = vmatmul.mubr.msk.f32.gmra.mrb[6].mxu0 %vm296_vm0, %v287_v13  ;;  %510 = vxpose.xlu0.b32.cont [5/8] (short) (narrow) %v502_v20, 8  ;;  %v5960_v20 = vmov 1  }
  0x21   : > { %3512 = vmatprep.mubr.msk.f32.mxu0 %vm296_vm0, %v288_v17 }
  0x24   : > { %3513 = vmatmul.mubr.msk.f32.gmra.mrb[8].mxu0 %vm296_vm0, %v289_v19  ;;  %511 = vxpose.xlu0.b32.cont [6/8] (short) (narrow) %v503_v23, 8  ;;  %v5958_v19 = vmov 0  }
  0x25   : > { %3515 = vmatprep.mubr.msk.f32.mxu0 %vm296_vm0, %v290_v21  ;;  %3884 = vset.pattern.permute.xlu1 %v5958_v19 }
  0x28   : > { %3516 = vmatmul.mubr.msk.f32.gmra.mrb[10].mxu0 %vm296_vm0, %v291_v22  ;;  %512 = vxpose.xlu0.b32.cont [7/8] (short) (narrow) %v504_v26, 8 }
  0x29   : > { %3518 = vmatprep.mubr.msk.f32.mxu0 %vm296_vm0, %v292_v24 }
  0x2c   : > { %3519 = vmatmul.mubr.msk.f32.gmra.mrb[12].mxu0 %vm296_vm0, %v293_v25  ;;  %513 = vxpose.xlu0.b32.end [8/8] (short) (narrow) %v505_v29, 8 }
  0x2d   : > { %3521 = vmatprep.mubr.msk.f32.mxu0 %vm296_vm0, %v294_v27 }
  0x30   : > { %3522 = vmatmul.mubr.msk.f32.gmra.mrb[14].mxu0 %vm296_vm0, %v295_v28 }
  0x31   : > { %3563 = vmatprep.mubr.msk.f32.mxu0 %vm296_vm0, %v660_v30 }
  0x34   : > { %3564 = vmatmul.mubr.msk.f32.vlgmr.msra.gmra.mrb[16].mxu0 %vm296_vm0, %v661_v33 }
  0x35   : > { %3566 = vmatprep.mubr.msk.f32.mxu0 %vm296_vm0, %v662_v34  ;;  %3838 = vmatpush3.bf16.msra.mxu0 %v3835_v18 }
  0x36   : > { %3840 = vmatprep.subr.bf16.mxu0 %v3839_v35 }
  0x38   : > { %3567 = vmatmul.mubr.msk.f32.gmra.mrb[18].mxu0 %vm296_vm0, %v663_v38 }
  0x39   : > { %3569 = vmatprep.mubr.msk.f32.mxu0 %vm296_vm0, %v664_v39  ;;  %3842 = vmatpush3.bf16.msra.mxu0 %v3839_v35 }
  0x3a   : > { %3844 = vmatprep.subr.bf16.mxu0 %v3843_v40 }
  0x3c   : > { %3570 = vmatmul.mubr.msk.f32.gmra.mrb[20].mxu0 %vm296_vm0, %v665_v41 }
  0x3d   : > { %3572 = vmatprep.mubr.msk.f32.mxu0 %vm296_vm0, %v666_v42  ;;  %3846 = vmatpush3.bf16.msra.mxu0 %v3843_v40 }
  0x3e   : > { %3848 = vmatprep.subr.bf16.mxu0 %v3847_v46 }
  0x40   : > { %3573 = vmatmul.mubr.msk.f32.gmra.mrb[22].mxu0 %vm296_vm0, %v667_v43 }
  0x41   : > { %3850 = vmatpush3.bf16.msra.mxu0 %v3847_v46 }
  0x55   : > { %3885 = vset.pattern.permute.xlu0 %v5960_v20 }
  0x90   : > { %v522_v18 = vpop.trf.xlu0 }
  0xe7   : > { %v3502_v49 = vpop.f32.mrb[0].mxu0 }
  0xe8   : > { %v411_v50 = vpop.f32.mrb[1].mxu0 }
  0xe9   : > { %v4444_v51 = vpack.c.bf16 %v3502_v49, %v411_v50 }
  0xeb   : > { %6046 = vst [vmem:[#allocation3_spill] sm:$0xff] %v4444_v51  ;;  %1602 = vrot.lane.b32.xlu1 %v4444_v51, %s4232_s7  ;;  %1328 = vrot.lane.b32.xlu0 %v4444_v51, %s4233_s8  ;;  %v3505_v53 = vpop.f32.mrb[2].mxu0 }
  0xec   : > { %3802 = vmatpush3.bf16.xpose.msk.msra.mxu1 %vm4448_vm3, %v4444_v51  ;;  %3603 = vmatprep.subr.bf16.mxu0 %v4444_v51  ;;  %v421_v54 = vpop.f32.mrb[3].mxu0 }
  0xed   : > { %v4460_v55 = vpack.c.bf16 %v3505_v53, %v421_v54  ;;  %3803 = vmatprep.subr.bf16.mxu1 %v4229_v47 }
  0xef   : > { %6049 = vst [vmem:[#allocation4_spill] sm:$0xff] %v4460_v55  ;;  %2150 = vrot.lane.b32.xlu1 %v4444_v51, %s4234_s9  ;;  %1876 = vrot.lane.b32.xlu0 %v4444_v51, %s4235_s10  ;;  %v3508_v56 = vpop.f32.mrb[4].mxu0 }
  0xf0   : > { %v431_v57 = vpop.f32.mrb[5].mxu0 }
  0xf1   : > { %v4467_v58 = vpack.c.bf16 %v3508_v56, %v431_v57 }
  0xf3   : > { %6050 = vst [vmem:[#allocation5_spill] sm:$0xff] %v4467_v58  ;;  %2424 = vrot.lane.b32.xlu0 %v4444_v51, %s4236_s11  ;;  %1330 = vrot.lane.b32.xlu1 %v4460_v55, %s4233_s8  ;;  %v3511_v59 = vpop.f32.mrb[6].mxu0 }
  0xf4   : > { %3806 = vmatpush3.bf16.xpose.msk.msra.mxu1 %vm4448_vm3, %v4460_v55  ;;  %v441_v60 = vpop.f32.mrb[7].mxu0 }
  0xf5   : > { %v4476_v61 = vpack.c.bf16 %v3511_v59, %v441_v60  ;;  %3807 = vmatprep.subr.bf16.mxu1 %v4229_v47  ;;  %v5956_v59 = vmov 2   ;;  %v5968_v60 = vmov 3  }
  0xf7   : > { %6051 = vst [vmem:[#allocation6_spill] sm:$0xff] %v4476_v61  ;;  %1604 = vrot.lane.b32.xlu0 %v4460_v55, %s4232_s7  ;;  %1878 = vrot.lane.b32.xlu1 %v4460_v55, %s4235_s10  ;;  %v3514_v62 = vpop.f32.mrb[8].mxu0 }
  0xf8   : > { %v451_v63 = vpop.f32.mrb[9].mxu0 }
  0xf9   : > { %v4483_v0 = vpack.c.bf16 %v3514_v62, %v451_v63 }
  0xfb   : > { %6052 = vst [vmem:[#allocation7_spill] sm:$0xff] %v4483_v0  ;;  %2152 = vrot.lane.b32.xlu1 %v4460_v55, %s4234_s9  ;;  %1334 = vrot.lane.b32.xlu0 %v4476_v61, %s4233_s8  ;;  %v3517_v1 = vpop.f32.mrb[10].mxu0 }
  0xfc   : > { %3810 = vmatpush3.bf16.xpose.msk.msra.mxu1 %vm4448_vm3, %v4467_v58  ;;  %v461_v2 = vpop.f32.mrb[11].mxu0 }
  0xfd   : > { %v4492_v3 = vpack.c.bf16 %v3517_v1, %v461_v2  ;;  %3811 = vmatprep.subr.bf16.mxu1 %v4229_v47  ;;  %v5975_v1 = vmov 5   ;;  %v5955_v2 = vmov 4  }
  0xff   : > { %6053 = vst [vmem:[#allocation8_spill] sm:$0xff] %v4492_v3  ;;  %2426 = vrot.lane.b32.xlu1 %v4460_v55, %s4236_s11  ;;  %1882 = vrot.lane.b32.xlu0 %v4476_v61, %s4235_s10  ;;  %v3520_v4 = vpop.f32.mrb[12].mxu0 }
 0x100   : > { %v471_v5 = vpop.f32.mrb[13].mxu0 }
 0x101   : > { %v4499_v6 = vpack.c.bf16 %v3520_v4, %v471_v5 }
 0x103   : > { %6054 = vst [vmem:[#allocation9_spill] sm:$0xff] %v4499_v6  ;;  %1332 = vrot.lane.b32.xlu1 %v4467_v58, %s4233_s8  ;;  %2156 = vrot.lane.b32.xlu0 %v4476_v61, %s4234_s9  ;;  %v3523_v7 = vpop.f32.mrb[14].mxu0 }
 0x104   : > { %3814 = vmatpush3.bf16.xpose.msk.msra.mxu1 %vm4448_vm3, %v4476_v61  ;;  %v481_v8 = vpop.f32.mrb[15].mxu0 }
 0x105   : > { %v4508_v9 = vpack.c.bf16 %v3523_v7, %v481_v8  ;;  %3815 = vmatprep.subr.bf16.mxu1 %v4229_v47  ;;  %v5962_v7 = vmov 7   ;;  %v5957_v8 = vmov 6  }
 0x107   : > { %6055 = vst [vmem:[#allocation10_spill] sm:$0xff] %v4508_v9  ;;  %1606 = vrot.lane.b32.xlu1 %v4467_v58, %s4232_s7  ;;  %1610 = vrot.lane.b32.xlu0 %v4483_v0, %s4232_s7  ;;  %v3565_v10 = vpop.f32.mrb[16].mxu0 }
 0x108   : > { %v758_v11 = vpop.f32.mrb[17].mxu0 }
 0x109   : > { %3591 = vmatprep.mubr.msk.f32.mxu0 %vm538_vm2, %v758_v11 }
 0x10a   : > { %3592 = vmatmul.mubr.msk.f32.vlgmr.msra.gmra.mrb[24].mxu0 %vm538_vm2, %v3565_v10 }
 0x10b   : > { %3604 = vmatpush3.bf16.msra.mxu0 %v4444_v51  ;;  %1880 = vrot.lane.b32.xlu1 %v4467_v58, %s4235_s10  ;;  %v3568_v12 = vpop.f32.mrb[18].mxu0 }
 0x10c   : > { %3818 = vmatpush3.bf16.xpose.msk.msra.mxu1 %vm4448_vm3, %v4483_v0  ;;  %1338 = vrot.lane.b32.xlu0 %v4492_v3, %s4233_s8  ;;  %v768_v13 = vpop.f32.mrb[19].mxu0 }
 0x10d   : > { %3605 = vmatprep.subr.bf16.mxu0 %v4460_v55  ;;  %3819 = vmatprep.subr.bf16.mxu1 %v4229_v47 }
 0x10e   : > { %3594 = vmatprep.mubr.msk.f32.mxu0 %vm538_vm2, %v768_v13 }
 0x10f   : > { %3606 = vmatpush3.bf16.msra.mxu0 %v4460_v55  ;;  %2154 = vrot.lane.b32.xlu1 %v4467_v58, %s4234_s9  ;;  %v3571_v14 = vpop.f32.mrb[20].mxu0  ;;  %v6081_v55 = vmov 7  }
 0x110   : > { %1886 = vrot.lane.b32.xlu0 %v4492_v3, %s4235_s10  ;;  %3607 = vmatprep.subr.bf16.mxu0 %v4467_v58  ;;  %v778_v15 = vpop.f32.mrb[21].mxu0 }
 0x111   : > { %3595 = vmatmul.mubr.msk.f32.gmra.mrb[26].mxu0 %vm538_vm2, %v3568_v12  ;;  %v1006_v12 = vlaneseq }
 0x112   : > { %3597 = vmatprep.mubr.msk.f32.mxu0 %vm538_vm2, %v778_v15 }
 0x113   : > { %3608 = vmatpush3.bf16.msra.mxu0 %v4467_v58  ;;  %2428 = vrot.lane.b32.xlu1 %v4467_v58, %s4236_s11  ;;  %v3574_v16 = vpop.f32.mrb[22].mxu0  ;;  %v4670_v13 = vshrl.u32 %v1006_v12, 7 }
 0x114   : > { %3822 = vmatpush3.bf16.xpose.msk.msra.mxu1 %vm4448_vm3, %v4492_v3  ;;  %1614 = vrot.lane.b32.xlu0 %v4499_v6, %s4232_s7  ;;  %v788_v17 = vpop.f32.mrb[23].mxu0 }
 0x115   : > { %3609 = vmatprep.subr.bf16.mxu0 %v4476_v61  ;;  %3823 = vmatprep.subr.bf16.mxu1 %v4229_v47  ;;  %v2878_v15 = vsub.s32 7, %v4670_v13 }
 0x116   : > { %3598 = vmatmul.mubr.msk.f32.gmra.mrb[28].mxu0 %vm538_vm2, %v3571_v14  ;;  %v2604_v14 = vsub.s32 6, %v4670_v13 }
 0x117   : > { %3610 = vmatpush3.bf16.msra.mxu0 %v4476_v61  ;;  %1608 = vrot.lane.b32.xlu1 %v4476_v61, %s4232_s7 }
 0x118   : > { %1342 = vrot.lane.b32.xlu0 %v4508_v9, %s4233_s8  ;;  %3611 = vmatprep.subr.bf16.mxu0 %v4483_v0 }
 0x119   : > { %3600 = vmatprep.mubr.msk.f32.mxu0 %vm538_vm2, %v788_v17 }
 0x11a   : > { %3601 = vmatmul.mubr.msk.f32.gmra.mrb[30].mxu0 %vm538_vm2, %v3574_v16 }
 0x11b   : > { %3612 = vmatpush3.bf16.msra.mxu0 %v4483_v0  ;;  %2430 = vrot.lane.b32.xlu1 %v4476_v61, %s4236_s11 }
 0x11c   : > { %3826 = vmatpush3.bf16.xpose.msk.msra.mxu1 %vm4448_vm3, %v4499_v6  ;;  %1890 = vrot.lane.b32.xlu0 %v4508_v9, %s4235_s10 }
 0x11d   : > { %3613 = vmatprep.subr.bf16.mxu0 %v4492_v3  ;;  %3827 = vmatprep.subr.bf16.mxu1 %v4229_v47 }
 0x11f   : > { %3614 = vmatpush3.bf16.msra.mxu0 %v4492_v3  ;;  %1336 = vrot.lane.b32.xlu1 %v4483_v0, %s4233_s8 }
 0x120   : > { %3615 = vmatprep.subr.bf16.mxu0 %v4499_v6 }
 0x123   : > { %3616 = vmatpush3.bf16.msra.mxu0 %v4499_v6  ;;  %1884 = vrot.lane.b32.xlu1 %v4483_v0, %s4235_s10 }
 0x124   : > { %3830 = vmatpush3.bf16.xpose.msk.msra.mxu1 %vm4448_vm3, %v4508_v9  ;;  %3617 = vmatprep.subr.bf16.mxu0 %v4508_v9 }
 0x127   : > { %3618 = vmatpush3.bf16.msra.mxu0 %v4508_v9  ;;  %2158 = vrot.lane.b32.xlu1 %v4483_v0, %s4234_s9 }
 0x12b   : > { %2432 = vrot.lane.b32.xlu1 %v4483_v0, %s4236_s11  ;;  %3557 = vmatmul.mubr.msk.f32.vlgmr.msra.gmra.mrb[0].mxu1 %vm538_vm2, %v522_v18 }
 0x12f   : > { %1612 = vrot.lane.b32.xlu1 %v4492_v3, %s4232_s7 }
 0x133   : > { %2160 = vrot.lane.b32.xlu1 %v4492_v3, %s4234_s9 }
 0x137   : > { %2434 = vrot.lane.b32.xlu1 %v4492_v3, %s4236_s11  ;;  %v2056_v3 = vsub.s32 4, %v4670_v13 }
 0x13b   : > { %1340 = vrot.lane.b32.xlu1 %v4499_v6, %s4233_s8 }
 0x13f   : > { %1888 = vrot.lane.b32.xlu1 %v4499_v6, %s4235_s10 }
 0x143   : > { %1616 = vrot.lane.b32.xlu1 %v4508_v9, %s4232_s7 }
 0x15d   : > { %v4596_v21 = vpop.permute.xlu1 %1602  ;;  %v1329_v22 = vpop.permute.xlu0 %1328 }
 0x15e   : > { %3627 = vmatprep.subr.bf16.mxu1 %v1329_v22  ;;  %3651 = vmatprep.subr.bf16.mxu0 %v4596_v21 }
 0x15f   : > { %3628 = vmatpush3.bf16.msra.mxu1 %v1329_v22 }
 0x161   : > { %v4599_v23 = vpop.permute.xlu1 %2150  ;;  %v4601_v24 = vpop.permute.xlu0 %1876 }
 0x162   : > { %6056 = vst [vmem:[#allocation11_spill] sm:$0xff] %v4599_v23 }
 0x165   : > { %v1331_v25 = vpop.permute.xlu1 %1330  ;;  %v4605_v27 = vpop.permute.xlu0 %2424 }
 0x166   : > { %3629 = vmatprep.subr.bf16.mxu1 %v1331_v25  ;;  %6057 = vst [vmem:[#allocation12_spill] sm:$0xff] %v4605_v27 }
 0x167   : > { %3630 = vmatpush3.bf16.msra.mxu1 %v1331_v25 }
 0x169   : > { %v4603_v26 = vpop.permute.xlu1 %1878  ;;  %v4609_v29 = vpop.permute.xlu0 %1604 }
 0x16d   : > { %v4607_v28 = vpop.permute.xlu1 %2152  ;;  %v1335_v32 = vpop.permute.xlu0 %1334 }
 0x16e   : > { %6058 = vst [vmem:[#allocation13_spill] sm:$0xff] %v4607_v28 }
 0x171   : > { %v4611_v30 = vpop.permute.xlu1 %2426  ;;  %v4617_v35 = vpop.permute.xlu0 %1882 }
 0x172   : > { %6059 = vst [vmem:[#allocation14_spill] sm:$0xff] %v4611_v30 }
 0x175   : > { %v1333_v31 = vpop.permute.xlu1 %1332  ;;  %v4623_v38 = vpop.permute.xlu0 %2156 }
 0x176   : > { %3631 = vmatprep.subr.bf16.mxu1 %v1333_v31  ;;  %6062 = vst [vmem:[#allocation17_spill] sm:$0xff] %v4623_v38 }
 0x177   : > { %3632 = vmatpush3.bf16.msra.mxu1 %v1333_v31  ;;  %v3321_v31 = vld [vmem:[%s4747_s14] sm:$0xff]  }
 0x178   : > { %3633 = vmatprep.subr.bf16.mxu1 %v1335_v32 }
 0x179   : > { %v4613_v33 = vpop.permute.xlu1 %1606  ;;  %v4627_v40 = vpop.permute.xlu0 %1610 }
 0x17a   : > { %6064 = vst [vmem:[#allocation19_spill] sm:$0xff] %v4627_v40 }
 0x17b   : > { %3634 = vmatpush3.bf16.msra.mxu1 %v1335_v32  ;;  %v1226_v32 = vsub.s32 1, %v4670_v13 }
 0x17d   : > { %v4615_v34 = vpop.permute.xlu1 %1880 }
 0x17e   : > { %v1339_v43 = vpop.permute.xlu0 %1338 }
 0x181   : > { %v4619_v36 = vpop.permute.xlu1 %2154 }
 0x182   : > { %6060 = vst [vmem:[#allocation15_spill] sm:$0xff] %v4619_v36  ;;  %v4639_v48 = vpop.permute.xlu0 %1886 }
 0x185   : > { %v4621_v37 = vpop.permute.xlu1 %2428 }
 0x186   : > { %6061 = vst [vmem:[#allocation16_spill] sm:$0xff] %v4621_v37  ;;  %v4643_v50 = vpop.permute.xlu0 %1614 }
 0x187   : > { %6070 = vst [vmem:[#allocation25_spill] sm:$0xff] %v4643_v50 }
 0x189   : > { %v4625_v39 = vpop.permute.xlu1 %1608 }
 0x18a   : > { %6063 = vst [vmem:[#allocation18_spill] sm:$0xff] %v4625_v39  ;;  %v1343_v54 = vpop.permute.xlu0 %1342 }
 0x18d   : > { %v4629_v41 = vpop.permute.xlu1 %2430 }
 0x18e   : > { %6065 = vst [vmem:[#allocation20_spill] sm:$0xff] %v4629_v41 }
 0x191   : > { %v1337_v42 = vpop.permute.xlu1 %1336 }
 0x192   : > { %3635 = vmatprep.subr.bf16.mxu1 %v1337_v42 }
 0x193   : > { %3636 = vmatpush3.bf16.msra.mxu1 %v1337_v42  ;;  %v3323_v42 = vunpack.c.h.bf16 %v3321_v31 }
 0x194   : > { %3637 = vmatprep.subr.bf16.mxu1 %v1339_v43 }
 0x195   : > { %v4631_v44 = vpop.permute.xlu1 %1884 }
 0x197   : > { %3638 = vmatpush3.bf16.msra.mxu1 %v1339_v43  ;;  %v4755_v43 = vpop.permute.xlu0 %1890 }
 0x198   : > { %6075 = vst [vmem:[#allocation30_spill] sm:$0xff] %v4755_v43 }
 0x199   : > { %v4633_v45 = vpop.permute.xlu1 %2158 }
 0x19a   : > { %6066 = vst [vmem:[#allocation21_spill] sm:$0xff] %v4633_v45  ;;  %v6086_v45 = vmov 2  }
 0x19d   : > { %v4635_v46 = vpop.permute.xlu1 %2432 }
 0x19e   : > { %6067 = vst [vmem:[#allocation22_spill] sm:$0xff] %v4635_v46 }
 0x1a1   : > { %v4637_v47 = vpop.permute.xlu1 %1612 }
 0x1a2   : > { %6068 = vst [vmem:[#allocation23_spill] sm:$0xff] %v4637_v47 }
 0x1a5   : > { %v4641_v49 = vpop.permute.xlu1 %2160 }
 0x1a6   : > { %6069 = vst [vmem:[#allocation24_spill] sm:$0xff] %v4641_v49  ;;  %v6083_v49 = vmov 1  }
 0x1a9   : > { %v4645_v52 = vpop.permute.xlu1 %2434 }
 0x1aa   : > { %6071 = vst [vmem:[#allocation26_spill] sm:$0xff] %v4645_v52 }
 0x1ad   : > { %v1341_v53 = vpop.permute.xlu1 %1340 }
 0x1ae   : > { %3639 = vmatprep.subr.bf16.mxu1 %v1341_v53 }
 0x1af   : > { %3640 = vmatpush3.bf16.msra.mxu1 %v1341_v53 }
 0x1b0   : > { %3641 = vmatprep.subr.bf16.mxu1 %v1343_v54 }
 0x1b1   : > { %v4749_v25 = vpop.permute.xlu1 %1888 }
 0x1b2   : > { %6074 = vst [vmem:[#allocation29_spill] sm:$0xff] %v4749_v25 }
 0x1b3   : > { %3642 = vmatpush3.bf16.msra.mxu1 %v1343_v54 }
 0x1b4   : > { %3675 = vmatprep.subr.bf16.mxu1 %v4601_v24 }
 0x1b5   : > { %v4757_v53 = vpop.permute.xlu1 %1616 }
 0x1b6   : > { %6076 = vst [vmem:[#allocation31_spill] sm:$0xff] %v4757_v53 }
 0x1dd   : > { %v3593_v56 = vpop.f32.mrb[24].mxu0 }
 0x1de   : > { %1197 = vperm.xlu0 %3885, %v3593_v56   ;;  %973 = vperm.xlu1 %3884, %v3593_v56   ;;  %v895_v57 = vpop.f32.mrb[25].mxu0 }
 0x1e2   : > { %3886 = vset.pattern.permute.xlu0 %v5956_v59  ;;  %3887 = vset.pattern.permute.xlu1 %v5968_v60 }
 0x1e3   : > { %1479 = vperm.xlu0 %3886, %v3593_v56   ;;  %1753 = vperm.xlu1 %3887, %v3593_v56  }
 0x1e4   : > { %v4650_v62 = vpop.f32.mrb[26].mxu0 }
 0x1e5   : > { %v4652_v63 = vpop.f32.mrb[27].mxu0 }
 0x1e7   : > { %3889 = vset.pattern.permute.xlu0 %v5975_v1  ;;  %3888 = vset.pattern.permute.xlu1 %v5955_v2 }
 0x1e8   : > { %2301 = vperm.xlu0 %3889, %v3593_v56   ;;  %2027 = vperm.xlu1 %3888, %v3593_v56  }
 0x1e9   : > { %v4656_v4 = vpop.f32.mrb[28].mxu0 }
 0x1ea   : > { %v4658_v5 = vpop.f32.mrb[29].mxu0 }
 0x1ec   : > { %3891 = vset.pattern.permute.xlu0 %v5962_v7  ;;  %3890 = vset.pattern.permute.xlu1 %v5957_v8 }
 0x1ed   : > { %2849 = vperm.xlu0 %3891, %v3593_v56   ;;  %2575 = vperm.xlu1 %3890, %v3593_v56   ;;  %v4662_v10 = vpop.f32.mrb[30].mxu0  ;;  %v1782_v56 = vsub.s32 3, %v4670_v13 }
 0x1ee   : > { %v4664_v11 = vpop.f32.mrb[31].mxu0 }
 0x1f1   : > { %3895 = vset.pattern.permute.xlu0 %v5968_v60  ;;  %3892 = vset.pattern.permute.xlu1 %v5958_v19 }
 0x1f2   : > { %1749 = vperm.xlu0 %3895, %v895_v57   ;;  %968 = vperm.xlu1 %3892, %v895_v57  }
 0x1f6   : > { %3896 = vset.pattern.permute.xlu0 %v5955_v2  ;;  %3893 = vset.pattern.permute.xlu1 %v5960_v20 }
 0x1f7   : > { %2023 = vperm.xlu0 %3896, %v895_v57   ;;  %1193 = vperm.xlu1 %3893, %v895_v57  }
 0x1fb   : > { %3898 = vset.pattern.permute.xlu0 %v5957_v8  ;;  %3894 = vset.pattern.permute.xlu1 %v5956_v59 }
 0x1fc   : > { %2571 = vperm.xlu0 %3898, %v895_v57   ;;  %1475 = vperm.xlu1 %3894, %v895_v57  }
 0x1fe   : > { %v4676_v16 = vpop.f32.mrb[0].mxu1 }
 0x1ff   : > { %v3558_v17 = vpop.f32.mrb[1].mxu1  ;;  %v4681_v18 = vrot.slane %v4676_v16, %v2604_v14  ;;  %v4685_v22 = vrot.slane %v4676_v16, %v2878_v15  ;;  %v4761_v54 = vrot.slane %v4676_v16, %v1226_v32  ;;  %v4769_v14 = vrot.slane %v4676_v16, %v1782_v56 }
 0x200   : > { %3903 = vset.pattern.permute.xlu0 %v5968_v60  ;;  %3897 = vset.pattern.permute.xlu1 %v5975_v1  ;;  %v4816_v58 = vrot.slane %v4676_v16, %v2056_v3 }
 0x201   : > { %6072 = vst [vmem:[#allocation27_spill] sm:$0xff] %v4681_v18  ;;  %2297 = vperm.xlu1 %3897, %v895_v57   ;;  %1761 = vperm.xlu0 %3903, %v4650_v62   ;;  %6073 = vst [vmem:[#allocation28_spill] sm:$0xff] %v4685_v22 }
 0x205   : > { %3899 = vset.pattern.permute.xlu1 %v5962_v7  ;;  %3904 = vset.pattern.permute.xlu0 %v5955_v2 }
 0x206   : > { %2845 = vperm.xlu1 %3899, %v895_v57   ;;  %2035 = vperm.xlu0 %3904, %v4650_v62   ;;  %v3303_v57 = vadd.f32 -1.0, %v3323_v42 }
 0x208   : > { %v4772_v15 = vmul.f32 1e+30, %v3303_v57 }
 0x20a   : > { %3900 = vset.pattern.permute.xlu1 %v5958_v19  ;;  %3906 = vset.pattern.permute.xlu0 %v5957_v8  ;;  %6077 = vst [vmem:[#allocation32_spill] sm:$0xff] %v4772_v15 }
 0x20b   : > { %2583 = vperm.xlu0 %3906, %v4650_v62   ;;  %983 = vperm.xlu1 %3900, %v4650_v62  }
 0x20f   : > { %3901 = vset.pattern.permute.xlu1 %v5960_v20  ;;  %3919 = vset.pattern.permute.xlu0 %v5968_v60 }
 0x210   : > { %1205 = vperm.xlu1 %3901, %v4650_v62   ;;  %1769 = vperm.xlu0 %3919, %v4656_v4  }
 0x214   : > { %3902 = vset.pattern.permute.xlu1 %v5956_v59  ;;  %3921 = vset.pattern.permute.xlu0 %v5975_v1 }
 0x215   : > { %1487 = vperm.xlu1 %3902, %v4650_v62   ;;  %2317 = vperm.xlu0 %3921, %v4656_v4  }
 0x219   : > { %3905 = vset.pattern.permute.xlu1 %v5975_v1  ;;  %3923 = vset.pattern.permute.xlu0 %v5962_v7 }
 0x21a   : > { %2309 = vperm.xlu1 %3905, %v4650_v62   ;;  %2865 = vperm.xlu0 %3923, %v4656_v4  }
 0x21e   : > { %3907 = vset.pattern.permute.xlu1 %v5962_v7  ;;  %3926 = vset.pattern.permute.xlu0 %v5956_v59 }
 0x21f   : > { %2857 = vperm.xlu1 %3907, %v4650_v62   ;;  %1491 = vperm.xlu0 %3926, %v4658_v5  }
 0x223   : > { %3908 = vset.pattern.permute.xlu1 %v5958_v19  ;;  %3928 = vset.pattern.permute.xlu0 %v5955_v2 }
 0x224   : > { %978 = vperm.xlu1 %3908, %v4652_v63   ;;  %2039 = vperm.xlu0 %3928, %v4658_v5  }
 0x228   : > { %3909 = vset.pattern.permute.xlu1 %v5960_v20  ;;  %3930 = vset.pattern.permute.xlu0 %v5957_v8 }
 0x229   : > { %1201 = vperm.xlu1 %3909, %v4652_v63   ;;  %2587 = vperm.xlu0 %3930, %v4658_v5  }
 0x22d   : > { %3910 = vset.pattern.permute.xlu1 %v5956_v59  ;;  %3935 = vset.pattern.permute.xlu0 %v5968_v60 }
 0x22e   : > { %1483 = vperm.xlu1 %3910, %v4652_v63   ;;  %1777 = vperm.xlu0 %3935, %v4662_v10  }
 0x232   : > { %3911 = vset.pattern.permute.xlu1 %v5968_v60  ;;  %3936 = vset.pattern.permute.xlu0 %v5955_v2 }
 0x233   : > { %1757 = vperm.xlu1 %3911, %v4652_v63   ;;  %2051 = vperm.xlu0 %3936, %v4662_v10  }
 0x237   : > { %3912 = vset.pattern.permute.xlu1 %v5955_v2  ;;  %3938 = vset.pattern.permute.xlu0 %v5957_v8 }
 0x238   : > { %2031 = vperm.xlu1 %3912, %v4652_v63   ;;  %2599 = vperm.xlu0 %3938, %v4662_v10  }
 0x23c   : > { %3913 = vset.pattern.permute.xlu1 %v5975_v1  ;;  %3942 = vset.pattern.permute.xlu0 %v5956_v59 }
 0x23d   : > { %2305 = vperm.xlu1 %3913, %v4652_v63   ;;  %1499 = vperm.xlu0 %3942, %v4664_v11  }
 0x241   : > { %3914 = vset.pattern.permute.xlu1 %v5957_v8  ;;  %3948 = vset.pattern.permute.xlu0 %v5962_v7 }
 0x242   : > { %2579 = vperm.xlu1 %3914, %v4652_v63  }
 0x246   : > { %3915 = vset.pattern.permute.xlu1 %v5962_v7 }
 0x247   : > { %2853 = vperm.xlu1 %3915, %v4652_v63  }
 0x24b   : > { %3916 = vset.pattern.permute.xlu1 %v5958_v19 }
 0x24c   : > { %993 = vperm.xlu1 %3916, %v4656_v4  }
 0x250   : > { %3917 = vset.pattern.permute.xlu1 %v5960_v20 }
 0x251   : > { %1213 = vperm.xlu1 %3917, %v4656_v4  }
 0x255   : > { %3918 = vset.pattern.permute.xlu1 %v5956_v59 }
 0x256   : > { %1495 = vperm.xlu1 %3918, %v4656_v4  }
 0x25a   : > { %3920 = vset.pattern.permute.xlu1 %v5955_v2 }
 0x25b   : > { %2043 = vperm.xlu1 %3920, %v4656_v4  }
 0x25d   : > { %v1198_v62 = vpop.permute.xlu0 %1197  ;;  %v4765_v63 = vpop.permute.xlu1 %973 }
 0x25e   : > { %v1229_v12 = vadd.f32 %v4761_v54, %v1198_v62 }
 0x25f   : > { %3922 = vset.pattern.permute.xlu1 %v5957_v8 }
 0x260   : > { %v1237_v17 = vmul.f32 0.6, %v1229_v12  ;;  %2591 = vperm.xlu1 %3922, %v4656_v4  }
 0x262   : > { %v4775_v32 = vpop.permute.xlu0 %1479  ;;  %v1754_v2 = vpop.permute.xlu1 %1753  ;;  %v1245_v59 = vmax.f32 %v1229_v12, %v1237_v17 }
 0x263   : > { %v1785_v42 = vadd.f32 %v4769_v14, %v1754_v2  ;;  %v1008_v2 = vsub.s32 0, %v4670_v13 }
 0x264   : > { %3924 = vset.pattern.permute.xlu1 %v5958_v19  ;;  %v4780_v62 = vadd.f32 %v1245_v59, %v4772_v15  ;;  %v3322_v59 = vunpack.c.l.bf16 %v3321_v31 }
 0x265   : > { %v1793_v56 = vmul.f32 0.6, %v1785_v42  ;;  %988 = vperm.xlu1 %3924, %v4658_v5  }
 0x266   : > { %1262 = vmax.xlane.f32.xlu0 %v4780_v62 }
 0x267   : > { %v4784_v57 = vpop.permute.xlu0 %2301  ;;  %v4786_v8 = vpop.permute.xlu1 %2027  ;;  %v1801_v4 = vmax.f32 %v1785_v42, %v1793_v56  ;;  %v3302_v42 = vadd.f32 -1.0, %v3322_v59  ;;  %v4802_v56 = vrot.slane %v4676_v16, %v1008_v2 }
 0x269   : > { %3925 = vset.pattern.permute.xlu1 %v5960_v20  ;;  %v4790_v12 = vadd.f32 %v1801_v4, %v4772_v15  ;;  %v4808_v31 = vmul.f32 1e+30, %v3302_v42 }
 0x26a   : > { %1209 = vperm.xlu1 %3925, %v4658_v5  }
 0x26b   : > { %1818 = vmax.xlane.f32.xlu0 %v4790_v12  ;;  %6080 = vst [vmem:[#allocation35_spill] sm:$0xff] %v4808_v31 }
 0x26c   : > { %v4795_v17 = vpop.permute.xlu0 %2849  ;;  %v4797_v19 = vpop.permute.xlu1 %2575 }
 0x26d   : > { %6078 = vst [vmem:[#allocation33_spill] sm:$0xff] %v4795_v17  ;;  %6079 = vst [vmem:[#allocation34_spill] sm:$0xff] %v4797_v19 }
 0x26e   : > { %3927 = vset.pattern.permute.xlu1 %v5968_v60  ;;  %v1508_v60 = vsub.s32 2, %v4670_v13 }
 0x26f   : > { %1765 = vperm.xlu1 %3927, %v4658_v5  }
 0x270   : > { %v4824_v42 = vrot.slane %v4676_v16, %v1508_v60 }
 0x271   : > { %v4804_v4 = vpop.permute.xlu0 %1749  ;;  %v969_v20 = vpop.permute.xlu1 %968 }
 0x272   : > { %v1010_v7 = vadd.f32 %v4802_v56, %v969_v20  ;;  %v1511_v37 = vadd.f32 %v4824_v42, %v4775_v32 }
 0x273   : > { %3929 = vset.pattern.permute.xlu1 %v5975_v1 }
 0x274   : > { %v1018_v0 = vmul.f32 0.6, %v1010_v7  ;;  %2313 = vperm.xlu1 %3929, %v4658_v5   ;;  %v1519_v23 = vmul.f32 0.6, %v1511_v37 }
 0x276   : > { %v4813_v59 = vpop.permute.xlu1 %1193  ;;  %v1026_v2 = vmax.f32 %v1010_v7, %v1018_v0  ;;  %v2024_v61 = vpop.permute.xlu0 %2023  ;;  %v6082_v7 = vmov 0   ;;  %v1527_v53 = vmax.f32 %v1511_v37, %v1519_v23 }
 0x277   : > { %v2058_v1 = vadd.f32 %v4816_v58, %v2024_v61 }
 0x278   : > { %3931 = vset.pattern.permute.xlu1 %v6081_v55  ;;  %v4820_v20 = vadd.f32 %v1026_v2, %v4808_v31 }
 0x279   : > { %2861 = vperm.xlu1 %3931, %v4658_v5   ;;  %v2066_v3 = vmul.f32 0.6, %v2058_v1 }
 0x27a   : > { %1042 = vmax.xlane.f32.xlu0 %v4820_v20 }
 0x27b   : > { %v1476_v17 = vpop.permute.xlu1 %1475  ;;  %v2074_v61 = vmax.f32 %v2058_v1, %v2066_v3  ;;  %v3336_v1 = vld [vmem:[%s4747_s14 + $0x8] sm:$0xff]   ;;  %v4936_v32 = vpop.permute.xlu0 %2571 }
 0x27c   : > { %v1510_v0 = vadd.f32 %v4824_v42, %v1476_v17  ;;  %6099 = vst [vmem:[#allocation46_spill] sm:$0xff] %v4936_v32 }
 0x27d   : > { %3932 = vset.pattern.permute.xlu1 %v6082_v7  ;;  %v4842_v22 = vadd.f32 %v2074_v61, %v4808_v31 }
 0x27e   : > { %v1518_v51 = vmul.f32 0.6, %v1510_v0  ;;  %1003 = vperm.xlu1 %3932, %v4662_v10  }
 0x27f   : > { %6085 = vst [vmem:[#allocation37_spill] sm:$0xff] %v4842_v22 }
 0x280   : > { %v4831_v2 = vpop.permute.xlu1 %2297  ;;  %v1526_v5 = vmax.f32 %v1510_v0, %v1518_v51  ;;  %v6087_v0 = vmov 5  }
 0x282   : > { %3933 = vset.pattern.permute.xlu1 %v6083_v49  ;;  %v4835_v60 = vadd.f32 %v1526_v5, %v4808_v31  ;;  %v3327_v5 = vunpack.c.h.bf16 %v3336_v1 }
 0x283   : > { %1221 = vperm.xlu1 %3933, %v4662_v10  }
 0x284   : > { %1542 = vmax.xlane.f32.xlu0 %v4835_v60 }
 0x285   : > { %v4839_v17 = vpop.permute.xlu1 %2845 }
 0x286   : > { %6084 = vst [vmem:[#allocation36_spill] sm:$0xff] %v4839_v17  ;;  %v3305_v17 = vadd.f32 -1.0, %v3327_v5 }
 0x287   : > { %3934 = vset.pattern.permute.xlu1 %v6086_v45  ;;  %v2330_v45 = vsub.s32 5, %v4670_v13 }
 0x288   : > { %1503 = vperm.xlu1 %3934, %v4662_v10   ;;  %2090 = vmax.xlane.f32.xlu0 %v4842_v22  ;;  %v4863_v46 = vmul.f32 1e+30, %v3305_v17 }
 0x289   : > { %v4861_v19 = vrot.slane %v4676_v16, %v2330_v45  ;;  %v6090_v45 = vmov 3  }
 0x28a   : > { %v4847_v51 = vpop.permute.xlu1 %983  ;;  %6088 = vst [vmem:[#allocation38_spill] sm:$0xff] %v4863_v46 }
 0x28c   : > { %3937 = vset.pattern.permute.xlu1 %v6087_v0 }
 0x28d   : > { %2325 = vperm.xlu1 %3937, %v4662_v10  }
 0x28f   : > { %v4852_v3 = vpop.permute.xlu1 %1205 }
 0x291   : > { %3939 = vset.pattern.permute.xlu1 %v6081_v55 }
 0x292   : > { %2873 = vperm.xlu1 %3939, %v4662_v10  }
 0x294   : > { %v1488_v61 = vpop.permute.xlu1 %1487 }
 0x295   : > { %v1513_v52 = vadd.f32 %v4824_v42, %v1488_v61 }
 0x296   : > { %3940 = vset.pattern.permute.xlu1 %v6082_v7 }
 0x297   : > { %v1521_v38 = vmul.f32 0.6, %v1513_v52  ;;  %998 = vperm.xlu1 %3940, %v4664_v11  }
 0x299   : > { %v2310_v36 = vpop.permute.xlu1 %2309  ;;  %v1529_v41 = vmax.f32 %v1513_v52, %v1521_v38  ;;  %v3326_v38 = vunpack.c.l.bf16 %v3336_v1  ;;  %v6094_v1 = vmov 6  }
 0x29a   : > { %v2335_v10 = vadd.f32 %v4861_v19, %v2310_v36 }
 0x29b   : > { %3941 = vset.pattern.permute.xlu1 %v6083_v49  ;;  %v4868_v13 = vadd.f32 %v1529_v41, %v4863_v46  ;;  %v6092_v41 = vmov 4   ;;  %v3304_v52 = vadd.f32 -1.0, %v3326_v38 }
 0x29c   : > { %v2343_v5 = vmul.f32 0.6, %v2335_v10  ;;  %1217 = vperm.xlu1 %3941, %v4664_v11  }
 0x29d   : > { %1548 = vmax.xlane.f32.xlu0 %v4868_v13 }
 0x29e   : > { %v4872_v7 = vpop.permute.xlu1 %2857  ;;  %v2351_v16 = vmax.f32 %v2335_v10, %v2343_v5  ;;  %v4887_v5 = vmul.f32 1e+30, %v3304_v52 }
 0x29f   : > { %6089 = vst [vmem:[#allocation39_spill] sm:$0xff] %v4872_v7 }
 0x2a0   : > { %3943 = vset.pattern.permute.xlu1 %v6090_v45  ;;  %v4876_v17 = vadd.f32 %v2351_v16, %v4863_v46  ;;  %6093 = vst [vmem:[#allocation41_spill] sm:$0xff] %v4887_v5 }
 0x2a1   : > { %1773 = vperm.xlu1 %3943, %v4664_v11  }
 0x2a2   : > { %6091 = vst [vmem:[#allocation40_spill] sm:$0xff] %v4876_v17  ;;  %2370 = vmax.xlane.f32.xlu0 %v4876_v17 }
 0x2a3   : > { %v4880_v36 = vpop.permute.xlu1 %978 }
 0x2a5   : > { %3944 = vset.pattern.permute.xlu1 %v6092_v41 }
 0x2a6   : > { %2047 = vperm.xlu1 %3944, %v4664_v11  }
 0x2a8   : > { %v1202_v49 = vpop.permute.xlu1 %1201 }
 0x2a9   : > { %v1230_v61 = vadd.f32 %v4761_v54, %v1202_v49 }
 0x2aa   : > { %3945 = vset.pattern.permute.xlu1 %v6087_v0 }
 0x2ab   : > { %v1238_v10 = vmul.f32 0.6, %v1230_v61  ;;  %2321 = vperm.xlu1 %3945, %v4664_v11  }
 0x2ad   : > { %v1484_v16 = vpop.permute.xlu1 %1483  ;;  %v1246_v45 = vmax.f32 %v1230_v61, %v1238_v10 }
 0x2ae   : > { %v1512_v7 = vadd.f32 %v4824_v42, %v1484_v16 }
 0x2af   : > { %3946 = vset.pattern.permute.xlu1 %v6094_v1  ;;  %v4892_v41 = vadd.f32 %v1246_v45, %v4887_v5 }
 0x2b0   : > { %v1520_v17 = vmul.f32 0.6, %v1512_v7  ;;  %2595 = vperm.xlu1 %3946, %v4664_v11  }
 0x2b1   : > { %1264 = vmax.xlane.f32.xlu0 %v4892_v41 }
 0x2b2   : > { %v1758_v0 = vpop.permute.xlu1 %1757  ;;  %v1528_v38 = vmax.f32 %v1512_v7, %v1520_v17 }
 0x2b3   : > { %v1786_v49 = vadd.f32 %v4769_v14, %v1758_v0  ;;  %v1011_v0 = vadd.f32 %v4802_v56, %v4765_v63  ;;  %v2059_v63 = vadd.f32 %v4816_v58, %v4786_v8  ;;  %v1762_v8 = vpop.permute.xlu0 %1761 }
 0x2b4   : > { %3947 = vset.pattern.permute.xlu1 %v6081_v55  ;;  %v4899_v52 = vadd.f32 %v1528_v38, %v4887_v5  ;;  %v4914_v55 = vld [vmem:[%s4747_s14 + $0x10] sm:$0xff]  }
 0x2b5   : > { %v1794_v61 = vmul.f32 0.6, %v1786_v49  ;;  %2869 = vperm.xlu1 %3947, %v4664_v11   ;;  %v3331_v11 = vunpack.c.h.bf16 %v4914_v55  ;;  %v1019_v28 = vmul.f32 0.6, %v1011_v0 }
 0x2b6   : > { %6095 = vst [vmem:[#allocation42_spill] sm:$0xff] %v4899_v52  ;;  %1546 = vmax.xlane.f32.xlu0 %v4899_v52 }
 0x2b7   : > { %v4903_v10 = vpop.permute.xlu1 %2031  ;;  %v1802_v16 = vmax.f32 %v1786_v49, %v1794_v61  ;;  %v3307_v49 = vadd.f32 -1.0, %v3331_v11  ;;  %v1027_v18 = vmax.f32 %v1011_v0, %v1019_v28 }
 0x2b9   : > { %v4906_v45 = vadd.f32 %v1802_v16, %v4887_v5  ;;  %v4924_v30 = vmul.f32 1e+30, %v3307_v49 }
 0x2bb   : > { %1820 = vmax.xlane.f32.xlu0 %v4906_v45  ;;  %6098 = vst [vmem:[#allocation45_spill] sm:$0xff] %v4924_v30 }
 0x2bc   : > { %v4909_v7 = vpop.permute.xlu1 %2305 }
 0x2bd   : > { %v2334_v40 = vadd.f32 %v4861_v19, %v4909_v7 }
 0x2c1   : > { %v4911_v17 = vpop.permute.xlu1 %2579 }
 0x2c2   : > { %6096 = vst [vmem:[#allocation43_spill] sm:$0xff] %v4911_v17 }
 0x2c6   : > { %v4916_v1 = vpop.permute.xlu1 %2853 }
 0x2c7   : > { %6097 = vst [vmem:[#allocation44_spill] sm:$0xff] %v4916_v1 }
 0x2cb   : > { %v994_v38 = vpop.permute.xlu1 %993 }
 0x2cc   : > { %v1015_v61 = vadd.f32 %v4802_v56, %v994_v38  ;;  %v2333_v38 = vadd.f32 %v4861_v19, %v4784_v57  ;;  %v1228_v57 = vadd.f32 %v4761_v54, %v4813_v59 }
 0x2ce   : > { %v1023_v16 = vmul.f32 0.6, %v1015_v61  ;;  %v2341_v0 = vmul.f32 0.6, %v2333_v38 }
 0x2d0   : > { %v4926_v17 = vpop.permute.xlu1 %1213  ;;  %v1031_v22 = vmax.f32 %v1015_v61, %v1023_v16  ;;  %v2067_v61 = vmul.f32 0.6, %v2059_v63 }
 0x2d2   : > { %v4929_v1 = vadd.f32 %v1031_v22, %v4924_v30  ;;  %v4940_v22 = vadd.f32 %v1027_v18, %v4772_v15  ;;  %v2075_v27 = vmax.f32 %v2059_v63, %v2067_v61  ;;  %v2349_v18 = vmax.f32 %v2333_v38, %v2341_v0 }
 0x2d3   : > { %v1784_v63 = vadd.f32 %v4769_v14, %v4804_v4  ;;  %v2332_v0 = vadd.f32 %v4861_v19, %v4831_v2 }
 0x2d4   : > { %1052 = vmax.xlane.f32.xlu0 %v4929_v1  ;;  %v4959_v59 = vadd.f32 %v2075_v27, %v4772_v15  ;;  %v4969_v4 = vadd.f32 %v2349_v18, %v4772_v15  ;;  %v3330_v27 = vunpack.c.l.bf16 %v4914_v55 }
 0x2d5   : > { %v1496_v11 = vpop.permute.xlu1 %1495 }
 0x2d6   : > { %v1515_v49 = vadd.f32 %v4824_v42, %v1496_v11  ;;  %v4947_v11 = vadd.f32 %v1527_v53, %v4772_v15  ;;  %6101 = vst [vmem:[#allocation48_spill] sm:$0xff] %v4959_v59  ;;  %6103 = vst [vmem:[#allocation50_spill] sm:$0xff] %v4969_v4  ;;  %v3306_v18 = vadd.f32 -1.0, %v3330_v27 }
 0x2d8   : > { %v1523_v28 = vmul.f32 0.6, %v1515_v49 }
 0x2d9   : > { %1044 = vmax.xlane.f32.xlu1 %v4940_v22 }
 0x2da   : > { %v2044_v16 = vpop.permute.xlu1 %2043  ;;  %v1531_v50 = vmax.f32 %v1515_v49, %v1523_v28  ;;  %v1236_v49 = vmul.f32 0.6, %v1228_v57  ;;  %v2036_v28 = vpop.permute.xlu0 %2035 }
 0x2db   : > { %v2063_v32 = vadd.f32 %v4816_v58, %v2044_v16  ;;  %v1792_v16 = vmul.f32 0.6, %v1784_v63 }
 0x2dc   : > { %v4950_v23 = vadd.f32 %v1531_v50, %v4924_v30  ;;  %v1244_v38 = vmax.f32 %v1228_v57, %v1236_v49  ;;  %v1013_v57 = vadd.f32 %v4802_v56, %v4847_v51 }
 0x2dd   : > { %v2071_v37 = vmul.f32 0.6, %v2063_v32  ;;  %1544 = vmax.xlane.f32.xlu1 %v4947_v11 }
 0x2de   : > { %1552 = vmax.xlane.f32.xlu0 %v4950_v23  ;;  %v4980_v2 = vadd.f32 %v1244_v38, %v4808_v31  ;;  %v1021_v55 = vmul.f32 0.6, %v1013_v57  ;;  %v4992_v38 = vmul.f32 1e+30, %v3306_v18 }
 0x2df   : > { %v4956_v61 = vpop.permute.xlu1 %2591  ;;  %v2079_v53 = vmax.f32 %v2063_v32, %v2071_v37  ;;  %v4975_v32 = vpop.permute.xlu0 %2583  ;;  %v1800_v37 = vmax.f32 %v1784_v63, %v1792_v16  ;;  %v1231_v63 = vadd.f32 %v4761_v54, %v4852_v3 }
 0x2e0   : > { %6100 = vst [vmem:[#allocation47_spill] sm:$0xff] %v4956_v61  ;;  %6104 = vst [vmem:[#allocation51_spill] sm:$0xff] %v4975_v32  ;;  %v1787_v32 = vadd.f32 %v4769_v14, %v1762_v8  ;;  %v1029_v47 = vmax.f32 %v1013_v57, %v1021_v55  ;;  %v2061_v8 = vadd.f32 %v4816_v58, %v2036_v28 }
 0x2e1   : > { %2092 = vmax.xlane.f32.xlu1 %v4959_v59  ;;  %v4963_v50 = vadd.f32 %v2079_v53, %v4924_v30  ;;  %v2340_v53 = vmul.f32 0.6, %v2332_v0  ;;  %v4989_v16 = vadd.f32 %v1800_v37, %v4808_v31  ;;  %6105 = vst [vmem:[#allocation52_spill] sm:$0xff] %v4992_v38  ;;  %v1239_v52 = vmul.f32 0.6, %v1231_v63 }
 0x2e2   : > { %v1795_v18 = vmul.f32 0.6, %v1787_v32  ;;  %v5010_v55 = vadd.f32 %v1029_v47, %v4863_v46 }
 0x2e3   : > { %6102 = vst [vmem:[#allocation49_spill] sm:$0xff] %v4963_v50  ;;  %2100 = vmax.xlane.f32.xlu0 %v4963_v50  ;;  %v4983_v15 = vpop.permute.xlu0 %1769  ;;  %v2348_v59 = vmax.f32 %v2332_v0, %v2340_v53 }
 0x2e4   : > { %v4971_v61 = vpop.permute.xlu1 %988 }
 0x2e5   : > { %2366 = vmax.xlane.f32.xlu1 %v4969_v4  ;;  %v4997_v53 = vadd.f32 %v2348_v59, %v4808_v31  ;;  %v1803_v31 = vmax.f32 %v1787_v32, %v1795_v18  ;;  %v2060_v32 = vadd.f32 %v4816_v58, %v4903_v10 }
 0x2e7   : > { %6106 = vst [vmem:[#allocation53_spill] sm:$0xff] %v4997_v53  ;;  %v4999_v3 = vpop.permute.xlu0 %2317  ;;  %v5034_v18 = vadd.f32 %v1803_v31, %v4863_v46  ;;  %v2068_v43 = vmul.f32 0.6, %v2060_v32 }
 0x2e9   : > { %v1210_v49 = vpop.permute.xlu1 %1209  ;;  %1260 = vmax.xlane.f32.xlu1 %v4980_v2  ;;  %6109 = vst [vmem:[#allocation56_spill] sm:$0xff] %v5034_v18 }
 0x2ea   : > { %v1232_v50 = vadd.f32 %v4761_v54, %v1210_v49 }
 0x2ec   : > { %v1240_v51 = vmul.f32 0.6, %v1232_v50 }
 0x2ed   : > { %1816 = vmax.xlane.f32.xlu1 %v4989_v16 }
 0x2ee   : > { %v1766_v27 = vpop.permute.xlu1 %1765  ;;  %v1248_v4 = vmax.f32 %v1232_v50, %v1240_v51  ;;  %v1247_v50 = vmax.f32 %v1231_v63, %v1239_v52  ;;  %v5016_v51 = vpop.permute.xlu0 %2865  ;;  %v1012_v52 = vadd.f32 %v4802_v56, %v4880_v36 }
 0x2ef   : > { %v1788_v0 = vadd.f32 %v4769_v14, %v1766_v27  ;;  %6107 = vst [vmem:[#allocation54_spill] sm:$0xff] %v5016_v51  ;;  %v5019_v27 = vld [vmem:[%s4747_s14 + $0x18] sm:$0xff]  }
 0x2f0   : > { %v5002_v37 = vadd.f32 %v1248_v4, %v4992_v38  ;;  %v5025_v47 = vadd.f32 %v1247_v50, %v4863_v46  ;;  %v3335_v63 = vunpack.c.h.bf16 %v5019_v27 }
 0x2f1   : > { %v1796_v49 = vmul.f32 0.6, %v1788_v0  ;;  %2364 = vmax.xlane.f32.xlu1 %v4997_v53  ;;  %v2069_v53 = vmul.f32 0.6, %v2061_v8 }
 0x2f2   : > { %1268 = vmax.xlane.f32.xlu0 %v5002_v37  ;;  %v1492_v36 = vpop.permute.xlu0 %1491  ;;  %v3309_v50 = vadd.f32 -1.0, %v3335_v63  ;;  %v2342_v63 = vmul.f32 0.6, %v2334_v40 }
 0x2f3   : > { %v5007_v57 = vpop.permute.xlu1 %2313  ;;  %v1804_v59 = vmax.f32 %v1788_v0, %v1796_v49  ;;  %v2077_v0 = vmax.f32 %v2061_v8, %v2069_v53  ;;  %v1020_v49 = vmul.f32 0.6, %v1012_v52 }
 0x2f4   : > { %v5044_v31 = vmul.f32 1e+30, %v3309_v50 }
 0x2f5   : > { %1048 = vmax.xlane.f32.xlu1 %v5010_v55  ;;  %v5014_v4 = vadd.f32 %v1804_v59, %v4992_v38  ;;  %v5041_v53 = vadd.f32 %v2077_v0, %v4863_v46  ;;  %v1789_v0 = vadd.f32 %v4769_v14, %v4983_v15  ;;  %v1014_v46 = vadd.f32 %v4802_v56, %v4971_v61 }
 0x2f6   : > { %6111 = vst [vmem:[#allocation58_spill] sm:$0xff] %v5044_v31  ;;  %v2040_v10 = vpop.permute.xlu0 %2039 }
 0x2f7   : > { %1824 = vmax.xlane.f32.xlu0 %v5014_v4  ;;  %6110 = vst [vmem:[#allocation57_spill] sm:$0xff] %v5041_v53  ;;  %v1797_v50 = vmul.f32 0.6, %v1789_v0 }
 0x2f8   : > { %v5027_v28 = vpop.permute.xlu1 %2861 }
 0x2f9   : > { %6108 = vst [vmem:[#allocation55_spill] sm:$0xff] %v5027_v28  ;;  %1266 = vmax.xlane.f32.xlu1 %v5025_v47  ;;  %v1028_v28 = vmax.f32 %v1012_v52, %v1020_v49  ;;  %v1233_v52 = vadd.f32 %v4761_v54, %v4926_v17 }
 0x2fa   : > { %v5061_v17 = vpop.permute.xlu0 %2587 }
 0x2fb   : > { %v5049_v49 = vadd.f32 %v1028_v28, %v4887_v5  ;;  %6114 = vst [vmem:[#allocation61_spill] sm:$0xff] %v5061_v17 }
 0x2fd   : > { %v1004_v59 = vpop.permute.xlu1 %1003  ;;  %1822 = vmax.xlane.f32.xlu1 %v5034_v18  ;;  %v2076_v18 = vmax.f32 %v2060_v32, %v2068_v43 }
 0x2fe   : > { %v1017_v51 = vadd.f32 %v4802_v56, %v1004_v59  ;;  %v1241_v59 = vmul.f32 0.6, %v1233_v52 }
 0x2ff   : > { %v5059_v32 = vadd.f32 %v2076_v18, %v4887_v5  ;;  %v1778_v18 = vpop.permute.xlu0 %1777 }
 0x300   : > { %v1025_v8 = vmul.f32 0.6, %v1017_v51 }
 0x301   : > { %2096 = vmax.xlane.f32.xlu1 %v5041_v53  ;;  %6113 = vst [vmem:[#allocation60_spill] sm:$0xff] %v5059_v32  ;;  %v1514_v53 = vadd.f32 %v4824_v42, %v1492_v36 }
 0x302   : > { %v1033_v25 = vmax.f32 %v1017_v51, %v1025_v8  ;;  %v1222_v39 = vpop.permute.xlu1 %1221  ;;  %v2350_v51 = vmax.f32 %v2334_v40, %v2342_v63  ;;  %v1249_v8 = vmax.f32 %v1233_v52, %v1241_v59  ;;  %v2062_v59 = vadd.f32 %v4816_v58, %v2040_v10 }
 0x304   : > { %v5052_v7 = vadd.f32 %v1033_v25, %v5044_v31  ;;  %v5068_v15 = vadd.f32 %v2350_v51, %v4887_v5  ;;  %v5078_v52 = vadd.f32 %v1249_v8, %v4924_v30  ;;  %v1522_v51 = vmul.f32 0.6, %v1514_v53 }
 0x305   : > { %1046 = vmax.xlane.f32.xlu1 %v5049_v49  ;;  %v2070_v8 = vmul.f32 0.6, %v2062_v59 }
 0x306   : > { %6112 = vst [vmem:[#allocation59_spill] sm:$0xff] %v5052_v7  ;;  %1056 = vmax.xlane.f32.xlu0 %v5052_v7  ;;  %6115 = vst [vmem:[#allocation62_spill] sm:$0xff] %v5068_v15 }
 0x307   : > { %v1504_v43 = vpop.permute.xlu1 %1503 }
 0x308   : > { %v1517_v28 = vadd.f32 %v4824_v42, %v1504_v43  ;;  %v1805_v43 = vmax.f32 %v1789_v0, %v1797_v50  ;;  %v2052_v0 = vpop.permute.xlu0 %2051  ;;  %v1530_v50 = vmax.f32 %v1514_v53, %v1522_v51 }
 0x309   : > { %2094 = vmax.xlane.f32.xlu1 %v5059_v32  ;;  %v1022_v32 = vmul.f32 0.6, %v1014_v46 }
 0x30a   : > { %v1525_v25 = vmul.f32 0.6, %v1517_v28 }
 0x30c   : > { %v1533_v40 = vmax.f32 %v1517_v28, %v1525_v25  ;;  %v5070_v63 = vpop.permute.xlu1 %2325  ;;  %v1030_v28 = vmax.f32 %v1014_v46, %v1022_v32  ;;  %v5086_v25 = vadd.f32 %v1805_v43, %v4924_v30  ;;  %v1791_v46 = vadd.f32 %v4769_v14, %v1778_v18  ;;  %v5096_v10 = vpop.permute.xlu0 %2599 }
 0x30d   : > { %2368 = vmax.xlane.f32.xlu1 %v5068_v15  ;;  %6119 = vst [vmem:[#allocation66_spill] sm:$0xff] %v5096_v10  ;;  %v2078_v32 = vmax.f32 %v2062_v59, %v2070_v8 }
 0x30e   : > { %v5074_v17 = vadd.f32 %v1533_v40, %v5044_v31  ;;  %6118 = vst [vmem:[#allocation65_spill] sm:$0xff] %v5086_v25  ;;  %v1235_v40 = vadd.f32 %v4761_v54, %v1222_v39  ;;  %v5091_v15 = vadd.f32 %v1030_v28, %v4992_v38  ;;  %v1799_v51 = vmul.f32 0.6, %v1791_v46 }
 0x30f   : > { %v5105_v18 = vadd.f32 %v2078_v32, %v4992_v38 }
 0x310   : > { %6116 = vst [vmem:[#allocation63_spill] sm:$0xff] %v5074_v17  ;;  %1556 = vmax.xlane.f32.xlu0 %v5074_v17  ;;  %v1243_v43 = vmul.f32 0.6, %v1235_v40  ;;  %v1500_v59 = vpop.permute.xlu0 %1499 }
 0x311   : > { %v5081_v61 = vpop.permute.xlu1 %2873  ;;  %1270 = vmax.xlane.f32.xlu1 %v5078_v52 }
 0x312   : > { %6117 = vst [vmem:[#allocation64_spill] sm:$0xff] %v5081_v61  ;;  %v3334_v61 = vunpack.c.l.bf16 %v5019_v27  ;;  %v1251_v27 = vmax.f32 %v1235_v40, %v1243_v43 }
 0x314   : > { %v3308_v53 = vadd.f32 -1.0, %v3334_v61  ;;  %v1516_v61 = vadd.f32 %v4824_v42, %v1500_v59 }
 0x315   : > { %1826 = vmax.xlane.f32.xlu1 %v5086_v25  ;;  %v5099_v25 = vadd.f32 %v1530_v50, %v4992_v38 }
 0x316   : > { %v999_v36 = vpop.permute.xlu1 %998  ;;  %v5107_v10 = vmul.f32 1e+30, %v3308_v53 }
 0x317   : > { %v1016_v17 = vadd.f32 %v4802_v56, %v999_v36  ;;  %v5116_v36 = vadd.f32 %v1251_v27, %v5044_v31 }
 0x318   : > { %6120 = vst [vmem:[#allocation67_spill] sm:$0xff] %v5107_v10 }
 0x319   : > { %1050 = vmax.xlane.f32.xlu1 %v5091_v15  ;;  %v1024_v40 = vmul.f32 0.6, %v1016_v17 }
 0x31b   : > { %v1218_v5 = vpop.permute.xlu1 %1217 }
 0x31c   : > { %v1234_v39 = vadd.f32 %v4761_v54, %v1218_v5  ;;  %v1807_v54 = vmax.f32 %v1791_v46, %v1799_v51  ;;  %v1032_v46 = vmax.f32 %v1016_v17, %v1024_v40  ;;  %v2336_v17 = vadd.f32 %v4861_v19, %v5007_v57 }
 0x31d   : > { %1550 = vmax.xlane.f32.xlu1 %v5099_v25 }
 0x31e   : > { %v1242_v28 = vmul.f32 0.6, %v1234_v39  ;;  %v5131_v27 = vadd.f32 %v1032_v46, %v5107_v10 }
 0x320   : > { %v1250_v8 = vmax.f32 %v1234_v39, %v1242_v28  ;;  %v1774_v7 = vpop.permute.xlu1 %1773  ;;  %v2065_v39 = vadd.f32 %v4816_v58, %v2052_v0 }
 0x321   : > { %v1790_v50 = vadd.f32 %v4769_v14, %v1774_v7  ;;  %2098 = vmax.xlane.f32.xlu1 %v5105_v18  ;;  %v5121_v14 = vadd.f32 %v1807_v54, %v5044_v31  ;;  %v1524_v7 = vmul.f32 0.6, %v1516_v61  ;;  %v2344_v54 = vmul.f32 0.6, %v2336_v17 }
 0x322   : > { %v5112_v5 = vadd.f32 %v1250_v8, %v5107_v10  ;;  %v2073_v59 = vmul.f32 0.6, %v2065_v39 }
 0x323   : > { %v1798_v56 = vmul.f32 0.6, %v1790_v50  ;;  %v1532_v51 = vmax.f32 %v1516_v61, %v1524_v7 }
 0x324   : > { %1272 = vmax.xlane.f32.xlu0 %v5112_v5  ;;  %v2081_v0 = vmax.f32 %v2065_v39, %v2073_v59  ;;  %v1263_v39 = vpop.xlane.xlu0 %1262 }
 0x325   : > { %v1806_v32 = vmax.f32 %v1790_v50, %v1798_v56  ;;  %1274 = vmax.xlane.f32.xlu1 %v5116_v36  ;;  %v2048_v43 = vpop.permute.xlu1 %2047  ;;  %v5137_v50 = vadd.f32 %v1532_v51, %v5107_v10  ;;  %v2352_v56 = vmax.f32 %v2336_v17, %v2344_v54 }
 0x326   : > { %v2064_v53 = vadd.f32 %v4816_v58, %v2048_v43  ;;  %v2337_v58 = vadd.f32 %v4861_v19, %v4999_v3  ;;  %v5147_v57 = vadd.f32 %v2081_v0, %v5044_v31 }
 0x327   : > { %v5125_v42 = vadd.f32 %v1806_v32, %v5107_v10  ;;  %v5151_v43 = vadd.f32 %v2352_v56, %v4992_v38 }
 0x328   : > { %v2072_v28 = vmul.f32 0.6, %v2064_v53  ;;  %v2345_v40 = vmul.f32 0.6, %v2337_v58 }
 0x329   : > { %1830 = vmax.xlane.f32.xlu1 %v5121_v14  ;;  %1828 = vmax.xlane.f32.xlu0 %v5125_v42  ;;  %6121 = vst [vmem:[#allocation68_spill] sm:$0xff] %v5151_v43 }
 0x32a   : > { %v2080_v8 = vmax.f32 %v2064_v53, %v2072_v28  ;;  %v2353_v32 = vmax.f32 %v2337_v58, %v2345_v40  ;;  %v2322_v7 = vpop.permute.xlu1 %2321  ;;  %v5163_v28 = vpop.xlane.xlu0 %1818 }
 0x32b   : > { %v2338_v46 = vadd.f32 %v4861_v19, %v2322_v7  ;;  %v2339_v7 = vadd.f32 %v4861_v19, %v5070_v63 }
 0x32c   : > { %v5143_v61 = vadd.f32 %v2080_v8, %v5107_v10  ;;  %v5157_v3 = vadd.f32 %v2353_v32, %v4924_v30 }
 0x32d   : > { %1054 = vmax.xlane.f32.xlu1 %v5131_v27  ;;  %v2346_v53 = vmul.f32 0.6, %v2338_v46 }
 0x32e   : > { %v1043_v8 = vpop.xlane.xlu0 %1042 }
 0x32f   : > { %v2354_v51 = vmax.f32 %v2338_v46, %v2346_v53  ;;  %v5165_v59 = vpop.permute.xlu1 %2595  ;;  %v1058_v58 = vsub.f32 %v4820_v20, %v1043_v8 }
 0x330   : > { %6122 = vst [vmem:[#allocation69_spill] sm:$0xff] %v5165_v59 }
 0x331   : > { %1554 = vmax.xlane.f32.xlu1 %v5137_v50  ;;  %v5168_v17 = vadd.f32 %v2354_v51, %v5107_v10  ;;  %v1066_v40 = vmul.f32 1.442695, %v1058_v58  ;;  %v1277_v58 = vsub.f32 %v4780_v62, %v1263_v39 }
 0x332   : > { %v5174_v54 = vpop.xlane.xlu0 %1542 }
 0x333   : > { %6123 = vst [vmem:[#allocation70_spill] sm:$0xff] %v5168_v17  ;;  %3949 = vpow2.f32 %v1066_v40 }
 0x334   : > { %v5172_v0 = vpop.permute.xlu1 %2869 }
 0x335   : > { %2102 = vmax.xlane.f32.xlu1 %v5143_v61  ;;  %6124 = vst [vmem:[#allocation71_spill] sm:$0xff] %v5172_v0 }
 0x336   : > { %v5179_v51 = vpop.xlane.xlu0 %2090 }
 0x339   : > { %2104 = vmax.xlane.f32.xlu1 %v5147_v57 }
 0x33a   : > { %v5183_v20 = vpop.xlane.xlu0 %1548 }
 0x33d   : > { %2372 = vmax.xlane.f32.xlu1 %v5151_v43 }
 0x33e   : > { %v5195_v40 = vpop.xlane.xlu0 %2370 }
 0x33f   : > { %2162 = vrot.lane.b32.xlu0 %v4499_v6, %s4234_s9 }
 0x341   : > { %2374 = vmax.xlane.f32.xlu1 %v5157_v3 }
 0x342   : > { %v1265_v39 = vpop.xlane.xlu0 %1264 }
 0x352   : > { %2436 = vrot.lane.b32.xlu1 %v4499_v6, %s4236_s11  ;;  %v2347_v6 = vmul.f32 0.6, %v2339_v7 }
 0x354   : > { %v2355_v8 = vmax.f32 %v2339_v7, %v2347_v6 }
 0x356   : > { %v5193_v19 = vadd.f32 %v2355_v8, %v5044_v31  ;;  %v5202_v8 = vpop.xlane.xlu0 %1546  ;;  %v1278_v31 = vsub.f32 %v4892_v41, %v1265_v39 }
 0x358   : > { %6125 = vst [vmem:[#allocation72_spill] sm:$0xff] %v5193_v19 }
 0x35e   : > { %2376 = vmax.xlane.f32.xlu0 %v5168_v17  ;;  %v1821_v17 = vpop.xlane.xlu0 %1820 }
 0x366   : > { %v1045_v56 = vpop.xlane.xlu1 %1044 }
 0x367   : > { %v1059_v32 = vsub.f32 %v4940_v22, %v1045_v56  ;;  %v5188_v22 = vpop.eup %3949  ;;  %v1286_v56 = vmul.f32 1.442695, %v1277_v58 }
 0x369   : > { %v1068_v46 = vmul.f32 1.442695, %v1059_v32 }
 0x36a   : > { %v1545_v53 = vpop.xlane.xlu1 %1544 }
 0x36b   : > { %3951 = vpow2.f32 %v1068_v46  ;;  %v1559_v30 = vsub.f32 %v4947_v11, %v1545_v53 }
 0x36c   : > { %3953 = vpow2.f32 %v1286_v56 }
 0x36e   : > { %v5181_v10 = vpop.xlane.xlu1 %2092 }
 0x372   : > { %v5186_v0 = vpop.xlane.xlu1 %2366 }
 0x374   : > { %2164 = vrot.lane.b32.xlu0 %v4508_v9, %s4234_s9 }
 0x375   : > { %v3952_v63 = vpop.eup %3951 }
 0x376   : > { %2378 = vmax.xlane.f32.xlu1 %v5193_v19  ;;  %v1261_v32 = vpop.xlane.xlu1 %1260  ;;  %v1098_v6 = vpack.c.bf16 %v3952_v63, %v5188_v22  ;;  %v5205_v38 = vpop.eup %3953 }
 0x377   : > { %v1276_v62 = vsub.f32 %v4980_v2, %v1261_v32  ;;  %v1288_v2 = vmul.f32 1.442695, %v1278_v31 }
 0x378   : > { %3619 = vmatprep.mubr.bf16.mxu0 %v1098_v6 }
 0x379   : > { %v1284_v7 = vmul.f32 1.442695, %v1276_v62  ;;  %v1568_v62 = vmul.f32 1.442695, %v1559_v30 }
 0x37a   : > { %v1817_v46 = vpop.xlane.xlu1 %1816 }
 0x37b   : > { %3955 = vpow2.f32 %v1284_v7  ;;  %v1053_v7 = vpop.xlane.xlu0 %1052  ;;  %v1832_v11 = vsub.f32 %v4989_v16, %v1817_v46 }
 0x37c   : > { %3957 = vpow2.f32 %v1288_v2 }
 0x37e   : > { %v5200_v59 = vpop.xlane.xlu1 %2364 }
 0x37f   : > { %v5215_v31 = vpop.xlane.xlu0 %1552 }
 0x382   : > { %v1049_v58 = vpop.xlane.xlu1 %1048 }
 0x383   : > { %v1061_v53 = vsub.f32 %v5010_v55, %v1049_v58  ;;  %v5220_v30 = vpop.xlane.xlu0 %2100 }
 0x385   : > { %v3956_v19 = vpop.eup %3955 }
 0x386   : > { %v1267_v32 = vpop.xlane.xlu1 %1266  ;;  %v1316_v6 = vpack.c.bf16 %v5205_v38, %v3956_v19  ;;  %v5223_v2 = vpop.eup %3957 }
 0x387   : > { %v1279_v56 = vsub.f32 %v5025_v47, %v1267_v32  ;;  %2438 = vrot.lane.b32.xlu1 %v4508_v9, %s4236_s11  ;;  %v1840_v47 = vmul.f32 1.442695, %v1832_v11  ;;  %v1072_v32 = vmul.f32 1.442695, %v1061_v53 }
 0x388   : > { %3643 = vmatprep.mubr.bf16.mxu1 %v1316_v6 }
 0x389   : > { %v1290_v41 = vmul.f32 1.442695, %v1279_v56  ;;  %v1561_v56 = vsub.f32 %v4868_v13, %v5183_v20  ;;  %v1833_v13 = vsub.f32 %v4790_v12, %v5163_v28 }
 0x38a   : > { %v5212_v39 = vpop.xlane.xlu1 %1822 }
 0x38b   : > { %3959 = vpow2.f32 %v1290_v41  ;;  %v1269_v41 = vpop.xlane.xlu0 %1268  ;;  %v1842_v11 = vmul.f32 1.442695, %v1833_v13 }
 0x38c   : > { %3961 = vpow2.f32 %v1568_v62 }
 0x38d   : > { %3963 = vpow2.f32 %v1840_v47 }
 0x38e   : > { %v5218_v43 = vpop.xlane.xlu1 %2096  ;;  %3965 = vpow2.f32 %v1072_v32 }
 0x392   : > { %v1047_v9 = vpop.xlane.xlu1 %1046 }
 0x393   : > { %v1060_v6 = vsub.f32 %v5049_v49, %v1047_v9  ;;  %1084 = vadd.xlane.f32.xlu0 %v3952_v63  ;;  %v1572_v9 = vmul.f32 1.442695, %v1561_v56  ;;  %v1280_v49 = vsub.f32 %v5002_v37, %v1269_v41  ;;  %v1834_v63 = vsub.f32 %v4906_v45, %v1821_v17 }
 0x395   : > { %v5227_v16 = vpop.eup %3959  ;;  %v1070_v46 = vmul.f32 1.442695, %v1060_v6  ;;  %v1292_v47 = vmul.f32 1.442695, %v1280_v49  ;;  %v1844_v28 = vmul.f32 1.442695, %v1834_v63  ;;  %v1825_v6 = vpop.xlane.xlu0 %1824 }
 0x396   : > { %v5229_v55 = vpop.eup %3961  ;;  %v5231_v58 = vpop.xlane.xlu1 %2094  ;;  %v1317_v62 = vpack.c.bf16 %v5227_v16, %v5223_v2  ;;  %v6128_v49 = vld [vmem:[#allocation29_spill] sm:$0xff] }
 0x397   : > { %3967 = vpow2.f32 %v1070_v46  ;;  %1584 = vadd.xlane.f32.xlu0 %v5229_v55  ;;  %v5245_v53 = vpop.eup %3963 }
 0x398   : > { %3644 = vmatmul.mubr.bf16.vlgmr.msra.gmra.mrb[4].mxu1 %v1317_v62  ;;  %3969 = vpow2.f32 %v1572_v9  ;;  %v3966_v37 = vpop.eup %3965 }
 0x399   : > { %3676 = vmatpush3.bf16.msra.mxu1 %v4601_v24  ;;  %3971 = vpow2.f32 %v1842_v11  ;;  %v6129_v11 = vld [vmem:[#allocation59_spill] sm:$0xff] }
 0x39a   : > { %3677 = vmatprep.subr.bf16.mxu1 %v4603_v26  ;;  %v5241_v20 = vpop.xlane.xlu1 %2368  ;;  %3973 = vpow2.f32 %v1292_v47 }
 0x39b   : > { %1300 = vadd.xlane.f32.xlu0 %v3956_v19  ;;  %v1063_v19 = vsub.f32 %v4929_v1, %v1053_v7  ;;  %v1563_v7 = vsub.f32 %v4950_v23, %v5215_v31  ;;  %v1057_v31 = vpop.xlane.xlu0 %1056 }
 0x39d   : > { %3678 = vmatpush3.bf16.msra.mxu1 %v4603_v26  ;;  %v1558_v26 = vsub.f32 %v4835_v60, %v5174_v54  ;;  %v1076_v1 = vmul.f32 1.442695, %v1063_v19  ;;  %v1576_v23 = vmul.f32 1.442695, %v1563_v7  ;;  %v6132_v19 = vld [vmem:[#allocation42_spill] sm:$0xff]  ;;  %v6133_v7 = vld [vmem:[#allocation63_spill] sm:$0xff] }
 0x39e   : > { %3679 = vmatprep.subr.bf16.mxu1 %v4615_v34  ;;  %v1271_v12 = vpop.xlane.xlu1 %1270 }
 0x39f   : > { %v1281_v24 = vsub.f32 %v5078_v52, %v1271_v12  ;;  %1856 = vadd.xlane.f32.xlu0 %v5245_v53  ;;  %v1566_v60 = vmul.f32 1.442695, %v1558_v26  ;;  %v1557_v9 = vpop.xlane.xlu0 %1556 }
 0x3a1   : > { %v5251_v32 = vpop.eup %3967  ;;  %v1294_v45 = vmul.f32 1.442695, %v1281_v24  ;;  %3680 = vmatpush3.bf16.msra.mxu1 %v4615_v34  ;;  %v6130_v24 = vld [vmem:[#allocation19_spill] sm:$0xff] }
 0x3a2   : > { %3681 = vmatprep.subr.bf16.mxu1 %v4617_v35  ;;  %v5257_v17 = vpop.xlane.xlu1 %1826  ;;  %v1099_v52 = vpack.c.bf16 %v3966_v37, %v5251_v32  ;;  %v5264_v34 = vpop.eup %3969 }
 0x3a3   : > { %3975 = vpow2.f32 %v1294_v45  ;;  %1088 = vadd.xlane.f32.xlu0 %v3966_v37  ;;  %v6131_v37 = vld [vmem:[#allocation30_spill] sm:$0xff]  ;;  %v1560_v45 = vsub.f32 %v6132_v19, %v5202_v8 }
 0x3a4   : > { %3977 = vpow2.f32 %v1844_v28  ;;  %3620 = vmatmul.mubr.bf16.vlgmr.msra.gmra.mrb[32].mxu0 %v1099_v52 }
 0x3a5   : > { %3652 = vmatpush3.bf16.msra.mxu0 %v4596_v21  ;;  %3682 = vmatpush3.bf16.msra.mxu1 %v4617_v35  ;;  %3979 = vpow2.f32 %v1076_v1  ;;  %v5276_v35 = vpop.eup %3971 }
 0x3a6   : > { %3653 = vmatprep.subr.bf16.mxu0 %v4609_v29  ;;  %3683 = vmatprep.subr.bf16.mxu1 %v4631_v44  ;;  %v1051_v54 = vpop.xlane.xlu1 %1050  ;;  %3981 = vpow2.f32 %v1566_v60  ;;  %v3974_v62 = vpop.eup %3973 }
 0x3a7   : > { %v1062_v56 = vsub.f32 %v5091_v15, %v1051_v54  ;;  %1588 = vadd.xlane.f32.xlu0 %v5264_v34  ;;  %v1836_v15 = vsub.f32 %v5014_v4, %v1825_v6  ;;  %v6127_v4 = vld [vmem:[#allocation18_spill] sm:$0xff] }
 0x3a9   : > { %v1074_v46 = vmul.f32 1.442695, %v1062_v56  ;;  %3654 = vmatpush3.bf16.msra.mxu0 %v4609_v29  ;;  %3684 = vmatpush3.bf16.msra.mxu1 %v4631_v44  ;;  %v6126_v29 = vld [vmem:[#allocation56_spill] sm:$0xff]  ;;  %v1848_v63 = vmul.f32 1.442695, %v1836_v15  ;;  %v6135_v56 = vld [vmem:[#allocation23_spill] sm:$0xff] }
 0x3aa   : > { %3655 = vmatprep.subr.bf16.mxu0 %v4613_v33  ;;  %3685 = vmatprep.subr.bf16.mxu1 %v4639_v48  ;;  %v5274_v21 = vpop.xlane.xlu1 %1550  ;;  %v1835_v44 = vsub.f32 %v6126_v29, %v5212_v39  ;;  %v1570_v15 = vmul.f32 1.442695, %v1560_v45 }
 0x3ab   : > { %3983 = vpow2.f32 %v1074_v46  ;;  %1302 = vadd.xlane.f32.xlu1 %v5205_v38  ;;  %1304 = vadd.xlane.f32.xlu0 %v5223_v2 }
 0x3ac   : > { %3985 = vpow2.f32 %v1576_v23  ;;  %v1846_v39 = vmul.f32 1.442695, %v1835_v44  ;;  %v6136_v23 = vld [vmem:[#allocation12_spill] sm:$0xff] }
 0x3ad   : > { %v5283_v41 = vpop.eup %3975  ;;  %3656 = vmatpush3.bf16.msra.mxu0 %v4613_v33  ;;  %3686 = vmatpush3.bf16.msra.mxu1 %v4639_v48  ;;  %v1065_v33 = vsub.f32 %v6129_v11, %v1057_v31  ;;  %3987 = vpow2.f32 %v1848_v63 }
 0x3ae   : > { %v5287_v13 = vpop.eup %3977  ;;  %3657 = vmatprep.subr.bf16.mxu0 %v6127_v4  ;;  %3687 = vmatprep.subr.bf16.mxu1 %v6128_v49  ;;  %v5291_v38 = vpop.xlane.xlu1 %2098  ;;  %v1318_v2 = vpack.c.bf16 %v5283_v41, %v3974_v62  ;;  %3989 = vpow2.f32 %v1846_v39 }
 0x3af   : > { %1858 = vadd.xlane.f32.xlu1 %v5276_v35  ;;  %1860 = vadd.xlane.f32.xlu0 %v5287_v13  ;;  %v3980_v47 = vpop.eup %3979  ;;  %v1080_v1 = vmul.f32 1.442695, %v1065_v33 }
 0x3b0   : > { %3647 = vmatprep.mubr.bf16.mxu1 %v1318_v2  ;;  %v5306_v52 = vpop.eup %3981 }
 0x3b1   : > { %3658 = vmatpush3.bf16.msra.mxu0 %v6127_v4  ;;  %3688 = vmatpush3.bf16.msra.mxu1 %v6128_v49  ;;  %v1273_v48 = vpop.xlane.xlu0 %1272 }
 0x3b2   : > { %v1282_v12 = vsub.f32 %v5112_v5, %v1273_v48  ;;  %3659 = vmatprep.subr.bf16.mxu0 %v6130_v24  ;;  %3689 = vmatprep.subr.bf16.mxu1 %v6131_v37  ;;  %v1275_v28 = vpop.xlane.xlu1 %1274  ;;  %v1565_v5 = vsub.f32 %v6133_v7, %v1557_v9  ;;  %v6137_v9 = vld [vmem:[#allocation25_spill] sm:$0xff]  ;;  %v6138_v48 = vld [vmem:[#allocation31_spill] sm:$0xff]  ;;  %v6142_v7 = vld [vmem:[#allocation46_spill] sm:$0xff] }
 0x3b3   : > { %v1283_v26 = vsub.f32 %v5116_v36, %v1275_v28  ;;  %1082 = vadd.xlane.f32.xlu1 %v5188_v22  ;;  %1092 = vadd.xlane.f32.xlu0 %v3980_v47  ;;  %v6134_v36 = vld [vmem:[#allocation65_spill] sm:$0xff] }
 0x3b4   : > { %v1296_v6 = vmul.f32 1.442695, %v1282_v12  ;;  %v1837_v22 = vsub.f32 %v6134_v36, %v5257_v17  ;;  %v1580_v29 = vmul.f32 1.442695, %v1565_v5  ;;  %v6143_v5 = vld [vmem:[#allocation27_spill] sm:$0xff] }
 0x3b5   : > { %v5309_v60 = vpop.eup %3983  ;;  %v1298_v54 = vmul.f32 1.442695, %v1283_v26  ;;  %3660 = vmatpush3.bf16.msra.mxu0 %v6130_v24  ;;  %3690 = vmatpush3.bf16.msra.mxu1 %v6131_v37  ;;  %v6140_v37 = vld [vmem:[#allocation50_spill] sm:$0xff] }
 0x3b6   : > { %v5313_v8 = vpop.eup %3985  ;;  %3991 = vpow2.f32 %v1296_v6  ;;  %3661 = vmatprep.subr.bf16.mxu0 %v6135_v56  ;;  %3723 = vmatprep.subr.bf16.mxu1 %v6136_v23  ;;  %v1831_v31 = vpop.xlane.xlu1 %1830  ;;  %v1100_v46 = vpack.c.bf16 %v3980_v47, %v5309_v60  ;;  %v1850_v17 = vmul.f32 1.442695, %v1837_v22  ;;  %v2381_v28 = vsub.f32 %v6140_v37, %v5186_v0  ;;  %v6144_v22 = vld [vmem:[#allocation48_spill] sm:$0xff] }
 0x3b7   : > { %3993 = vpow2.f32 %v1298_v54  ;;  %1582 = vadd.xlane.f32.xlu1 %v5306_v52  ;;  %1592 = vadd.xlane.f32.xlu0 %v5313_v8  ;;  %v1829_v44 = vpop.xlane.xlu0 %1828  ;;  %v5327_v63 = vpop.eup %3987  ;;  %v1839_v39 = vsub.f32 %v5121_v14, %v1831_v31  ;;  %v2606_v6 = vadd.f32 %v6143_v5, %v6142_v7  ;;  %v6145_v31 = vld [vmem:[#allocation37_spill] sm:$0xff] }
 0x3b8   : > { %3995 = vpow2.f32 %v1080_v1  ;;  %3623 = vmatprep.mubr.bf16.mxu0 %v1100_v46  ;;  %v1838_v2 = vsub.f32 %v5125_v42, %v1829_v44  ;;  %v3990_v33 = vpop.eup %3989  ;;  %v6139_v42 = vld [vmem:[#allocation53_spill] sm:$0xff]  ;;  %v2390_v36 = vmul.f32 1.442695, %v2381_v28  ;;  %v2106_v46 = vsub.f32 %v6145_v31, %v5179_v51 }
 0x3b9   : > { %3662 = vmatpush3.bf16.msra.mxu0 %v6135_v56  ;;  %3997 = vpow2.f32 %v1570_v15  ;;  %v1854_v12 = vmul.f32 1.442695, %v1839_v39  ;;  %v2614_v56 = vmul.f32 0.6, %v2606_v6 }
 0x3ba   : > { %3663 = vmatprep.subr.bf16.mxu0 %v6137_v9  ;;  %v1055_v4 = vpop.xlane.xlu1 %1054  ;;  %3999 = vpow2.f32 %v1580_v29  ;;  %v1852_v47 = vmul.f32 1.442695, %v1838_v2 }
 0x3bb   : > { %v1064_v49 = vsub.f32 %v5131_v27, %v1055_v4  ;;  %1308 = vadd.xlane.f32.xlu0 %v3974_v62  ;;  %1306 = vadd.xlane.f32.xlu1 %v5227_v16  ;;  %4001 = vpow2.f32 %v1850_v17  ;;  %v1562_v27 = vsub.f32 %v5099_v25, %v5274_v21  ;;  %v2380_v62 = vsub.f32 %v6139_v42, %v5200_v59  ;;  %v6141_v25 = vld [vmem:[#allocation11_spill] sm:$0xff]  ;;  %v6149_v42 = vld [vmem:[#allocation13_spill] sm:$0xff] }
 0x3bc   : > { %v1872_v59 = vpack.c.bf16 %v5276_v35, %v5245_v53  ;;  %v1598_v17 = vpack.c.bf16 %v5229_v55, %v5306_v52  ;;  %v2622_v51 = vmax.f32 %v2606_v6, %v2614_v56  ;;  %v2114_v4 = vmul.f32 1.442695, %v2106_v46  ;;  %v6147_v52 = vld [vmem:[#allocation35_spill] sm:$0xff]  ;;  %v6157_v6 = vld [vmem:[#allocation26_spill] sm:$0xff]  ;;  %v6161_v46 = vld [vmem:[#allocation36_spill] sm:$0xff] }
 0x3bd   : > { %v1078_v11 = vmul.f32 1.442695, %v1064_v49  ;;  %3664 = vmatpush3.bf16.msra.mxu0 %v6137_v9  ;;  %v1574_v45 = vmul.f32 1.442695, %v1562_v27  ;;  %v2388_v26 = vmul.f32 1.442695, %v2380_v62 }
 0x3be   : > { %3665 = vmatprep.subr.bf16.mxu0 %v6138_v48  ;;  %v1555_v19 = vpop.xlane.xlu1 %1554 }
 0x3bf   : > { %4003 = vpow2.f32 %v1078_v11  ;;  %1864 = vadd.xlane.f32.xlu0 %v5327_v63  ;;  %1862 = vadd.xlane.f32.xlu1 %v3990_v33  ;;  %v1564_v0 = vsub.f32 %v5137_v50, %v1555_v19 }
 0x3c0   : > { %v3992_v16 = vpop.eup %3991  ;;  %4005 = vpow2.f32 %v1852_v47 }
 0x3c1   : > { %v5337_v14 = vpop.eup %3993  ;;  %3666 = vmatpush3.bf16.msra.mxu0 %v6138_v48  ;;  %4007 = vpow2.f32 %v1854_v12  ;;  %v1578_v50 = vmul.f32 1.442695, %v1564_v0  ;;  %v6152_v12 = vld [vmem:[#allocation22_spill] sm:$0xff] }
 0x3c2   : > { %v3996_v24 = vpop.eup %3995  ;;  %3699 = vmatprep.subr.bf16.mxu0 %v6141_v25  ;;  %v1319_v21 = vpack.c.bf16 %v5337_v14, %v3992_v16  ;;  %4009 = vpow2.f32 %v1574_v45  ;;  %v5359_v15 = vpop.xlane.xlu1 %2102  ;;  %v6154_v45 = vld [vmem:[#allocation34_spill] sm:$0xff] }
 0x3c3   : > { %1096 = vadd.xlane.f32.xlu0 %v3996_v24  ;;  %1086 = vadd.xlane.f32.xlu1 %v5251_v32  ;;  %v3998_v1 = vpop.eup %3997  ;;  %v2107_v32 = vsub.f32 %v6144_v22, %v5181_v10  ;;  %4011 = vpow2.f32 %v2388_v26  ;;  %v1873_v10 = vpack.c.bf16 %v3990_v33, %v5287_v13  ;;  %v6146_v13 = vld [vmem:[#allocation14_spill] sm:$0xff]  ;;  %v2110_v26 = vsub.f32 %v5105_v18, %v5291_v38  ;;  %v6159_v18 = vld [vmem:[#allocation43_spill] sm:$0xff] }
 0x3c4   : > { %3648 = vmatmul.mubr.bf16.gmra.mrb[8].mxu1 %v1319_v21  ;;  %v5350_v54 = vpop.eup %3999  ;;  %4013 = vpow2.f32 %v2390_v36  ;;  %v1599_v11 = vpack.c.bf16 %v5264_v34, %v3998_v1  ;;  %v2608_v38 = vadd.f32 %v6143_v5, %v6159_v18  ;;  %v6173_v18 = vld [vmem:[#allocation70_spill] sm:$0xff] }
 0x3c5   : > { %3691 = vmatprep.mubr.bf16.mxu1 %v1872_v59  ;;  %v4002_v53 = vpop.eup %4001  ;;  %v2116_v44 = vmul.f32 1.442695, %v2107_v32  ;;  %4015 = vpow2.f32 %v1578_v50  ;;  %v2607_v59 = vadd.f32 %v6143_v5, %v6154_v45  ;;  %v2122_v32 = vmul.f32 1.442695, %v2110_v26  ;;  %v6162_v50 = vld [vmem:[#allocation28_spill] sm:$0xff] }
 0x3c6   : > { %v1874_v9 = vpack.c.bf16 %v4002_v53, %v5327_v63  ;;  %v5373_v63 = vadd.f32 %v2622_v51, %v6147_v52  ;;  %v6165_v51 = vld [vmem:[#allocation33_spill] sm:$0xff]  ;;  %v6169_v26 = vld [vmem:[#allocation40_spill] sm:$0xff] }
 0x3c7   : > { %1596 = vadd.xlane.f32.xlu0 %v5350_v54  ;;  %1586 = vadd.xlane.f32.xlu1 %v3998_v1  ;;  %4017 = vpow2.f32 %v2116_v44  ;;  %v6155_v1 = vld [vmem:[#allocation17_spill] sm:$0xff]  ;;  %v2615_v22 = vmul.f32 0.6, %v2607_v59  ;;  %v6163_v44 = vld [vmem:[#allocation24_spill] sm:$0xff] }
 0x3c8   : > { %4019 = vpow2.f32 %v2114_v4  ;;  %v2881_v4 = vadd.f32 %v6162_v50, %v6165_v51 }
 0x3c9   : > { %v5355_v35 = vpop.eup %4003  ;;  %v2623_v31 = vmax.f32 %v2607_v59, %v2615_v22  ;;  %v6172_v22 = vld [vmem:[#allocation39_spill] sm:$0xff] }
 0x3ca   : > { %v1101_v29 = vpack.c.bf16 %v3996_v24, %v5355_v35  ;;  %v4006_v49 = vpop.eup %4005 }
 0x3cb   : > { %1312 = vadd.xlane.f32.xlu0 %v3992_v16  ;;  %1310 = vadd.xlane.f32.xlu1 %v5283_v41  ;;  %v4008_v2 = vpop.eup %4007  ;;  %v5369_v41 = vpop.xlane.xlu1 %2104 }
 0x3cc   : > { %3624 = vmatmul.mubr.bf16.gmra.mrb[36].mxu0 %v1101_v29  ;;  %3692 = vmatmul.mubr.bf16.vlgmr.msra.gmra.mrb[12].mxu1 %v1873_v10  ;;  %v4010_v55 = vpop.eup %4009  ;;  %v1875_v33 = vpack.c.bf16 %v4008_v2, %v4006_v49  ;;  %v2880_v29 = vadd.f32 %v6162_v50, %v6161_v46  ;;  %v2616_v10 = vmul.f32 0.6, %v2608_v38 }
 0x3cd   : > { %3724 = vmatpush3.bf16.msra.mxu1 %v6136_v23  ;;  %3667 = vmatprep.mubr.bf16.mxu0 %v1598_v17  ;;  %v5375_v39 = vpop.eup %4011  ;;  %v6148_v23 = vld [vmem:[#allocation16_spill] sm:$0xff]  ;;  %v1600_v27 = vpack.c.bf16 %v5313_v8, %v4010_v55  ;;  %v6151_v8 = vld [vmem:[#allocation15_spill] sm:$0xff]  ;;  %v2163_v17 = vpop.permute.xlu0 %2162 }
 0x3ce   : > { %3695 = vmatprep.mubr.bf16.mxu1 %v1874_v9  ;;  %3725 = vmatprep.subr.bf16.mxu1 %v6146_v13  ;;  %v5381_v48 = vpop.eup %4013 }
 0x3cf   : > { %1868 = vadd.xlane.f32.xlu0 %v4006_v49  ;;  %1866 = vadd.xlane.f32.xlu1 %v4002_v53  ;;  %v5384_v16 = vpop.xlane.xlu1 %2372  ;;  %v2420_v34 = vpack.c.bf16 %v5381_v48, %v5375_v39  ;;  %v4016_v62 = vpop.eup %4015  ;;  %v6160_v53 = vld [vmem:[#allocation21_spill] sm:$0xff]  ;;  %v2888_v49 = vmul.f32 0.6, %v2880_v29 }
 0x3d0   : > { %v1601_v24 = vpack.c.bf16 %v5350_v54, %v4016_v62 }
 0x3d1   : > { %3726 = vmatpush3.bf16.msra.mxu1 %v6146_v13  ;;  %v5392_v47 = vpop.eup %4017  ;;  %v2624_v13 = vmax.f32 %v2608_v38, %v2616_v10  ;;  %v6175_v10 = vld [vmem:[#allocation38_spill] sm:$0xff] }
 0x3d2   : > { %3727 = vmatprep.subr.bf16.mxu1 %v6148_v23  ;;  %v5399_v37 = vpop.eup %4019 }
 0x3d3   : > { %2638 = vmax.xlane.f32.xlu0 %v5373_v63  ;;  %1090 = vadd.xlane.f32.xlu1 %v5309_v60  ;;  %v6150_v60 = vld [vmem:[#allocation20_spill] sm:$0xff]  ;;  %v5401_v28 = vpop.xlane.xlu1 %2374  ;;  %v2146_v19 = vpack.c.bf16 %v5392_v47, %v5399_v37 }
 0x3d4   : > { %3668 = vmatmul.mubr.bf16.vlgmr.msra.gmra.mrb[40].mxu0 %v1599_v11  ;;  %3696 = vmatmul.mubr.bf16.gmra.mrb[16].mxu1 %v1875_v33  ;;  %v6167_v11 = vld [vmem:[#allocation41_spill] sm:$0xff]  ;;  %v2385_v45 = vsub.f32 %v5157_v3, %v5401_v28 }
 0x3d5   : > { %3700 = vmatpush3.bf16.msra.mxu0 %v6141_v25  ;;  %3728 = vmatpush3.bf16.msra.mxu1 %v6148_v23  ;;  %v6153_v25 = vld [vmem:[#allocation60_spill] sm:$0xff]  ;;  %v2896_v23 = vmax.f32 %v2880_v29, %v2888_v49  ;;  %v5444_v33 = vadd.f32 %v2624_v13, %v6167_v11 }
 0x3d6   : > { %3671 = vmatprep.mubr.bf16.mxu0 %v1600_v27  ;;  %3701 = vmatprep.subr.bf16.mxu0 %v6149_v42  ;;  %v2108_v21 = vsub.f32 %v6153_v25, %v5231_v58  ;;  %v6158_v58 = vld [vmem:[#allocation49_spill] sm:$0xff]  ;;  %v6168_v25 = vld [vmem:[#allocation62_spill] sm:$0xff]  ;;  %v2398_v3 = vmul.f32 1.442695, %v2385_v45 }
 0x3d7   : > { %3729 = vmatprep.subr.bf16.mxu1 %v6150_v60  ;;  %3739 = vmatprep.mubr.bf16.mxu1 %v2420_v34  ;;  %v2111_v0 = vsub.f32 %v6158_v58, %v5220_v30  ;;  %v2437_v36 = vpop.permute.xlu1 %2436  ;;  %v2113_v30 = vsub.f32 %v5147_v57, %v5369_v41  ;;  %v6164_v57 = vld [vmem:[#allocation3_spill] sm:$0xff] }
 0x3d8   : > { %1590 = vadd.xlane.f32.xlu1 %v4010_v55  ;;  %v2118_v54 = vmul.f32 1.442695, %v2108_v21  ;;  %v2382_v21 = vsub.f32 %v6168_v25, %v5241_v20  ;;  %v6171_v58 = vld [vmem:[#allocation51_spill] sm:$0xff] }
 0x3d9   : > { %3702 = vmatpush3.bf16.msra.mxu0 %v6149_v42  ;;  %3730 = vmatpush3.bf16.msra.mxu1 %v6150_v60  ;;  %v2124_v56 = vmul.f32 1.442695, %v2111_v0  ;;  %v2128_v9 = vmul.f32 1.442695, %v2113_v30  ;;  %v2609_v0 = vadd.f32 %v6143_v5, %v6171_v58  ;;  %v6174_v30 = vld [vmem:[#allocation72_spill] sm:$0xff]  ;;  %v6184_v58 = vld [vmem:[#allocation45_spill] sm:$0xff] }
 0x3da   : > { %3703 = vmatprep.subr.bf16.mxu0 %v6151_v8  ;;  %3731 = vmatprep.subr.bf16.mxu1 %v6152_v12  ;;  %4021 = vpow2.f32 %v2118_v54  ;;  %v2392_v20 = vmul.f32 1.442695, %v2382_v21 }
 0x3db   : > { %4023 = vpow2.f32 %v2122_v32 }
 0x3dc   : > { %1314 = vadd.xlane.f32.xlu1 %v5337_v14  ;;  %3672 = vmatmul.mubr.bf16.gmra.mrb[44].mxu0 %v1601_v24  ;;  %v6156_v14 = vld [vmem:[#allocation57_spill] sm:$0xff] }
 0x3dd   : > { %3704 = vmatpush3.bf16.msra.mxu0 %v6151_v8  ;;  %3732 = vmatpush3.bf16.msra.mxu1 %v6152_v12  ;;  %v2109_v7 = vsub.f32 %v6156_v14, %v5218_v43  ;;  %v5456_v12 = vadd.f32 %v2896_v23, %v6147_v52  ;;  %v6170_v14 = vld [vmem:[#allocation68_spill] sm:$0xff] }
 0x3de   : > { %3705 = vmatprep.subr.bf16.mxu0 %v6155_v1  ;;  %3715 = vmatprep.mubr.bf16.mxu0 %v2146_v19 }
 0x3df   : > { %3733 = vmatprep.subr.bf16.mxu1 %v6157_v6  ;;  %v2120_v43 = vmul.f32 1.442695, %v2109_v7  ;;  %v2384_v7 = vsub.f32 %v6170_v14, %v5384_v16  ;;  %v2883_v16 = vadd.f32 %v6162_v50, %v6172_v22 }
 0x3e0   : > { %1870 = vadd.xlane.f32.xlu1 %v4008_v2  ;;  %v6166_v2 = vld [vmem:[#allocation32_spill] sm:$0xff] }
 0x3e1   : > { %3706 = vmatpush3.bf16.msra.mxu0 %v6155_v1  ;;  %3734 = vmatpush3.bf16.msra.mxu1 %v6157_v6  ;;  %4025 = vpow2.f32 %v2120_v43  ;;  %v5440_v41 = vadd.f32 %v2623_v31, %v6166_v2  ;;  %v2383_v1 = vsub.f32 %v6169_v26, %v5195_v40  ;;  %v2617_v40 = vmul.f32 0.6, %v2609_v0 }
 0x3e2   : > { %3707 = vmatprep.subr.bf16.mxu0 %v6160_v53  ;;  %3735 = vmatprep.subr.bf16.mxu1 %v2437_v36  ;;  %4027 = vpow2.f32 %v2124_v56 }
 0x3e3   : > { %4029 = vpow2.f32 %v2128_v9  ;;  %v2394_v54 = vmul.f32 1.442695, %v2383_v1  ;;  %v2625_v32 = vmax.f32 %v2609_v0, %v2617_v40 }
 0x3e4   : > { %1094 = vadd.xlane.f32.xlu1 %v5355_v35  ;;  %v2112_v35 = vsub.f32 %v5143_v61, %v5359_v15  ;;  %v2889_v15 = vmul.f32 0.6, %v2881_v4  ;;  %v5446_v27 = vpop.eup %4021 }
 0x3e5   : > { %3708 = vmatpush3.bf16.msra.mxu0 %v6160_v53  ;;  %3736 = vmatpush3.bf16.msra.mxu1 %v2437_v36  ;;  %v5448_v42 = vpop.eup %4023  ;;  %v2396_v36 = vmul.f32 1.442695, %v2384_v7  ;;  %v2891_v53 = vmul.f32 0.6, %v2883_v16 }
 0x3e6   : > { %3709 = vmatprep.subr.bf16.mxu0 %v6163_v44  ;;  %v2126_v55 = vmul.f32 1.442695, %v2112_v35  ;;  %v2897_v8 = vmax.f32 %v2881_v4, %v2889_v15  ;;  %v6179_v15 = vld [vmem:[#allocation44_spill] sm:$0xff] }
 0x3e7   : > { %v2899_v46 = vmax.f32 %v2883_v16, %v2891_v53  ;;  %v2882_v23 = vadd.f32 %v6162_v50, %v6179_v15  ;;  %v6186_v16 = vld [vmem:[#allocation66_spill] sm:$0xff] }
 0x3e8   : > { %1594 = vadd.xlane.f32.xlu1 %v4016_v62  ;;  %4031 = vpow2.f32 %v2126_v55  ;;  %v5468_v59 = vadd.f32 %v2897_v8, %v6166_v2  ;;  %v6180_v8 = vld [vmem:[#allocation4_spill] sm:$0xff] }
 0x3e9   : > { %3710 = vmatpush3.bf16.msra.mxu0 %v6163_v44  ;;  %2698 = vrot.lane.b32.xlu0 %v6164_v57, %s4245_s15  ;;  %4033 = vpow2.f32 %v2392_v20  ;;  %v5488_v44 = vadd.f32 %v2625_v32, %v6175_v10  ;;  %v5502_v49 = vadd.f32 %v2899_v46, %v6175_v10  ;;  %v6191_v10 = vld [vmem:[#allocation54_spill] sm:$0xff] }
 0x3ea   : > { %3711 = vmatprep.subr.bf16.mxu0 %v2163_v17  ;;  %4035 = vpow2.f32 %v2398_v3 }
 0x3eb   : > { %v2377_v61 = vpop.xlane.xlu0 %2376  ;;  %v5451_v62 = vpop.eup %4025  ;;  %4037 = vpow2.f32 %v2394_v54  ;;  %6176 = vst [vmem:[#allocation56_spill] sm:$0xff] %v5502_v49  ;;  %v6185_v54 = vld [vmem:[#allocation61_spill] sm:$0xff] }
 0x3ec   : > { %2640 = vmax.xlane.f32.xlu1 %v5440_v41  ;;  %v5453_v60 = vpop.eup %4027  ;;  %v2147_v24 = vpack.c.bf16 %v5451_v62, %v5446_v27  ;;  %v2386_v38 = vsub.f32 %v6173_v18, %v2377_v61  ;;  %4039 = vpow2.f32 %v2396_v36  ;;  %v2610_v36 = vadd.f32 %v6143_v5, %v6185_v54 }
 0x3ed   : > { %3712 = vmatpush3.bf16.msra.mxu0 %v2163_v17  ;;  %v2148_v19 = vpack.c.bf16 %v5453_v60, %v5448_v42  ;;  %v5470_v52 = vpop.eup %4029  ;;  %v2613_v18 = vadd.f32 %v6143_v5, %v6186_v16 }
 0x3ee   : > { %v2400_v43 = vmul.f32 1.442695, %v2386_v38  ;;  %v2618_v22 = vmul.f32 0.6, %v2610_v36 }
 0x3ef   : > { %v2165_v34 = vpop.permute.xlu0 %2164 }
 0x3f0   : > { %2642 = vmax.xlane.f32.xlu1 %v5444_v33  ;;  %3713 = vmatprep.subr.bf16.mxu0 %v2165_v34  ;;  %4041 = vpow2.f32 %v2400_v43  ;;  %v2626_v53 = vmax.f32 %v2610_v36, %v2618_v22  ;;  %v2621_v43 = vmul.f32 0.6, %v2613_v18 }
 0x3f1   : > { %3714 = vmatpush3.bf16.msra.mxu0 %v2165_v34 }
 0x3f2   : > { %v5477_v6 = vpop.eup %4031 }
 0x3f3   : > { %v2149_v28 = vpack.c.bf16 %v5470_v52, %v5477_v6  ;;  %v5490_v17 = vpop.eup %4033 }
 0x3f4   : > { %2912 = vmax.xlane.f32.xlu1 %v5456_v12  ;;  %3716 = vmatmul.mubr.bf16.vlgmr.msra.gmra.mrb[48].mxu0 %v2147_v24  ;;  %v5492_v9 = vpop.eup %4035  ;;  %v2890_v24 = vmul.f32 0.6, %v2882_v23 }
 0x3f5   : > { %3719 = vmatprep.mubr.bf16.mxu0 %v2148_v19  ;;  %v5495_v51 = vpop.eup %4037  ;;  %v6181_v19 = vld [vmem:[#allocation47_spill] sm:$0xff] }
 0x3f6   : > { %v5499_v4 = vpop.eup %4039  ;;  %v2421_v13 = vpack.c.bf16 %v5495_v51, %v5490_v17  ;;  %v2611_v25 = vadd.f32 %v6143_v5, %v6181_v19  ;;  %v2898_v45 = vmax.f32 %v2882_v23, %v2890_v24 }
 0x3f7   : > { %v2422_v2 = vpack.c.bf16 %v5492_v9, %v5499_v4 }
 0x3f8   : > { %2914 = vmax.xlane.f32.xlu1 %v5468_v59  ;;  %v2619_v26 = vmul.f32 0.6, %v2611_v25  ;;  %v5530_v7 = vadd.f32 %v2898_v45, %v6167_v11 }
 0x3fa   : > { %v5509_v55 = vpop.eup %4041  ;;  %v2627_v14 = vmax.f32 %v2611_v25, %v2619_v26  ;;  %6182 = vst [vmem:[#allocation59_spill] sm:$0xff] %v5530_v7  ;;  %v6193_v25 = vld [vmem:[#allocation58_spill] sm:$0xff] }
 0x3fb   : > { %6177 = vst [vmem:[#allocation18_spill] sm:$0xff] %v5509_v55 }
 0x3fc   : > { %3720 = vmatmul.mubr.bf16.gmra.mrb[52].mxu0 %v2149_v28  ;;  %v5536_v0 = vadd.f32 %v2627_v14, %v6184_v58 }
 0x403   : > { %v2379_v56 = vpop.xlane.xlu1 %2378 }
 0x404   : > { %v2387_v31 = vsub.f32 %v6174_v30, %v2379_v56  ;;  %v6189_v56 = vld [vmem:[#allocation55_spill] sm:$0xff] }
 0x405   : > { %v2884_v30 = vadd.f32 %v6162_v50, %v6189_v56 }
 0x406   : > { %v2402_v29 = vmul.f32 1.442695, %v2387_v31 }
 0x407   : > { %v2439_v35 = vpop.permute.xlu1 %2438 }
 0x408   : > { %4043 = vpow2.f32 %v2402_v29  ;;  %2644 = vmax.xlane.f32.xlu0 %v5488_v44  ;;  %3737 = vmatprep.subr.bf16.mxu1 %v2439_v35  ;;  %v6190_v29 = vld [vmem:[#allocation5_spill] sm:$0xff] }
 0x409   : > { %2972 = vrot.lane.b32.xlu1 %v6164_v57, %s4246_s16  ;;  %3738 = vmatpush3.bf16.msra.mxu1 %v2439_v35  ;;  %v2885_v35 = vadd.f32 %v6162_v50, %v6191_v10  ;;  %v6198_v10 = vld [vmem:[#allocation69_spill] sm:$0xff] }
 0x40b   : > { %v2893_v24 = vmul.f32 0.6, %v2885_v35 }
 0x40c   : > { %2918 = vmax.xlane.f32.xlu0 %v5502_v49  ;;  %3740 = vmatmul.mubr.bf16.vlgmr.msra.gmra.mrb[20].mxu1 %v2421_v13  ;;  %v2629_v13 = vmax.f32 %v2613_v18, %v2621_v43  ;;  %v6203_v49 = vld [vmem:[#allocation67_spill] sm:$0xff] }
 0x40d   : > { %3743 = vmatprep.mubr.bf16.mxu1 %v2422_v2  ;;  %v2892_v2 = vmul.f32 0.6, %v2884_v30  ;;  %v2901_v54 = vmax.f32 %v2885_v35, %v2893_v24  ;;  %v2612_v35 = vadd.f32 %v6143_v5, %v6198_v10  ;;  %v6199_v24 = vld [vmem:[#allocation71_spill] sm:$0xff] }
 0x40e   : > { %v5572_v45 = vadd.f32 %v2629_v13, %v6193_v25 }
 0x40f   : > { %v2900_v19 = vmax.f32 %v2884_v30, %v2892_v2  ;;  %v5588_v18 = vadd.f32 %v2901_v54, %v6184_v58  ;;  %v2886_v58 = vadd.f32 %v6162_v50, %v6199_v24  ;;  %v6209_v24 = vld [vmem:[#allocation7_spill] sm:$0xff] }
 0x411   : > { %6197 = vst [vmem:[#allocation12_spill] sm:$0xff] %v5588_v18 }
 0x412   : > { %v5511_v61 = vpop.eup %4043 }
 0x413   : > { %6178 = vst [vmem:[#allocation29_spill] sm:$0xff] %v5511_v61  ;;  %v2423_v57 = vpack.c.bf16 %v5511_v61, %v5509_v55 }
 0x415   : > { %3744 = vmatmul.mubr.bf16.gmra.mrb[24].mxu1 %v2423_v57  ;;  %v6192_v57 = vld [vmem:[#allocation52_spill] sm:$0xff] }
 0x416   : > { %v5564_v15 = vadd.f32 %v2626_v53, %v6192_v57  ;;  %v5580_v36 = vadd.f32 %v2900_v19, %v6192_v57  ;;  %v2620_v57 = vmul.f32 0.6, %v2612_v35 }
 0x418   : > { %6194 = vst [vmem:[#allocation63_spill] sm:$0xff] %v5580_v36 }
 0x420   : > { %v5517_v34 = vpop.xlane.xlu0 %1084 }
 0x422   : > { %2700 = vrot.lane.b32.xlu0 %v6180_v8, %s4245_s15 }
 0x424   : > { %v5523_v21 = vpop.xlane.xlu0 %1584 }
 0x426   : > { %2974 = vrot.lane.b32.xlu0 %v6180_v8, %s4246_s16 }
 0x428   : > { %v5527_v1 = vpop.xlane.xlu0 %1300 }
 0x42c   : > { %v5532_v20 = vpop.xlane.xlu0 %1856 }
 0x42d   : > { %6183 = vst [vmem:[#allocation19_spill] sm:$0xff] %v5532_v20  ;;  %2916 = vmax.xlane.f32.xlu1 %v5530_v7 }
 0x430   : > { %v5538_v3 = vpop.xlane.xlu0 %1088 }
 0x431   : > { %2648 = vmax.xlane.f32.xlu1 %v5536_v0 }
 0x434   : > { %v5541_v28 = vpop.xlane.xlu0 %1588 }
 0x438   : > { %v5545_v40 = vpop.xlane.xlu0 %1304  ;;  %v5547_v11 = vpop.xlane.xlu1 %1302 }
 0x43c   : > { %v5551_v38 = vpop.xlane.xlu0 %1860  ;;  %v5553_v32 = vpop.xlane.xlu1 %1858 }
 0x43d   : > { %6187 = vst [vmem:[#allocation30_spill] sm:$0xff] %v5551_v38  ;;  %6188 = vst [vmem:[#allocation42_spill] sm:$0xff] %v5553_v32  ;;  %v2628_v32 = vmax.f32 %v2612_v35, %v2620_v57  ;;  %v2894_v38 = vmul.f32 0.6, %v2886_v58 }
 0x43f   : > { %v2902_v10 = vmax.f32 %v2886_v58, %v2894_v38  ;;  %v5614_v7 = vadd.f32 %v2628_v32, %v6203_v49  ;;  %v6206_v38 = vld [vmem:[#allocation6_spill] sm:$0xff] }
 0x440   : > { %v5557_v31 = vpop.xlane.xlu0 %1092  ;;  %v1083_v46 = vpop.xlane.xlu1 %1082 }
 0x441   : > { %6204 = vst [vmem:[#allocation53_spill] sm:$0xff] %v5614_v7 }
 0x442   : > { %2702 = vrot.lane.b32.xlu1 %v6190_v29, %s4245_s15 }
 0x444   : > { %v5566_v23 = vpop.xlane.xlu0 %1592  ;;  %v5568_v8 = vpop.xlane.xlu1 %1582 }
 0x445   : > { %2646 = vmax.xlane.f32.xlu0 %v5564_v15 }
 0x448   : > { %v5574_v26 = vpop.xlane.xlu0 %1308  ;;  %v5576_v14 = vpop.xlane.xlu1 %1306 }
 0x449   : > { %2652 = vmax.xlane.f32.xlu0 %v5572_v45 }
 0x44c   : > { %v5582_v22 = vpop.xlane.xlu0 %1864  ;;  %v5584_v16 = vpop.xlane.xlu1 %1862 }
 0x44d   : > { %6195 = vst [vmem:[#allocation65_spill] sm:$0xff] %v5582_v22  ;;  %6196 = vst [vmem:[#allocation23_spill] sm:$0xff] %v5584_v16  ;;  %2920 = vmax.xlane.f32.xlu0 %v5580_v36  ;;  %v6202_v22 = vld [vmem:[#allocation64_spill] sm:$0xff] }
 0x44e   : > { %v2887_v16 = vadd.f32 %v6162_v50, %v6202_v22  ;;  %v5622_v22 = vadd.f32 %v2902_v10, %v6203_v49 }
 0x450   : > { %v5590_v53 = vpop.xlane.xlu0 %1096  ;;  %v1087_v43 = vpop.xlane.xlu1 %1086  ;;  %v2895_v5 = vmul.f32 0.6, %v2887_v16  ;;  %6205 = vst [vmem:[#allocation50_spill] sm:$0xff] %v5622_v22 }
 0x451   : > { %2922 = vmax.xlane.f32.xlu0 %v5588_v18  ;;  %4045 = vrcp.f32 %v1087_v43 }
 0x452   : > { %v2903_v50 = vmax.f32 %v2887_v16, %v2895_v5  ;;  %4047 = vrcp.f32 %v1083_v46  ;;  %v6210_v5 = vld [vmem:[#allocation8_spill] sm:$0xff] }
 0x453   : > { %4049 = vrcp.f32 %v5538_v3 }
 0x454   : > { %v5593_v56 = vpop.xlane.xlu0 %1596  ;;  %v5595_v30 = vpop.xlane.xlu1 %1586  ;;  %4051 = vrcp.f32 %v5517_v34 }
 0x455   : > { %4053 = vrcp.f32 %v5576_v14 }
 0x456   : > { %4055 = vrcp.f32 %v5545_v40 }
 0x458   : > { %v5599_v13 = vpop.xlane.xlu0 %1312  ;;  %v5601_v2 = vpop.xlane.xlu1 %1310 }
 0x45b   : > { %v4046_v46 = vpop.eup %4045 }
 0x45c   : > { %v5605_v19 = vpop.xlane.xlu0 %1868  ;;  %v5607_v54 = vpop.xlane.xlu1 %1866 }
 0x45d   : > { %6200 = vst [vmem:[#allocation25_spill] sm:$0xff] %v5605_v19  ;;  %6201 = vst [vmem:[#allocation31_spill] sm:$0xff] %v5607_v54  ;;  %v4048_v3 = vpop.eup %4047 }
 0x460   : > { %v2639_v20 = vpop.xlane.xlu0 %2638  ;;  %v5611_v18 = vpop.xlane.xlu1 %1090 }
 0x464   : > { %v2699_v36 = vpop.permute.xlu0 %2698 }
 0x465   : > { %v5616_v61 = vpop.xlane.xlu1 %1590  ;;  %3747 = vmatprep.subr.bf16.mxu0 %v2699_v36 }
 0x466   : > { %2650 = vmax.xlane.f32.xlu1 %v5614_v7  ;;  %3748 = vmatpush3.bf16.msra.mxu0 %v2699_v36  ;;  %v5634_v36 = vadd.f32 %v2903_v50, %v6193_v25  ;;  %v2654_v25 = vsub.f32 %v5373_v63, %v2639_v20 }
 0x467   : > { %2976 = vrot.lane.b32.xlu0 %v6190_v29, %s4246_s16 }
 0x468   : > { %6207 = vst [vmem:[#allocation11_spill] sm:$0xff] %v5634_v36  ;;  %v2662_v34 = vmul.f32 1.442695, %v2654_v25 }
 0x469   : > { %v5624_v35 = vpop.xlane.xlu1 %1314 }
 0x46a   : > { %2924 = vmax.xlane.f32.xlu1 %v5622_v22  ;;  %4057 = vpow2.f32 %v2662_v34 }
 0x46b   : > { %2704 = vrot.lane.b32.xlu0 %v6206_v38, %s4245_s15  ;;  %v5629_v32 = vpop.f32.mrb[4].mxu1 }
 0x46c   : > { %v5631_v57 = vpop.f32.mrb[5].mxu1 }
 0x46d   : > { %v5636_v29 = vpop.xlane.xlu1 %1870  ;;  %v3646_v16 = vpop.f32.mrb[6].mxu1 }
 0x46e   : > { %6208 = vst [vmem:[#allocation46_spill] sm:$0xff] %v5636_v29  ;;  %2926 = vmax.xlane.f32.xlu1 %v5634_v36  ;;  %v1389_v49 = vpop.f32.mrb[7].mxu1  ;;  %v4050_v29 = vpop.eup %4049 }
 0x46f   : > { %2706 = vrot.lane.b32.xlu0 %v6209_v24, %s4245_s15  ;;  %v4052_v55 = vpop.eup %4051 }
 0x471   : > { %v5643_v58 = vpop.xlane.xlu1 %1094 }
 0x473   : > { %2980 = vrot.lane.b32.xlu0 %v6209_v24, %s4246_s16 }
 0x475   : > { %v5648_v43 = vpop.xlane.xlu1 %1594 }
 0x477   : > { %2708 = vrot.lane.b32.xlu0 %v6210_v5, %s4245_s15  ;;  %v3621_v10 = vpop.f32.mrb[32].mxu0 }
 0x478   : > { %v1172_v50 = vmul.f32 %v4046_v46, %v3621_v10  ;;  %v1136_v19 = vpop.f32.mrb[33].mxu0 }
 0x479   : > { %v1168_v54 = vmul.f32 %v4048_v3, %v1136_v19  ;;  %v2641_v36 = vpop.xlane.xlu1 %2640  ;;  %v3622_v22 = vpop.f32.mrb[34].mxu0 }
 0x47a   : > { %1186 = vst.msk [vmem:[#allocation2 + $0x10] sm:$0xff] %vm1183_vm4, %v1172_v50  ;;  %v2655_v63 = vsub.f32 %v5440_v41, %v2641_v36  ;;  %v1174_v20 = vmul.f32 %v4050_v29, %v3622_v22  ;;  %v1139_v24 = vpop.f32.mrb[35].mxu0  ;;  %v6211_v41 = vld [vmem:[#allocation9_spill] sm:$0xff] }
 0x47b   : > { %1184 = vst.msk [vmem:[#allocation2] sm:$0xff] %vm1183_vm4, %v1168_v54  ;;  %v1170_v7 = vmul.f32 %v4052_v55, %v1139_v24  ;;  %2982 = vrot.lane.b32.xlu0 %v6210_v5, %s4246_s16  ;;  %v4054_v54 = vpop.eup %4053 }
 0x47c   : > { %v2664_v19 = vmul.f32 1.442695, %v2655_v63  ;;  %1187 = vst.msk [vmem:[#allocation2 + $0x18] sm:$0xff] %vm1183_vm4, %v1174_v20  ;;  %v1424_v22 = vmul.f32 %v4054_v54, %v3646_v16  ;;  %v4056_v29 = vpop.eup %4055 }
 0x47d   : > { %1185 = vst.msk [vmem:[#allocation2 + $0x8] sm:$0xff] %vm1183_vm4, %v1170_v7  ;;  %v5661_v14 = vpop.xlane.xlu1 %2642  ;;  %v6212_v7 = vld [vmem:[#allocation10_spill] sm:$0xff]  ;;  %v5675_v25 = vpop.eup %4057  ;;  %v1422_v5 = vmul.f32 %v4056_v29, %v5629_v32 }
 0x47e   : > { %4059 = vpow2.f32 %v2664_v19 }
 0x47f   : > { %4061 = vrcp.f32 %v5547_v11  ;;  %2978 = vrot.lane.b32.xlu1 %v6206_v38, %s4246_s16  ;;  %2984 = vrot.lane.b32.xlu0 %v6211_v41, %s4246_s16 }
 0x480   : > { %4063 = vrcp.f32 %v5527_v1 }
 0x481   : > { %v2913_v55 = vpop.xlane.xlu1 %2912 }
 0x482   : > { %v2928_v40 = vsub.f32 %v5456_v12, %v2913_v55 }
 0x483   : > { %2710 = vrot.lane.b32.xlu1 %v6211_v41, %s4245_s15  ;;  %2986 = vrot.lane.b32.xlu0 %v6212_v7, %s4246_s16 }
 0x484   : > { %v2936_v11 = vmul.f32 1.442695, %v2928_v40 }
 0x485   : > { %v2915_v36 = vpop.xlane.xlu1 %2914 }
 0x486   : > { %v2929_v38 = vsub.f32 %v5468_v59, %v2915_v36  ;;  %4065 = vpow2.f32 %v2936_v11 }
 0x487   : > { %2712 = vrot.lane.b32.xlu1 %v6212_v7, %s4245_s15  ;;  %1447 = vrot.lane.b32.xlu0 %v1424_v22, %s4247_s17 }
 0x488   : > { %v5680_v12 = vpop.eup %4059  ;;  %v2938_v1 = vmul.f32 1.442695, %v2929_v38 }
 0x489   : > { %v4062_v46 = vpop.eup %4061  ;;  %v2973_v16 = vpop.permute.xlu1 %2972  ;;  %v2694_v10 = vpack.c.bf16 %v5680_v12, %v5675_v25 }
 0x48a   : > { %v1420_v59 = vmul.f32 %v4062_v46, %v1389_v49  ;;  %4067 = vpow2.f32 %v2938_v1  ;;  %3771 = vmatprep.subr.bf16.mxu1 %v2973_v16  ;;  %v4064_v3 = vpop.eup %4063 }
 0x48b   : > { %1445 = vrot.lane.b32.xlu1 %v1422_v5, %s4247_s17  ;;  %3763 = vmatprep.mubr.bf16.mxu0 %v2694_v10  ;;  %4069 = vrcp.f32 %v5599_v13  ;;  %v1418_v50 = vmul.f32 %v4064_v3, %v5631_v57 }
 0x48c   : > { %3772 = vmatpush3.bf16.msra.mxu1 %v2973_v16  ;;  %1443 = vrot.lane.b32.xlu0 %v1420_v59, %s4247_s17  ;;  %4071 = vrcp.f32 %v5624_v35 }
 0x48d   : > { %4073 = vrcp.f32 %v5574_v26 }
 0x48e   : > { %4075 = vrcp.f32 %v5601_v2 }
 0x48f   : > { %1441 = vrot.lane.b32.xlu1 %v1418_v50, %s4247_s17  ;;  %4077 = vrcp.f32 %v5643_v58 }
 0x490   : > { %v5692_v32 = vpop.eup %4065  ;;  %4079 = vrcp.f32 %v5611_v18 }
 0x491   : > { %4081 = vrcp.f32 %v5590_v53 }
 0x492   : > { %4083 = vrcp.f32 %v5557_v31 }
 0x493   : > { %4085 = vrcp.f32 %v5595_v30 }
 0x494   : > { %v5695_v49 = vpop.eup %4067  ;;  %4087 = vrcp.f32 %v5541_v28 }
 0x495   : > { %v5698_v34 = vpop.xlane.xlu0 %2644  ;;  %v2968_v13 = vpack.c.bf16 %v5695_v49, %v5692_v32  ;;  %v4070_v35 = vpop.eup %4069  ;;  %4089 = vrcp.f32 %v5568_v8 }
 0x496   : > { %v4072_v63 = vpop.eup %4071  ;;  %4091 = vrcp.f32 %v5523_v21 }
 0x497   : > { %3787 = vmatprep.mubr.bf16.mxu1 %v2968_v13  ;;  %v3649_v26 = vpop.f32.mrb[8].mxu1  ;;  %v4074_v41 = vpop.eup %4073  ;;  %4093 = vrcp.f32 %v5648_v43 }
 0x498   : > { %v1430_v57 = vmul.f32 %v4070_v35, %v3649_v26  ;;  %v1402_v2 = vpop.f32.mrb[9].mxu1  ;;  %v4076_v18 = vpop.eup %4075  ;;  %4095 = vrcp.f32 %v5593_v56 }
 0x499   : > { %v5705_v20 = vpop.xlane.xlu0 %2918  ;;  %v3650_v58 = vpop.f32.mrb[10].mxu1  ;;  %v1426_v55 = vmul.f32 %v4074_v41, %v1402_v2  ;;  %4097 = vrcp.f32 %v5616_v61 }
 0x49a   : > { %v1432_v24 = vmul.f32 %v4072_v63, %v3650_v58  ;;  %v1405_v19 = vpop.f32.mrb[11].mxu1  ;;  %1453 = vrot.lane.b32.xlu1 %v1430_v57, %s4247_s17  ;;  %v4078_v31 = vpop.eup %4077  ;;  %4099 = vrcp.f32 %v5566_v23 }
 0x49b   : > { %v1428_v40 = vmul.f32 %v4076_v18, %v1405_v19  ;;  %v4080_v22 = vpop.eup %4079 }
 0x49c   : > { %1455 = vrot.lane.b32.xlu0 %v1432_v24, %s4247_s17  ;;  %v4082_v30 = vpop.eup %4081 }
 0x49d   : > { %v2701_v53 = vpop.permute.xlu0 %2700  ;;  %v4084_v5 = vpop.eup %4083 }
 0x49e   : > { %1449 = vrot.lane.b32.xlu1 %v1426_v55, %s4247_s17  ;;  %3749 = vmatprep.subr.bf16.mxu0 %v2701_v53  ;;  %v4086_v8 = vpop.eup %4085 }
 0x49f   : > { %v3625_v7 = vpop.f32.mrb[36].mxu0  ;;  %v5712_v54 = vpop.f32.mrb[12].mxu1  ;;  %3750 = vmatpush3.bf16.msra.mxu0 %v2701_v53 }
 0x4a0   : > { %v1180_v11 = vmul.f32 %v4078_v31, %v3625_v7  ;;  %v1152_v36 = vpop.f32.mrb[37].mxu0  ;;  %v5714_v29 = vpop.f32.mrb[13].mxu1  ;;  %1451 = vrot.lane.b32.xlu0 %v1428_v40, %s4247_s17 }
 0x4a1   : > { %v1176_v38 = vmul.f32 %v4080_v22, %v1152_v36  ;;  %v2975_v1 = vpop.permute.xlu0 %2974  ;;  %v3626_v46 = vpop.f32.mrb[38].mxu0 }
 0x4a2   : > { %1190 = vst.msk [vmem:[#allocation2 + $0x30] sm:$0xff] %vm1183_vm4, %v1180_v11  ;;  %v1182_v28 = vmul.f32 %v4082_v30, %v3626_v46  ;;  %v5719_v16 = vpop.f32.mrb[14].mxu1  ;;  %v1155_v10 = vpop.f32.mrb[39].mxu0  ;;  %3773 = vmatprep.subr.bf16.mxu1 %v2975_v1 }
 0x4a3   : > { %1188 = vst.msk [vmem:[#allocation2 + $0x20] sm:$0xff] %vm1183_vm4, %v1176_v38  ;;  %v1178_v59 = vmul.f32 %v4084_v5, %v1155_v10  ;;  %v5723_v3 = vpop.f32.mrb[15].mxu1  ;;  %3774 = vmatpush3.bf16.msra.mxu1 %v2975_v1  ;;  %v4088_v57 = vpop.eup %4087 }
 0x4a4   : > { %1191 = vst.msk [vmem:[#allocation2 + $0x38] sm:$0xff] %vm1183_vm4, %v1182_v28  ;;  %v4090_v56 = vpop.eup %4089 }
 0x4a5   : > { %1189 = vst.msk [vmem:[#allocation2 + $0x28] sm:$0xff] %vm1183_vm4, %v1178_v59  ;;  %v4092_v41 = vpop.eup %4091 }
 0x4a6   : > { %v4094_v18 = vpop.eup %4093 }
 0x4a7   : > { %v3669_v50 = vpop.f32.mrb[40].mxu0  ;;  %v5729_v13 = vpop.f32.mrb[16].mxu1 }
 0x4a8   : > { %v1696_v35 = vmul.f32 %v4086_v8, %v3669_v50  ;;  %v1660_v21 = vpop.f32.mrb[41].mxu0  ;;  %v5731_v26 = vpop.f32.mrb[17].mxu1 }
 0x4a9   : > { %v3670_v2 = vpop.f32.mrb[42].mxu0  ;;  %v5734_v63 = vpop.f32.mrb[18].mxu1  ;;  %v1692_v19 = vmul.f32 %v4090_v56, %v1660_v21 }
 0x4aa   : > { %v1698_v58 = vmul.f32 %v4088_v57, %v3670_v2  ;;  %v1663_v43 = vpop.f32.mrb[43].mxu0  ;;  %v5736_v24 = vpop.f32.mrb[19].mxu1  ;;  %1719 = vrot.lane.b32.xlu0 %v1696_v35, %s4248_s18 }
 0x4ab   : > { %v1694_v55 = vmul.f32 %v4092_v41, %v1663_v43  ;;  %v4096_v31 = vpop.eup %4095 }
 0x4ac   : > { %1721 = vrot.lane.b32.xlu1 %v1698_v58, %s4248_s18  ;;  %v4098_v36 = vpop.eup %4097 }
 0x4ad   : > { %v4100_v38 = vpop.eup %4099 }
 0x4ae   : > { %1715 = vrot.lane.b32.xlu0 %v1692_v19, %s4248_s18 }
 0x4af   : > { %v3673_v53 = vpop.f32.mrb[44].mxu0 }
 0x4b0   : > { %v1704_v61 = vmul.f32 %v4094_v18, %v3673_v53  ;;  %1717 = vrot.lane.b32.xlu1 %v1694_v55, %s4248_s18  ;;  %v1676_v40 = vpop.f32.mrb[45].mxu0 }
 0x4b1   : > { %v3674_v7 = vpop.f32.mrb[46].mxu0  ;;  %v1700_v30 = vmul.f32 %v4098_v36, %v1676_v40  ;;  %v6216_v36 = vld [vmem:[#allocation59_spill] sm:$0xff] }
 0x4b2   : > { %v1706_v22 = vmul.f32 %v4096_v31, %v3674_v7  ;;  %v1679_v11 = vpop.f32.mrb[47].mxu0  ;;  %1727 = vrot.lane.b32.xlu0 %v1704_v61, %s4248_s18 }
 0x4b3   : > { %v1702_v23 = vmul.f32 %v4100_v38, %v1679_v11 }
 0x4b4   : > { %1729 = vrot.lane.b32.xlu1 %v1706_v22, %s4248_s18 }
 0x4b6   : > { %1723 = vrot.lane.b32.xlu0 %v1700_v30, %s4248_s18 }
 0x4b8   : > { %1725 = vrot.lane.b32.xlu1 %v1702_v23, %s4248_s18  ;;  %v6217_v23 = vld [vmem:[#allocation56_spill] sm:$0xff] }
 0x4ba   : > { %v5739_v1 = vpop.xlane.xlu1 %2916 }
 0x4be   : > { %v2649_v46 = vpop.xlane.xlu1 %2648 }
 0x4c2   : > { %v2703_v5 = vpop.permute.xlu1 %2702 }
 0x4c3   : > { %3751 = vmatprep.subr.bf16.mxu0 %v2703_v5 }
 0x4c4   : > { %3752 = vmatpush3.bf16.msra.mxu0 %v2703_v5 }
 0x4c7   : > { %v5741_v28 = vpop.f32.mrb[48].mxu0 }
 0x4c8   : > { %v5743_v10 = vpop.f32.mrb[49].mxu0 }
 0x4c9   : > { %v5745_v59 = vpop.f32.mrb[50].mxu0 }
 0x4ca   : > { %v5747_v8 = vpop.f32.mrb[51].mxu0 }
 0x4cf   : > { %v5749_v50 = vpop.f32.mrb[52].mxu0 }
 0x4d0   : > { %v5751_v35 = vpop.f32.mrb[53].mxu0 }
 0x4d1   : > { %v5753_v21 = vpop.f32.mrb[54].mxu0 }
 0x4d2   : > { %v2647_v57 = vpop.xlane.xlu0 %2646  ;;  %v5755_v2 = vpop.f32.mrb[55].mxu0 }
 0x4d3   : > { %v2658_v61 = vsub.f32 %v5564_v15, %v2647_v57  ;;  %v6213_v15 = vld [vmem:[#allocation53_spill] sm:$0xff] }
 0x4d5   : > { %2132 = vadd.xlane.f32.xlu0 %v5392_v47 }
 0x4d6   : > { %v2653_v58 = vpop.xlane.xlu0 %2652 }
 0x4d9   : > { %2134 = vadd.xlane.f32.xlu0 %v5446_v27 }
 0x4da   : > { %v5759_v43 = vpop.xlane.xlu0 %2920 }
 0x4dc   : > { %2130 = vadd.xlane.f32.xlu1 %v5399_v37 }
 0x4dd   : > { %2136 = vadd.xlane.f32.xlu0 %v5451_v62  ;;  %v2656_v62 = vsub.f32 %v5444_v33, %v5661_v14 }
 0x4de   : > { %v5763_v56 = vpop.xlane.xlu0 %2922 }
 0x4df   : > { %v5765_v19 = vpop.f32.mrb[20].mxu1 }
 0x4e0   : > { %2138 = vadd.xlane.f32.xlu1 %v5448_v42  ;;  %v5768_v41 = vpop.f32.mrb[21].mxu1 }
 0x4e1   : > { %v5770_v55 = vpop.f32.mrb[22].mxu1  ;;  %2140 = vadd.xlane.f32.xlu0 %v5453_v60 }
 0x4e2   : > { %v2977_v47 = vpop.permute.xlu0 %2976  ;;  %v5773_v27 = vpop.f32.mrb[23].mxu1 }
 0x4e3   : > { %3775 = vmatprep.subr.bf16.mxu1 %v2977_v47 }
 0x4e4   : > { %2142 = vadd.xlane.f32.xlu1 %v5477_v6  ;;  %3776 = vmatpush3.bf16.msra.mxu1 %v2977_v47  ;;  %v2657_v6 = vsub.f32 %v5488_v44, %v5698_v34  ;;  %v2670_v44 = vmul.f32 1.442695, %v2658_v61  ;;  %v6218_v47 = vld [vmem:[#allocation63_spill] sm:$0xff] }
 0x4e5   : > { %2144 = vadd.xlane.f32.xlu0 %v5470_v52 }
 0x4e6   : > { %v2705_v37 = vpop.permute.xlu0 %2704  ;;  %v2668_v33 = vmul.f32 1.442695, %v2657_v6 }
 0x4e7   : > { %3753 = vmatprep.subr.bf16.mxu0 %v2705_v37 }
 0x4e8   : > { %2404 = vadd.xlane.f32.xlu1 %v5375_v39  ;;  %v5778_v42 = vpop.f32.mrb[24].mxu1  ;;  %3754 = vmatpush3.bf16.msra.mxu0 %v2705_v37  ;;  %v2666_v39 = vmul.f32 1.442695, %v2656_v62  ;;  %v2932_v37 = vsub.f32 %v6218_v47, %v5759_v43  ;;  %v6222_v47 = vld [vmem:[#allocation19_spill] sm:$0xff] }
 0x4e9   : > { %v5782_v60 = vpop.f32.mrb[25].mxu1  ;;  %2406 = vadd.xlane.f32.xlu0 %v5381_v48  ;;  %v2659_v48 = vsub.f32 %v5536_v0, %v2649_v46  ;;  %v6215_v0 = vld [vmem:[#allocation29_spill] sm:$0xff]  ;;  %v2931_v46 = vsub.f32 %v6217_v23, %v5705_v20 }
 0x4ea   : > { %v2707_v18 = vpop.permute.xlu0 %2706  ;;  %v5787_v53 = vpop.f32.mrb[26].mxu1  ;;  %4101 = vpow2.f32 %v2666_v39  ;;  %v2944_v20 = vmul.f32 1.442695, %v2932_v37 }
 0x4eb   : > { %v5789_v52 = vpop.f32.mrb[27].mxu1  ;;  %3755 = vmatprep.subr.bf16.mxu0 %v2707_v18  ;;  %4103 = vpow2.f32 %v2668_v33  ;;  %v2672_v34 = vmul.f32 1.442695, %v2659_v48  ;;  %v6220_v33 = vld [vmem:[#allocation50_spill] sm:$0xff] }
 0x4ec   : > { %2408 = vadd.xlane.f32.xlu1 %v5490_v17  ;;  %3756 = vmatpush3.bf16.msra.mxu0 %v2707_v18  ;;  %v2661_v17 = vsub.f32 %v5572_v45, %v2653_v58  ;;  %4105 = vpow2.f32 %v2670_v44  ;;  %v2930_v45 = vsub.f32 %v6216_v36, %v5739_v1 }
 0x4ed   : > { %2410 = vadd.xlane.f32.xlu0 %v5495_v51  ;;  %v6214_v51 = vld [vmem:[#allocation18_spill] sm:$0xff]  ;;  %4107 = vpow2.f32 %v2672_v34 }
 0x4ee   : > { %v2981_v14 = vpop.permute.xlu0 %2980  ;;  %v2676_v11 = vmul.f32 1.442695, %v2661_v17  ;;  %v2940_v58 = vmul.f32 1.442695, %v2930_v45 }
 0x4f0   : > { %2412 = vadd.xlane.f32.xlu1 %v5499_v4 }
 0x4f1   : > { %2414 = vadd.xlane.f32.xlu0 %v5492_v9 }
 0x4f2   : > { %v2709_v40 = vpop.permute.xlu0 %2708 }
 0x4f3   : > { %v2651_v31 = vpop.xlane.xlu1 %2650  ;;  %3757 = vmatprep.subr.bf16.mxu0 %v2709_v40 }
 0x4f4   : > { %v2660_v7 = vsub.f32 %v6213_v15, %v2651_v31  ;;  %2416 = vadd.xlane.f32.xlu1 %v6214_v51  ;;  %3758 = vmatpush3.bf16.msra.mxu0 %v2709_v40  ;;  %v4102_v38 = vpop.eup %4101 }
 0x4f5   : > { %2418 = vadd.xlane.f32.xlu0 %v6215_v0  ;;  %v4104_v57 = vpop.eup %4103 }
 0x4f6   : > { %v2674_v4 = vmul.f32 1.442695, %v2660_v7  ;;  %v2983_v22 = vpop.permute.xlu0 %2982  ;;  %v4106_v6 = vpop.eup %4105  ;;  %v2695_v0 = vpack.c.bf16 %v4104_v57, %v4102_v38 }
 0x4f7   : > { %v2925_v9 = vpop.xlane.xlu1 %2924  ;;  %v4108_v39 = vpop.eup %4107 }
 0x4f8   : > { %2678 = vadd.xlane.f32.xlu1 %v5675_v25  ;;  %4109 = vpow2.f32 %v2674_v4  ;;  %v6219_v25 = vld [vmem:[#allocation12_spill] sm:$0xff]  ;;  %v2934_v48 = vsub.f32 %v6220_v33, %v2925_v9 }
 0x4f9   : > { %2680 = vadd.xlane.f32.xlu0 %v5680_v12  ;;  %4111 = vpow2.f32 %v2676_v11  ;;  %v2933_v1 = vsub.f32 %v6219_v25, %v5763_v56  ;;  %v2942_v12 = vmul.f32 1.442695, %v2931_v46  ;;  %v6221_v56 = vld [vmem:[#allocation11_spill] sm:$0xff]  ;;  %v2696_v11 = vpack.c.bf16 %v4108_v39, %v4106_v6 }
 0x4fa   : > { %v2985_v30 = vpop.permute.xlu0 %2984  ;;  %4113 = vpow2.f32 %v2940_v58  ;;  %v2948_v31 = vmul.f32 1.442695, %v2934_v48 }
 0x4fb   : > { %v2927_v5 = vpop.xlane.xlu1 %2926  ;;  %v2946_v61 = vmul.f32 1.442695, %v2933_v1  ;;  %4115 = vpow2.f32 %v2942_v12  ;;  %v6223_v1 = vld [vmem:[#allocation30_spill] sm:$0xff] }
 0x4fc   : > { %2682 = vadd.xlane.f32.xlu1 %v4102_v38  ;;  %v2935_v34 = vsub.f32 %v6221_v56, %v2927_v5  ;;  %4117 = vpow2.f32 %v2944_v20 }
 0x4fd   : > { %2684 = vadd.xlane.f32.xlu0 %v4104_v57  ;;  %4119 = vpow2.f32 %v2946_v61  ;;  %v6226_v61 = vld [vmem:[#allocation31_spill] sm:$0xff] }
 0x4fe   : > { %v2987_v62 = vpop.permute.xlu0 %2986  ;;  %v2950_v7 = vmul.f32 1.442695, %v2935_v34  ;;  %4121 = vpow2.f32 %v2948_v31  ;;  %v6228_v34 = vld [vmem:[#allocation46_spill] sm:$0xff] }
 0x4ff   : > { %v2979_v18 = vpop.permute.xlu1 %2978 }
 0x500   : > { %3777 = vmatprep.subr.bf16.mxu1 %v2979_v18  ;;  %2686 = vadd.xlane.f32.xlu1 %v4106_v6  ;;  %4123 = vpow2.f32 %v2950_v7  ;;  %v6224_v6 = vld [vmem:[#allocation42_spill] sm:$0xff] }
 0x501   : > { %3778 = vmatpush3.bf16.msra.mxu1 %v2979_v18  ;;  %2688 = vadd.xlane.f32.xlu0 %v4108_v39  ;;  %4125 = vrcp.f32 %v6222_v47  ;;  %v6225_v18 = vld [vmem:[#allocation23_spill] sm:$0xff] }
 0x502   : > { %3779 = vmatprep.subr.bf16.mxu1 %v2981_v14  ;;  %v1448_v43 = vpop.permute.xlu0 %1447  ;;  %v4110_v44 = vpop.eup %4109  ;;  %4127 = vrcp.f32 %v6223_v1 }
 0x503   : > { %1469 = vst.msk [vmem:[#allocation2 + $0x18] sm:$0xff] %vm1465_vm5, %v1448_v43  ;;  %v2711_v40 = vpop.permute.xlu1 %2710  ;;  %v4112_v17 = vpop.eup %4111  ;;  %4129 = vrcp.f32 %v6224_v6  ;;  %v6227_v43 = vld [vmem:[#allocation65_spill] sm:$0xff] }
 0x504   : > { %3759 = vmatprep.subr.bf16.mxu0 %v2711_v40  ;;  %2690 = vadd.xlane.f32.xlu1 %v4110_v44  ;;  %v2697_v38 = vpack.c.bf16 %v4112_v17, %v4110_v44  ;;  %4131 = vrcp.f32 %v6225_v18 }
 0x505   : > { %3760 = vmatpush3.bf16.msra.mxu0 %v2711_v40  ;;  %3780 = vmatpush3.bf16.msra.mxu1 %v2981_v14  ;;  %v4114_v14 = vpop.eup %4113  ;;  %4133 = vrcp.f32 %v6226_v61 }
 0x506   : > { %2692 = vadd.xlane.f32.xlu0 %v4112_v17  ;;  %3781 = vmatprep.subr.bf16.mxu1 %v2983_v22  ;;  %v1444_v15 = vpop.permute.xlu0 %1443  ;;  %v4116_v9 = vpop.eup %4115  ;;  %4135 = vrcp.f32 %v6227_v43 }
 0x507   : > { %1467 = vst.msk [vmem:[#allocation2 + $0x8] sm:$0xff] %vm1465_vm5, %v1444_v15  ;;  %v2713_v51 = vpop.permute.xlu1 %2712  ;;  %v2969_v23 = vpack.c.bf16 %v4116_v9, %v4114_v14  ;;  %4137 = vrcp.f32 %v6228_v34  ;;  %v6229_v15 = vld [vmem:[#allocation25_spill] sm:$0xff] }
 0x508   : > { %3761 = vmatprep.subr.bf16.mxu0 %v2713_v51  ;;  %2952 = vadd.xlane.f32.xlu1 %v5692_v32  ;;  %4139 = vrcp.f32 %v6229_v15 }
 0x509   : > { %3762 = vmatpush3.bf16.msra.mxu0 %v2713_v51  ;;  %3782 = vmatpush3.bf16.msra.mxu1 %v2983_v22  ;;  %v4118_v22 = vpop.eup %4117 }
 0x50a   : > { %2954 = vadd.xlane.f32.xlu0 %v5695_v49  ;;  %3783 = vmatprep.subr.bf16.mxu1 %v2985_v30  ;;  %v4120_v36 = vpop.eup %4119 }
 0x50b   : > { %v1446_v4 = vpop.permute.xlu1 %1445  ;;  %v4122_v5 = vpop.eup %4121 }
 0x50c   : > { %1468 = vst.msk [vmem:[#allocation2 + $0x10] sm:$0xff] %vm1465_vm5, %v1446_v4  ;;  %3764 = vmatmul.mubr.bf16.vlgmr.msra.gmra.mrb[56].mxu0 %v2695_v0  ;;  %2956 = vadd.xlane.f32.xlu1 %v4114_v14  ;;  %v4124_v57 = vpop.eup %4123 }
 0x50d   : > { %3767 = vmatprep.mubr.bf16.mxu0 %v2696_v11  ;;  %3784 = vmatpush3.bf16.msra.mxu1 %v2985_v30  ;;  %v2970_v30 = vpack.c.bf16 %v4120_v36, %v4118_v22  ;;  %v2971_v37 = vpack.c.bf16 %v4124_v57, %v4122_v5  ;;  %v4126_v20 = vpop.eup %4125 }
 0x50e   : > { %2958 = vadd.xlane.f32.xlu0 %v4116_v9  ;;  %3785 = vmatprep.subr.bf16.mxu1 %v2987_v62  ;;  %v1456_v32 = vpop.permute.xlu0 %1455  ;;  %v1966_v33 = vmul.f32 %v4126_v20, %v5714_v29  ;;  %v4128_v56 = vpop.eup %4127 }
 0x50f   : > { %1473 = vst.msk [vmem:[#allocation2 + $0x38] sm:$0xff] %vm1465_vm5, %v1456_v32  ;;  %v1442_v49 = vpop.permute.xlu1 %1441  ;;  %v1970_v40 = vmul.f32 %v4128_v56, %v5712_v54  ;;  %v4130_v31 = vpop.eup %4129 }
 0x510   : > { %1466 = vst.msk [vmem:[#allocation2] sm:$0xff] %vm1465_vm5, %v1442_v49  ;;  %2960 = vadd.xlane.f32.xlu1 %v4118_v22  ;;  %v1968_v29 = vmul.f32 %v4130_v31, %v5723_v3  ;;  %v4132_v51 = vpop.eup %4131 }
 0x511   : > { %3786 = vmatpush3.bf16.msra.mxu1 %v2987_v62  ;;  %v1972_v0 = vmul.f32 %v4132_v51, %v5719_v16  ;;  %v4134_v14 = vpop.eup %4133 }
 0x512   : > { %2962 = vadd.xlane.f32.xlu0 %v4120_v36  ;;  %v1452_v45 = vpop.permute.xlu0 %1451  ;;  %v1976_v4 = vmul.f32 %v4134_v14, %v5736_v24  ;;  %v4136_v54 = vpop.eup %4135 }
 0x513   : > { %1471 = vst.msk [vmem:[#allocation2 + $0x28] sm:$0xff] %vm1465_vm5, %v1452_v45  ;;  %v1454_v46 = vpop.permute.xlu1 %1453  ;;  %v1974_v11 = vmul.f32 %v4136_v54, %v5731_v26  ;;  %v4138_v9 = vpop.eup %4137 }
 0x514   : > { %1472 = vst.msk [vmem:[#allocation2 + $0x30] sm:$0xff] %vm1465_vm5, %v1454_v46  ;;  %3768 = vmatmul.mubr.bf16.gmra.mrb[60].mxu0 %v2697_v38  ;;  %3788 = vmatmul.mubr.bf16.vlgmr.msra.gmra.mrb[28].mxu1 %v2969_v23  ;;  %v1980_v32 = vmul.f32 %v4138_v9, %v5734_v63  ;;  %v4140_v3 = vpop.eup %4139 }
 0x515   : > { %2964 = vadd.xlane.f32.xlu1 %v4122_v5  ;;  %3791 = vmatprep.mubr.bf16.mxu1 %v2970_v30  ;;  %v1978_v22 = vmul.f32 %v4140_v3, %v5729_v13 }
 0x516   : > { %2966 = vadd.xlane.f32.xlu0 %v4124_v57 }
 0x517   : > { %v1450_v58 = vpop.permute.xlu1 %1449 }
 0x518   : > { %1470 = vst.msk [vmem:[#allocation2 + $0x20] sm:$0xff] %vm1465_vm5, %v1450_v58 }
 0x51c   : > { %3792 = vmatmul.mubr.bf16.gmra.mrb[32].mxu1 %v2971_v37  ;;  %v1720_v25 = vpop.permute.xlu0 %1719 }
 0x51d   : > { %1742 = vst.msk [vmem:[#allocation2 + $0x10] sm:$0xff] %vm1739_vm6, %v1720_v25 }
 0x51e   : > { %v1722_v62 = vpop.permute.xlu1 %1721 }
 0x51f   : > { %1743 = vst.msk [vmem:[#allocation2 + $0x18] sm:$0xff] %vm1739_vm6, %v1722_v62 }
 0x520   : > { %v1716_v12 = vpop.permute.xlu0 %1715 }
 0x521   : > { %1740 = vst.msk [vmem:[#allocation2] sm:$0xff] %vm1739_vm6, %v1716_v12 }
 0x522   : > { %v1718_v39 = vpop.permute.xlu1 %1717 }
 0x523   : > { %1741 = vst.msk [vmem:[#allocation2 + $0x8] sm:$0xff] %vm1739_vm6, %v1718_v39 }
 0x524   : > { %v1728_v48 = vpop.permute.xlu0 %1727 }
 0x525   : > { %1746 = vst.msk [vmem:[#allocation2 + $0x30] sm:$0xff] %vm1739_vm6, %v1728_v48 }
 0x526   : > { %1989 = vrot.lane.b32.xlu1 %v1966_v33, %s4249_s19  ;;  %v1730_v44 = vpop.permute.xlu1 %1729 }
 0x527   : > { %1747 = vst.msk [vmem:[#allocation2 + $0x38] sm:$0xff] %vm1739_vm6, %v1730_v44 }
 0x528   : > { %v1724_v17 = vpop.permute.xlu0 %1723 }
 0x529   : > { %1744 = vst.msk [vmem:[#allocation2 + $0x20] sm:$0xff] %vm1739_vm6, %v1724_v17 }
 0x52a   : > { %1993 = vrot.lane.b32.xlu1 %v1970_v40, %s4249_s19  ;;  %v1726_v7 = vpop.permute.xlu1 %1725 }
 0x52b   : > { %1745 = vst.msk [vmem:[#allocation2 + $0x28] sm:$0xff] %vm1739_vm6, %v1726_v7 }
 0x52c   : > { %1991 = vrot.lane.b32.xlu0 %v1968_v29, %s4249_s19 }
 0x52e   : > { %1995 = vrot.lane.b32.xlu1 %v1972_v0, %s4249_s19 }
 0x530   : > { %1999 = vrot.lane.b32.xlu0 %v1976_v4, %s4249_s19 }
 0x532   : > { %1997 = vrot.lane.b32.xlu1 %v1974_v11, %s4249_s19 }
 0x534   : > { %2003 = vrot.lane.b32.xlu0 %v1980_v32, %s4249_s19 }
 0x536   : > { %2001 = vrot.lane.b32.xlu1 %v1978_v22, %s4249_s19 }
 0x562   : > { %v2133_v49 = vpop.xlane.xlu0 %2132 }
 0x563   : > { %4141 = vrcp.f32 %v2133_v49 }
 0x566   : > { %v2135_v16 = vpop.xlane.xlu0 %2134 }
 0x569   : > { %v2131_v36 = vpop.xlane.xlu1 %2130 }
 0x56a   : > { %4143 = vrcp.f32 %v2131_v36  ;;  %v2137_v24 = vpop.xlane.xlu0 %2136 }
 0x56b   : > { %4145 = vrcp.f32 %v2137_v24 }
 0x56c   : > { %4147 = vrcp.f32 %v2135_v16 }
 0x56d   : > { %v4142_v45 = vpop.eup %4141  ;;  %v2139_v26 = vpop.xlane.xlu1 %2138 }
 0x56e   : > { %v2141_v38 = vpop.xlane.xlu0 %2140  ;;  %v2242_v23 = vmul.f32 %v4142_v45, %v5747_v8 }
 0x56f   : > { %4149 = vrcp.f32 %v2141_v38 }
 0x570   : > { %4151 = vrcp.f32 %v2139_v26  ;;  %2265 = vrot.lane.b32.xlu0 %v2242_v23, %s4250_s20 }
 0x571   : > { %v2143_v13 = vpop.xlane.xlu1 %2142 }
 0x572   : > { %v2145_v63 = vpop.xlane.xlu0 %2144 }
 0x573   : > { %4153 = vrcp.f32 %v2145_v63 }
 0x574   : > { %v4144_v46 = vpop.eup %4143  ;;  %4155 = vrcp.f32 %v2143_v13 }
 0x575   : > { %v4146_v30 = vpop.eup %4145  ;;  %v2405_v5 = vpop.xlane.xlu1 %2404  ;;  %v2240_v57 = vmul.f32 %v4144_v46, %v5743_v10 }
 0x576   : > { %v4148_v58 = vpop.eup %4147  ;;  %v2407_v47 = vpop.xlane.xlu0 %2406  ;;  %v2246_v37 = vmul.f32 %v4146_v30, %v5745_v59 }
 0x577   : > { %4157 = vrcp.f32 %v2407_v47  ;;  %2263 = vrot.lane.b32.xlu1 %v2240_v57, %s4250_s20  ;;  %v2244_v1 = vmul.f32 %v4148_v58, %v5741_v28 }
 0x578   : > { %4159 = vrcp.f32 %v2405_v5  ;;  %2269 = vrot.lane.b32.xlu0 %v2246_v37, %s4250_s20 }
 0x579   : > { %v4150_v8 = vpop.eup %4149  ;;  %v2409_v25 = vpop.xlane.xlu1 %2408 }
 0x57a   : > { %v4152_v62 = vpop.eup %4151  ;;  %v2411_v6 = vpop.xlane.xlu0 %2410  ;;  %v2250_v12 = vmul.f32 %v4150_v8, %v5755_v2 }
 0x57b   : > { %4161 = vrcp.f32 %v2411_v6  ;;  %2267 = vrot.lane.b32.xlu1 %v2244_v1, %s4250_s20  ;;  %v2248_v18 = vmul.f32 %v4152_v62, %v5751_v35 }
 0x57c   : > { %4163 = vrcp.f32 %v2409_v25  ;;  %2273 = vrot.lane.b32.xlu0 %v2250_v12, %s4250_s20 }
 0x57d   : > { %v4154_v10 = vpop.eup %4153  ;;  %v2413_v59 = vpop.xlane.xlu1 %2412 }
 0x57e   : > { %v4156_v39 = vpop.eup %4155  ;;  %v2415_v20 = vpop.xlane.xlu0 %2414  ;;  %v2254_v61 = vmul.f32 %v4154_v10, %v5753_v21 }
 0x57f   : > { %4165 = vrcp.f32 %v2415_v20  ;;  %2271 = vrot.lane.b32.xlu1 %v2248_v18, %s4250_s20  ;;  %v2252_v33 = vmul.f32 %v4156_v39, %v5749_v50 }
 0x580   : > { %4167 = vrcp.f32 %v2413_v59  ;;  %2277 = vrot.lane.b32.xlu0 %v2254_v61, %s4250_s20 }
 0x581   : > { %v4158_v28 = vpop.eup %4157  ;;  %v2417_v2 = vpop.xlane.xlu1 %2416 }
 0x582   : > { %v4160_v48 = vpop.eup %4159  ;;  %v2419_v43 = vpop.xlane.xlu0 %2418  ;;  %v2516_v44 = vmul.f32 %v4158_v28, %v5773_v27 }
 0x583   : > { %4169 = vrcp.f32 %v2419_v43  ;;  %2275 = vrot.lane.b32.xlu1 %v2252_v33, %s4250_s20  ;;  %v2514_v56 = vmul.f32 %v4160_v48, %v5768_v41 }
 0x584   : > { %4171 = vrcp.f32 %v2417_v2  ;;  %2539 = vrot.lane.b32.xlu0 %v2516_v44, %s4251_s23 }
 0x585   : > { %v4162_v35 = vpop.eup %4161  ;;  %v2679_v21 = vpop.xlane.xlu1 %2678 }
 0x586   : > { %v4164_v34 = vpop.eup %4163  ;;  %v2681_v40 = vpop.xlane.xlu0 %2680  ;;  %v2520_v17 = vmul.f32 %v4162_v35, %v5770_v55 }
 0x587   : > { %2537 = vrot.lane.b32.xlu1 %v2514_v56, %s4251_s23  ;;  %v2518_v27 = vmul.f32 %v4164_v34, %v5765_v19 }
 0x588   : > { %2543 = vrot.lane.b32.xlu0 %v2520_v17, %s4251_s23 }
 0x589   : > { %v4166_v50 = vpop.eup %4165  ;;  %v2683_v31 = vpop.xlane.xlu1 %2682 }
 0x58a   : > { %v4168_v15 = vpop.eup %4167  ;;  %v2685_v29 = vpop.xlane.xlu0 %2684  ;;  %v2524_v7 = vmul.f32 %v4166_v50, %v5789_v52  ;;  %4173 = vrcp.f32 %v2683_v31 }
 0x58b   : > { %2541 = vrot.lane.b32.xlu1 %v2518_v27, %s4251_s23  ;;  %v2522_v41 = vmul.f32 %v4168_v15, %v5782_v60  ;;  %4175 = vrcp.f32 %v2679_v21 }
 0x58c   : > { %2547 = vrot.lane.b32.xlu0 %v2524_v7, %s4251_s23  ;;  %4177 = vrcp.f32 %v2685_v29 }
 0x58d   : > { %v4170_v51 = vpop.eup %4169  ;;  %v2687_v0 = vpop.xlane.xlu1 %2686  ;;  %4179 = vrcp.f32 %v2681_v40 }
 0x58e   : > { %v4172_v14 = vpop.eup %4171  ;;  %v2689_v4 = vpop.xlane.xlu0 %2688  ;;  %v2528_v55 = vmul.f32 %v4170_v51, %v5787_v53  ;;  %4181 = vrcp.f32 %v2687_v0 }
 0x58f   : > { %2545 = vrot.lane.b32.xlu1 %v2522_v41, %s4251_s23  ;;  %v2526_v11 = vmul.f32 %v4172_v14, %v5778_v42  ;;  %4183 = vrcp.f32 %v2689_v4 }
 0x590   : > { %2551 = vrot.lane.b32.xlu0 %v2528_v55, %s4251_s23 }
 0x591   : > { %v2691_v54 = vpop.xlane.xlu1 %2690 }
 0x592   : > { %4185 = vrcp.f32 %v2691_v54 }
 0x593   : > { %v2693_v19 = vpop.xlane.xlu0 %2692  ;;  %2549 = vrot.lane.b32.xlu1 %v2526_v11, %s4251_s23 }
 0x594   : > { %4187 = vrcp.f32 %v2693_v19  ;;  %v4174_v13 = vpop.eup %4173 }
 0x595   : > { %v2953_v9 = vpop.xlane.xlu1 %2952  ;;  %v4176_v46 = vpop.eup %4175 }
 0x596   : > { %v4178_v57 = vpop.eup %4177 }
 0x597   : > { %v2955_v32 = vpop.xlane.xlu0 %2954  ;;  %v4180_v37 = vpop.eup %4179 }
 0x598   : > { %v4182_v62 = vpop.eup %4181 }
 0x599   : > { %v2957_v52 = vpop.xlane.xlu1 %2956  ;;  %v4184_v12 = vpop.eup %4183 }
 0x59a   : > { %4189 = vrcp.f32 %v2957_v52 }
 0x59b   : > { %v2959_v3 = vpop.xlane.xlu0 %2958  ;;  %4191 = vrcp.f32 %v2953_v9 }
 0x59c   : > { %4193 = vrcp.f32 %v2959_v3  ;;  %v4186_v10 = vpop.eup %4185 }
 0x59d   : > { %v2961_v22 = vpop.xlane.xlu1 %2960  ;;  %4195 = vrcp.f32 %v2955_v32 }
 0x59e   : > { %v4188_v59 = vpop.eup %4187 }
 0x59f   : > { %v5871_v49 = vpop.xlane.xlu0 %2962 }
 0x5a2   : > { %v2965_v16 = vpop.xlane.xlu1 %2964 }
 0x5a3   : > { %v2967_v60 = vpop.xlane.xlu0 %2966  ;;  %4197 = vrcp.f32 %v2965_v16 }
 0x5a4   : > { %v4190_v18 = vpop.eup %4189  ;;  %4199 = vrcp.f32 %v2961_v22 }
 0x5a5   : > { %v4192_v61 = vpop.eup %4191  ;;  %4201 = vrcp.f32 %v2967_v60 }
 0x5a6   : > { %v1990_v36 = vpop.permute.xlu1 %1989  ;;  %v4194_v43 = vpop.eup %4193  ;;  %4203 = vrcp.f32 %v5871_v49 }
 0x5a7   : > { %2014 = vst.msk [vmem:[#allocation2] sm:$0xff] %vm2013_vm7, %v1990_v36  ;;  %v1992_v53 = vpop.permute.xlu0 %1991  ;;  %v4196_v34 = vpop.eup %4195 }
 0x5a8   : > { %2015 = vst.msk [vmem:[#allocation2 + $0x8] sm:$0xff] %vm2013_vm7, %v1992_v53 }
 0x5aa   : > { %v1994_v24 = vpop.permute.xlu1 %1993 }
 0x5ab   : > { %2016 = vst.msk [vmem:[#allocation2 + $0x10] sm:$0xff] %vm2013_vm7, %v1994_v24  ;;  %v2000_v42 = vpop.permute.xlu0 %1999 }
 0x5ac   : > { %2019 = vst.msk [vmem:[#allocation2 + $0x28] sm:$0xff] %vm2013_vm7, %v2000_v42 }
 0x5ad   : > { %v4198_v41 = vpop.eup %4197 }
 0x5ae   : > { %v1996_v45 = vpop.permute.xlu1 %1995  ;;  %v4200_v4 = vpop.eup %4199 }
 0x5af   : > { %2017 = vst.msk [vmem:[#allocation2 + $0x18] sm:$0xff] %vm2013_vm7, %v1996_v45  ;;  %v2004_v26 = vpop.permute.xlu0 %2003  ;;  %v4202_v11 = vpop.eup %4201 }
 0x5b0   : > { %2021 = vst.msk [vmem:[#allocation2 + $0x38] sm:$0xff] %vm2013_vm7, %v2004_v26  ;;  %v4204_v32 = vpop.eup %4203 }
 0x5b2   : > { %v1998_v38 = vpop.permute.xlu1 %1997 }
 0x5b3   : > { %2018 = vst.msk [vmem:[#allocation2 + $0x20] sm:$0xff] %vm2013_vm7, %v1998_v38 }
 0x5b6   : > { %v2002_v23 = vpop.permute.xlu1 %2001 }
 0x5b7   : > { %2020 = vst.msk [vmem:[#allocation2 + $0x30] sm:$0xff] %vm2013_vm7, %v2002_v23 }
 0x5df   : > { %v3765_v63 = vpop.f32.mrb[56].mxu0 }
 0x5e0   : > { %v2792_v30 = vmul.f32 %v4174_v13, %v3765_v63  ;;  %v2756_v5 = vpop.f32.mrb[57].mxu0 }
 0x5e1   : > { %v2788_v58 = vmul.f32 %v4176_v46, %v2756_v5  ;;  %v3766_v47 = vpop.f32.mrb[58].mxu0 }
 0x5e2   : > { %v2794_v8 = vmul.f32 %v4178_v57, %v3766_v47  ;;  %v2759_v25 = vpop.f32.mrb[59].mxu0  ;;  %v2266_v1 = vpop.permute.xlu0 %2265 }
 0x5e3   : > { %v2790_v6 = vmul.f32 %v4180_v37, %v2759_v25  ;;  %2289 = vst.msk [vmem:[#allocation2 + $0x8] sm:$0xff] %vm2287_vm8, %v2266_v1  ;;  %2811 = vrot.lane.b32.xlu1 %v2788_v58, %s4252_s24 }
 0x5e5   : > { %2813 = vrot.lane.b32.xlu0 %v2790_v6, %s4252_s24 }
 0x5e7   : > { %v3769_v39 = vpop.f32.mrb[60].mxu0  ;;  %v3789_v20 = vpop.f32.mrb[28].mxu1  ;;  %2815 = vrot.lane.b32.xlu1 %v2792_v30, %s4252_s24 }
 0x5e8   : > { %v2800_v28 = vmul.f32 %v4186_v10, %v3769_v39  ;;  %v3066_v2 = vmul.f32 %v4190_v18, %v3789_v20  ;;  %v2772_v33 = vpop.f32.mrb[61].mxu0  ;;  %v3030_v48 = vpop.f32.mrb[29].mxu1 }
 0x5e9   : > { %v2796_v44 = vmul.f32 %v4182_v62, %v2772_v33  ;;  %v3062_v35 = vmul.f32 %v4192_v61, %v3030_v48  ;;  %v3790_v21 = vpop.f32.mrb[30].mxu1  ;;  %2817 = vrot.lane.b32.xlu0 %v2794_v8, %s4252_s24  ;;  %v3770_v56 = vpop.f32.mrb[62].mxu0 }
 0x5ea   : > { %v3068_v40 = vmul.f32 %v4194_v43, %v3790_v21  ;;  %v2802_v17 = vmul.f32 %v4188_v59, %v3770_v56  ;;  %v2775_v50 = vpop.f32.mrb[63].mxu0  ;;  %v3033_v31 = vpop.f32.mrb[31].mxu1 }
 0x5eb   : > { %v2798_v27 = vmul.f32 %v4184_v12, %v2775_v50  ;;  %v3064_v15 = vmul.f32 %v4196_v34, %v3033_v31  ;;  %v2264_v29 = vpop.permute.xlu1 %2263  ;;  %v2270_v7 = vpop.permute.xlu0 %2269  ;;  %2819 = vrot.lane.b32.xlu1 %v2796_v44, %s4252_s24 }
 0x5ec   : > { %2288 = vst.msk [vmem:[#allocation2] sm:$0xff] %vm2287_vm8, %v2264_v29  ;;  %2291 = vst.msk [vmem:[#allocation2 + $0x18] sm:$0xff] %vm2287_vm8, %v2270_v7 }
 0x5ed   : > { %2821 = vrot.lane.b32.xlu0 %v2798_v27, %s4252_s24 }
 0x5ef   : > { %v2268_v51 = vpop.permute.xlu1 %2267  ;;  %v2274_v0 = vpop.permute.xlu0 %2273  ;;  %2823 = vrot.lane.b32.xlu1 %v2800_v28, %s4252_s24 }
 0x5f0   : > { %2290 = vst.msk [vmem:[#allocation2 + $0x10] sm:$0xff] %vm2287_vm8, %v2268_v51  ;;  %2293 = vst.msk [vmem:[#allocation2 + $0x28] sm:$0xff] %vm2287_vm8, %v2274_v0  ;;  %v3793_v14 = vpop.f32.mrb[32].mxu1 }
 0x5f1   : > { %v3074_v55 = vmul.f32 %v4198_v41, %v3793_v14  ;;  %v3046_v54 = vpop.f32.mrb[33].mxu1  ;;  %2825 = vrot.lane.b32.xlu0 %v2802_v17, %s4252_s24 }
 0x5f2   : > { %v3070_v19 = vmul.f32 %v4200_v4, %v3046_v54  ;;  %v3794_v9 = vpop.f32.mrb[34].mxu1 }
 0x5f3   : > { %v3076_v52 = vmul.f32 %v4202_v11, %v3794_v9  ;;  %v3049_v3 = vpop.f32.mrb[35].mxu1  ;;  %v2272_v22 = vpop.permute.xlu1 %2271  ;;  %3085 = vrot.lane.b32.xlu1 %v3062_v35, %s4253_s26 }
 0x5f4   : > { %v3072_v49 = vmul.f32 %v4204_v32, %v3049_v3  ;;  %2292 = vst.msk [vmem:[#allocation2 + $0x20] sm:$0xff] %vm2287_vm8, %v2272_v22  ;;  %v2278_v16 = vpop.permute.xlu0 %2277 }
 0x5f5   : > { %2295 = vst.msk [vmem:[#allocation2 + $0x38] sm:$0xff] %vm2287_vm8, %v2278_v16  ;;  %3087 = vrot.lane.b32.xlu0 %v3064_v15, %s4253_s26 }
 0x5f7   : > { %v2276_v60 = vpop.permute.xlu1 %2275  ;;  %3089 = vrot.lane.b32.xlu1 %v3066_v2, %s4253_s26 }
 0x5f8   : > { %2294 = vst.msk [vmem:[#allocation2 + $0x30] sm:$0xff] %vm2287_vm8, %v2276_v60  ;;  %v2540_v36 = vpop.permute.xlu0 %2539 }
 0x5f9   : > { %2563 = vst.msk [vmem:[#allocation2 + $0x8] sm:$0xff] %vm2561_vm9, %v2540_v36  ;;  %3091 = vrot.lane.b32.xlu0 %v3068_v40, %s4253_s26 }
 0x5fb   : > { %v2538_v53 = vpop.permute.xlu1 %2537  ;;  %3093 = vrot.lane.b32.xlu1 %v3070_v19, %s4253_s26 }
 0x5fc   : > { %2562 = vst.msk [vmem:[#allocation2] sm:$0xff] %vm2561_vm9, %v2538_v53  ;;  %v2544_v24 = vpop.permute.xlu0 %2543 }
 0x5fd   : > { %2565 = vst.msk [vmem:[#allocation2 + $0x18] sm:$0xff] %vm2561_vm9, %v2544_v24  ;;  %3095 = vrot.lane.b32.xlu0 %v3072_v49, %s4253_s26 }
 0x5ff   : > { %v2542_v42 = vpop.permute.xlu1 %2541  ;;  %3097 = vrot.lane.b32.xlu1 %v3074_v55, %s4253_s26 }
 0x600   : > { %2564 = vst.msk [vmem:[#allocation2 + $0x10] sm:$0xff] %vm2561_vm9, %v2542_v42  ;;  %v2548_v45 = vpop.permute.xlu0 %2547 }
 0x601   : > { %2567 = vst.msk [vmem:[#allocation2 + $0x28] sm:$0xff] %vm2561_vm9, %v2548_v45  ;;  %3099 = vrot.lane.b32.xlu0 %v3076_v52, %s4253_s26 }
 0x603   : > { %v2546_v26 = vpop.permute.xlu1 %2545 }
 0x604   : > { %2566 = vst.msk [vmem:[#allocation2 + $0x20] sm:$0xff] %vm2561_vm9, %v2546_v26  ;;  %v2552_v38 = vpop.permute.xlu0 %2551 }
 0x605   : > { %2569 = vst.msk [vmem:[#allocation2 + $0x38] sm:$0xff] %vm2561_vm9, %v2552_v38 }
 0x607   : > { %v2550_v23 = vpop.permute.xlu1 %2549 }
 0x608   : > { %2568 = vst.msk [vmem:[#allocation2 + $0x30] sm:$0xff] %vm2561_vm9, %v2550_v23 }
 0x655   : > { %v2812_v13 = vpop.permute.xlu1 %2811 }
 0x656   : > { %2836 = vst.msk [vmem:[#allocation2] sm:$0xff] %vm2835_vm10, %v2812_v13 }
 0x657   : > { %v2814_v63 = vpop.permute.xlu0 %2813 }
 0x658   : > { %2837 = vst.msk [vmem:[#allocation2 + $0x8] sm:$0xff] %vm2835_vm10, %v2814_v63 }
 0x659   : > { %v2816_v46 = vpop.permute.xlu1 %2815 }
 0x65a   : > { %2838 = vst.msk [vmem:[#allocation2 + $0x10] sm:$0xff] %vm2835_vm10, %v2816_v46 }
 0x65b   : > { %v2818_v30 = vpop.permute.xlu0 %2817 }
 0x65c   : > { %2839 = vst.msk [vmem:[#allocation2 + $0x18] sm:$0xff] %vm2835_vm10, %v2818_v30 }
 0x65d   : > { %v2820_v5 = vpop.permute.xlu1 %2819 }
 0x65e   : > { %2840 = vst.msk [vmem:[#allocation2 + $0x20] sm:$0xff] %vm2835_vm10, %v2820_v5 }
 0x65f   : > { %v2822_v57 = vpop.permute.xlu0 %2821 }
 0x660   : > { %2841 = vst.msk [vmem:[#allocation2 + $0x28] sm:$0xff] %vm2835_vm10, %v2822_v57 }
 0x661   : > { %v2824_v58 = vpop.permute.xlu1 %2823 }
 0x662   : > { %2842 = vst.msk [vmem:[#allocation2 + $0x30] sm:$0xff] %vm2835_vm10, %v2824_v58 }
 0x663   : > { %v2826_v47 = vpop.permute.xlu0 %2825 }
 0x664   : > { %2843 = vst.msk [vmem:[#allocation2 + $0x38] sm:$0xff] %vm2835_vm10, %v2826_v47 }
 0x665   : > { %v3086_v37 = vpop.permute.xlu1 %3085 }
 0x666   : > { %3110 = vst.msk [vmem:[#allocation2] sm:$0xff] %vm3109_vm11, %v3086_v37 }
 0x667   : > { %v3088_v8 = vpop.permute.xlu0 %3087 }
 0x668   : > { %3111 = vst.msk [vmem:[#allocation2 + $0x8] sm:$0xff] %vm3109_vm11, %v3088_v8 }
 0x669   : > { %v3090_v25 = vpop.permute.xlu1 %3089 }
 0x66a   : > { %3112 = vst.msk [vmem:[#allocation2 + $0x10] sm:$0xff] %vm3109_vm11, %v3090_v25 }
 0x66b   : > { %v3092_v1 = vpop.permute.xlu0 %3091 }
 0x66c   : > { %3113 = vst.msk [vmem:[#allocation2 + $0x18] sm:$0xff] %vm3109_vm11, %v3092_v1 }
 0x66d   : > { %v3118_v62 = vld [vmem:[#allocation2] sm:$0xff]  ;;  %v3094_v6 = vpop.permute.xlu1 %3093 }
 0x66e   : > { %v3134_v12 = vmul.f32 1.442695, %v3118_v62  ;;  %3114 = vst.msk [vmem:[#allocation2 + $0x20] sm:$0xff] %vm3109_vm11, %v3094_v6  ;;  %vm3126_vm12 = vcmp.gt.f32.partialorder %v3118_v62, 0.0 }
 0x66f   : > { %v3119_v10 = vld [vmem:[#allocation2 + $0x8] sm:$0xff]  ;;  %v3096_v59 = vpop.permute.xlu0 %3095 }
 0x670   : > { %4205 = vpow2.f32 %v3134_v12  ;;  %v3136_v18 = vmul.f32 1.442695, %v3119_v10  ;;  %3115 = vst.msk [vmem:[#allocation2 + $0x28] sm:$0xff] %vm3109_vm11, %v3096_v59  ;;  %vm3127_vm13 = vcmp.gt.f32.partialorder %v3119_v10, 0.0 }
 0x671   : > { %v3120_v39 = vld [vmem:[#allocation2 + $0x10] sm:$0xff]  ;;  %v3098_v20 = vpop.permute.xlu1 %3097 }
 0x672   : > { %4207 = vpow2.f32 %v3136_v18  ;;  %v3138_v61 = vmul.f32 1.442695, %v3120_v39  ;;  %3116 = vst.msk [vmem:[#allocation2 + $0x30] sm:$0xff] %vm3109_vm11, %v3098_v20  ;;  %vm3128_vm14 = vcmp.gt.f32.partialorder %v3120_v39, 0.0 }
 0x673   : > { %v3121_v28 = vld [vmem:[#allocation2 + $0x18] sm:$0xff]  ;;  %v3100_v2 = vpop.permute.xlu0 %3099 }
 0x674   : > { %4209 = vpow2.f32 %v3138_v61  ;;  %v3140_v33 = vmul.f32 1.442695, %v3121_v28  ;;  %3117 = vst.msk [vmem:[#allocation2 + $0x38] sm:$0xff] %vm3109_vm11, %v3100_v2  ;;  %vm3129_vm15 = vcmp.gt.f32.partialorder %v3121_v28, 0.0 }
 0x675   : > { %v3122_v48 = vld [vmem:[#allocation2 + $0x20] sm:$0xff] }
 0x676   : > { %4211 = vpow2.f32 %v3140_v33  ;;  %v3142_v43 = vmul.f32 1.442695, %v3122_v48  ;;  %vm3130_vm0 = vcmp.gt.f32.partialorder %v3122_v48, 0.0 }
 0x677   : > { %v3123_v44 = vld [vmem:[#allocation2 + $0x28] sm:$0xff] }
 0x678   : > { %4213 = vpow2.f32 %v3142_v43  ;;  %v3144_v35 = vmul.f32 1.442695, %v3123_v44  ;;  %vm3131_vm1 = vcmp.gt.f32.partialorder %v3123_v44, 0.0 }
 0x679   : > { %v3124_v21 = vld [vmem:[#allocation2 + $0x30] sm:$0xff] }
 0x67a   : > { %v4206_v56 = vpop.eup %4205  ;;  %4215 = vpow2.f32 %v3144_v35  ;;  %v3146_v34 = vmul.f32 1.442695, %v3124_v21  ;;  %vm3132_vm3 = vcmp.gt.f32.partialorder %v3124_v21, 0.0 }
 0x67b   : > { %v3310_v40 = vadd.f32 -1.0, %v4206_v56  ;;  %v3125_v17 = vld [vmem:[#allocation2 + $0x38] sm:$0xff] }
 0x67c   : > { %v4208_v50 = vpop.eup %4207  ;;  %4217 = vpow2.f32 %v3146_v34  ;;  %v3148_v31 = vmul.f32 1.442695, %v3125_v17  ;;  %vm3133_vm4 = vcmp.gt.f32.partialorder %v3125_v17, 0.0 }
 0x67d   : > { %v3158_v27 = vsel %vm3126_vm12, %v3118_v62, %v3310_v40  ;;  %v3311_v15 = vadd.f32 -1.0, %v4208_v50 }
 0x67e   : > { %v4210_v29 = vpop.eup %4209  ;;  %3166 = vst.msk [vmem:[%s5927_s30] sm:$0xff] %vm538_vm2, %v3158_v27  ;;  %4219 = vpow2.f32 %v3148_v31 }
 0x67f   : > { %v3159_v7 = vsel %vm3127_vm13, %v3119_v10, %v3311_v15  ;;  %v3312_v51 = vadd.f32 -1.0, %v4210_v29 }
 0x680   : > { %v4212_v0 = vpop.eup %4211  ;;  %3167 = vst.msk [vmem:[%s5927_s30 + $0x8] sm:$0xff] %vm538_vm2, %v3159_v7 }
 0x681   : > { %v3160_v41 = vsel %vm3128_vm14, %v3120_v39, %v3312_v51  ;;  %v3313_v14 = vadd.f32 -1.0, %v4212_v0 }
 0x682   : > { %v4214_v4 = vpop.eup %4213  ;;  %3168 = vst.msk [vmem:[%s5927_s30 + $0x10] sm:$0xff] %vm538_vm2, %v3160_v41 }
 0x683   : > { %v3161_v55 = vsel %vm3129_vm15, %v3121_v28, %v3313_v14  ;;  %v3314_v54 = vadd.f32 -1.0, %v4214_v4 }
 0x684   : > { %v4216_v11 = vpop.eup %4215  ;;  %3169 = vst.msk [vmem:[%s5927_s30 + $0x18] sm:$0xff] %vm538_vm2, %v3161_v55 }
 0x685   : > { %v3162_v19 = vsel %vm3130_vm0, %v3122_v48, %v3314_v54  ;;  %v3315_v9 = vadd.f32 -1.0, %v4216_v11 }
 0x686   : > { %v4218_v32 = vpop.eup %4217  ;;  %3170 = vst.msk [vmem:[%s5927_s30 + $0x20] sm:$0xff] %vm538_vm2, %v3162_v19 }
 0x687   : > { %v3163_v52 = vsel %vm3131_vm1, %v3123_v44, %v3315_v9  ;;  %v3316_v3 = vadd.f32 -1.0, %v4218_v32 }
 0x688   : > { %v4220_v22 = vpop.eup %4219  ;;  %3171 = vst.msk [vmem:[%s5927_s30 + $0x28] sm:$0xff] %vm538_vm2, %v3163_v52 }
 0x689   : > { %v3164_v49 = vsel %vm3132_vm3, %v3124_v21, %v3316_v3  ;;  %v3317_v16 = vadd.f32 -1.0, %v4220_v22 }
 0x68a   : > { %3172 = vst.msk [vmem:[%s5927_s30 + $0x30] sm:$0xff] %vm538_vm2, %v3164_v49 }
 0x68b   : > { %v3165_v60 = vsel %vm3133_vm4, %v3125_v17, %v3317_v16 }
 0x68c   : > { %3173 = vst.msk [vmem:[%s5927_s30 + $0x38] sm:$0xff] %vm538_vm2, %v3165_v60 }
 0x68d PF: > { %s16_s21 = sadd.s32 1, %s4227_s21  }
 0x68e   : > { %p13_p4 = scmp.ge.s32.totalorder %s16_s21, 4  }
 0x690   :  { %15 = sbr.rel (!%p13_p4) target bundleno = 1 (0x1), region = 77 }

</bundles_post_ra>
